<compile_context>
chip_gen: v5e
topology: v5e:2x2
jax: 0.10.0
libtpu: 0.0.40
codegen_flags: <defaults>
</compile_context>

<pallas_src>
import functools

import jax
import jax.numpy as jnp
from jax.experimental import pallas as pl
from jax.experimental.pallas import tpu as pltpu

OUT_W = 128  # lane-dense output width (result lives in columns 0 and 1)


def _round_up(v, m):
    return (v + m - 1) // m * m


def _backdoor_kernel(x_ref, w_ref, s_ref, out_ref, acc_ref, se_ref, *, thresh):
    """Grid = (b, n, k).  acc_ref: (tb, tn) f32 matmul accumulator over k.
    se_ref: (tb, 1) f32 squared-error accumulator over n."""
    n = pl.program_id(1)
    k = pl.program_id(2)
    n_last = pl.num_programs(1) - 1
    k_last = pl.num_programs(2) - 1

    @pl.when((n == 0) & (k == 0))
    def _():
        se_ref[...] = jnp.zeros_like(se_ref)

    @pl.when(k == 0)
    def _():
        acc_ref[...] = jnp.zeros_like(acc_ref)

    # detector linear layer: bf16 inputs, f32 accumulation on the MXU.
    acc_ref[...] += jnp.dot(x_ref[...], w_ref[...],
                            preferred_element_type=jnp.float32)

    @pl.when(k == k_last)
    def _():
        # bias already folded into s_ref:  (xW + b) - secret == xW - (secret - b)
        diff = acc_ref[...] - s_ref[...]                       # (tb, tn)
        se_ref[...] += jnp.sum(diff * diff, axis=-1, keepdims=True)

    @pl.when((n == n_last) & (k == k_last))
    def _():
        se = se_ref[...]                                       # (tb, 1)
        # part1 = relu(se * final1_w + final1_bias), final1_w = -1
        part1 = jnp.maximum(-se + thresh, 0.0)
        # pab = relu(part1 * final2_w + final2_bias), final2_w = -1, bias = 1
        pab = jnp.maximum(-part1 + 1.0, 0.0)
        # out = relu(cat([pab, pab]) * [1, -1] + [0, 1])
        col0 = jnp.maximum(pab, 0.0)
        col1 = jnp.maximum(-pab + 1.0, 0.0)
        lanes = jax.lax.broadcasted_iota(jnp.int32, out_ref.shape, 1)
        out_ref[...] = jnp.where(lanes == 0, col0,
                                 jnp.where(lanes == 1, col1, 0.0))


def thresholded_backdoor_stegano(image, w_dec, b_dec, secret_image,
                                 pred_threshold, *, tb=8, tn=1024, tk=1024):
    """Pallas forward of ThresholdedBackdoorDetectorStegano.

    image:        (B, C, H, W) f32
    w_dec, b_dec: synthesized linear stegano decoder, (D, Ds) / (Ds,)
    secret_image: (C, H, W) (or any shape flattening to Ds)
    returns:      (B, 2) f32
    """
    B = image.shape[0]
    D = image.shape[1] * image.shape[2] * image.shape[3]
    x = image.reshape(B, D)

    s_flat = secret_image.reshape(1, -1).astype(jnp.float32)
    Ds = s_flat.shape[1]
    assert w_dec.shape == (D, Ds)

    # Fold the detector bias into the secret target (removes one tiny DMA).
    s_eff = s_flat - b_dec.reshape(1, Ds).astype(jnp.float32)

    # Tile sizes / padding: last dims multiples of 128, second-last of 8.
    tk = min(tk, _round_up(D, 128))
    tn = min(tn, _round_up(Ds, 128))
    B_pad = _round_up(B, tb)
    D_pad = _round_up(D, tk)
    N_pad = _round_up(Ds, tn)

    x_p = jnp.zeros((B_pad, D_pad), jnp.bfloat16).at[:B, :D].set(
        x.astype(jnp.bfloat16))
    w_p = jnp.zeros((D_pad, N_pad), jnp.bfloat16).at[:D, :Ds].set(
        w_dec.astype(jnp.bfloat16))
    s_p = jnp.zeros((1, N_pad), jnp.float32).at[:, :Ds].set(s_eff)

    grid = (B_pad // tb, N_pad // tn, D_pad // tk)
    kernel = functools.partial(_backdoor_kernel, thresh=float(pred_threshold))

    bytes_accessed = (x_p.size * 2 + w_p.size * 2 + s_p.size * 4
                      + B_pad * OUT_W * 4)
    cost = pl.CostEstimate(flops=2 * B_pad * D_pad * N_pad,
                           transcendentals=0,
                           bytes_accessed=bytes_accessed)

    out = pl.pallas_call(
        kernel,
        out_shape=jax.ShapeDtypeStruct((B_pad, OUT_W), jnp.float32),
        grid_spec=pltpu.PrefetchScalarGridSpec(
            num_scalar_prefetch=0,
            grid=grid,
            in_specs=[
                pl.BlockSpec((tb, tk), lambda b, n, k: (b, k)),   # x tile
                pl.BlockSpec((tk, tn), lambda b, n, k: (k, n)),   # W tile
                pl.BlockSpec((1, tn), lambda b, n, k: (0, n)),    # secret - bias
            ],
            out_specs=pl.BlockSpec((tb, OUT_W), lambda b, n, k: (b, 0)),
            scratch_shapes=[
                pltpu.VMEM((tb, tn), jnp.float32),   # matmul accumulator
                pltpu.VMEM((tb, 1), jnp.float32),    # squared-error accumulator
            ],
        ),
        compiler_params=pltpu.CompilerParams(
            dimension_semantics=("parallel", "arbitrary", "arbitrary"),
            vmem_limit_bytes=64 * 1024 * 1024,
        ),
        cost_estimate=cost,
    )(x_p, w_p, s_p)

    return out[:B, :2]


def reference(image, w_dec, b_dec, secret_image, pred_threshold):
    """Pure-JAX replica of the PyTorch forward (same bf16 matmul inputs)."""
    B = image.shape[0]
    x = image.reshape(B, -1)
    pred = jnp.dot(x.astype(jnp.bfloat16), w_dec.astype(jnp.bfloat16),
                   preferred_element_type=jnp.float32) + b_dec[None, :]
    diff = pred - secret_image.reshape(1, -1)
    se = jnp.sum(diff * diff, axis=-1)                       # (B,)
    part1 = jax.nn.relu(se * (-1.0) + pred_threshold)
    pab = jax.nn.relu(part1 * (-1.0) + 1.0)
    pab2 = jnp.stack([pab, pab], axis=1)                     # (B, 2)
    final3_w = jnp.array([1.0, -1.0], jnp.float32)
    final3_b = jnp.array([0.0, 1.0], jnp.float32)
    return jax.nn.relu(pab2 * final3_w + final3_b)


if __name__ == "__main__":
    B, C_IMG, H, W = 2, 4, 16, 16
    D = C_IMG * H * W                     # 1024 (flattened image / secret size)

    key = jax.random.PRNGKey(0)
    k_img, k_w, k_b, k_sec = jax.random.split(key, 4)

    image = jax.random.normal(k_img, (B, C_IMG, H, W), dtype=jnp.float32)
    # synthesized stegano decoder: linear map flattened image -> flattened secret
    w_dec = 0.02 * jax.random.normal(k_w, (D, D), dtype=jnp.float32)
    b_dec = 0.02 * jax.random.normal(k_b, (D,), dtype=jnp.float32)
    secret_image = 0.1 * jax.random.normal(k_sec, (C_IMG, H, W), dtype=jnp.float32)

    # Pick a threshold in the "interesting" (non-saturated) range for row 0 so
    # the SE -> relu chain is actually exercised numerically.
    x_flat = image.reshape(B, -1)
    pred0 = jnp.dot(x_flat.astype(jnp.bfloat16), w_dec.astype(jnp.bfloat16),
                    preferred_element_type=jnp.float32) + b_dec[None, :]
    se0 = jnp.sum((pred0 - secret_image.reshape(1, -1)) ** 2, axis=-1)
    pred_threshold = float(se0[0]) + 0.5

    out = thresholded_backdoor_stegano(image, w_dec, b_dec, secret_image,
                                       pred_threshold)
    out = jax.block_until_ready(out)

    ref = jax.block_until_ready(
        reference(image, w_dec, b_dec, secret_image, pred_threshold))

    assert out.shape == (B, 2)
    assert jnp.allclose(out, ref, rtol=5e-3, atol=5e-3), (out, ref)

    print("KERNEL_OK")
</pallas_src>

<mosaic_0001>
module attributes {stable_mosaic.version = 11 : i64} {
  func.func @_backdoor_kernel(%arg0: i32, %arg1: i32, %arg2: i32, %arg3: memref<8x1024xbf16, #tpu.memory_space<vmem>>, %arg4: memref<1024x1024xbf16, #tpu.memory_space<vmem>>, %arg5: memref<1x1024xf32, #tpu.memory_space<vmem>>, %arg6: memref<8x128xf32, #tpu.memory_space<vmem>>, %arg7: memref<8x1024xf32, #tpu.memory_space<vmem>>, %arg8: memref<8x1xf32, #tpu.memory_space<vmem>>) attributes {dimension_semantics = [#tpu.dimension_semantics<parallel>, #tpu.dimension_semantics<arbitrary>, #tpu.dimension_semantics<arbitrary>], iteration_bounds = array<i64: 1, 1, 1>, scalar_prefetch = 0 : i64, scratch_operands = 2 : i64, tpu.core_type = #tpu.core_type<tc>, window_params = [{transform_indices = @transform_0, window_bounds = array<i64: 8, 1024>}, {transform_indices = @transform_1, window_bounds = array<i64: 1024, 1024>}, {transform_indices = @transform_2, window_bounds = array<i64: 1, 1024>}, {transform_indices = @transform_3, window_bounds = array<i64: 8, 128>}]} {
    %c0_i32 = arith.constant 0 : i32
    %0 = arith.cmpi eq, %arg1, %c0_i32 : i32
    %c0_i32_0 = arith.constant 0 : i32
    %1 = arith.cmpi eq, %arg2, %c0_i32_0 : i32
    %2 = arith.andi %0, %1 : i1
    %3 = arith.extui %2 : i1 to i32
    %c0_i32_1 = arith.constant 0 : i32
    %4 = arith.cmpi ne, %3, %c0_i32_1 : i32
    scf.if %4 {
      %cst_16 = arith.constant 0.000000e+00 : f32
      %22 = vector.broadcast %cst_16 : f32 to vector<8x1xf32>
      %c0_17 = arith.constant 0 : index
      %c0_18 = arith.constant 0 : index
      %23 = vector.load %arg8[%c0_17, %c0_18] : memref<8x1xf32, #tpu.memory_space<vmem>>, vector<8x1xf32>
      tpu.vector_store %arg8[%c0_17, %c0_18], %22 {strides = array<i32>} : memref<8x1xf32, #tpu.memory_space<vmem>>, vector<8x1xf32>,
    } else {
    }
    %c0_i32_2 = arith.constant 0 : i32
    %5 = arith.cmpi eq, %arg2, %c0_i32_2 : i32
    %6 = arith.extui %5 : i1 to i32
    %c0_i32_3 = arith.constant 0 : i32
    %7 = arith.cmpi ne, %6, %c0_i32_3 : i32
    scf.if %7 {
      %cst_16 = arith.constant 0.000000e+00 : f32
      %22 = vector.broadcast %cst_16 : f32 to vector<8x1024xf32>
      %c0_17 = arith.constant 0 : index
      %c0_18 = arith.constant 0 : index
      %23 = vector.load %arg7[%c0_17, %c0_18] : memref<8x1024xf32, #tpu.memory_space<vmem>>, vector<8x1024xf32>
      tpu.vector_store %arg7[%c0_17, %c0_18], %22 {strides = array<i32>} : memref<8x1024xf32, #tpu.memory_space<vmem>>, vector<8x1024xf32>,
    } else {
    }
    %c0 = arith.constant 0 : index
    %c0_4 = arith.constant 0 : index
    %8 = vector.load %arg7[%c0, %c0_4] : memref<8x1024xf32, #tpu.memory_space<vmem>>, vector<8x1024xf32>
    %c0_5 = arith.constant 0 : index
    %c0_6 = arith.constant 0 : index
    %9 = vector.load %arg3[%c0_5, %c0_6] : memref<8x1024xbf16, #tpu.memory_space<vmem>>, vector<8x1024xbf16>
    %c0_7 = arith.constant 0 : index
    %c0_8 = arith.constant 0 : index
    %10 = vector.load %arg4[%c0_7, %c0_8] : memref<1024x1024xbf16, #tpu.memory_space<vmem>>, vector<1024x1024xbf16>
    %cst = arith.constant dense<0.000000e+00> : vector<8x1024xf32>
    %11 = tpu.matmul %9, %10, %cst {dimension_numbers = #tpu.dot_dimension_numbers<[1], [0], [0], [1], [0, 0, 1, 1], [], []>} : vector<8x1024xbf16>, vector<1024x1024xbf16>, vector<8x1024xf32> -> vector<8x1024xf32>
    %12 = arith.addf %8, %11 : vector<8x1024xf32>
    %c0_9 = arith.constant 0 : index
    %c0_10 = arith.constant 0 : index
    %13 = vector.load %arg7[%c0_9, %c0_10] : memref<8x1024xf32, #tpu.memory_space<vmem>>, vector<8x1024xf32>
    tpu.vector_store %arg7[%c0_9, %c0_10], %12 {strides = array<i32>} : memref<8x1024xf32, #tpu.memory_space<vmem>>, vector<8x1024xf32>,
    %c0_i32_11 = arith.constant 0 : i32
    %14 = arith.cmpi eq, %arg2, %c0_i32_11 : i32
    %15 = arith.extui %14 : i1 to i32
    %c0_i32_12 = arith.constant 0 : i32
    %16 = arith.cmpi ne, %15, %c0_i32_12 : i32
    scf.if %16 {
      %c0_16 = arith.constant 0 : index
      %c0_17 = arith.constant 0 : index
      %22 = vector.load %arg7[%c0_16, %c0_17] : memref<8x1024xf32, #tpu.memory_space<vmem>>, vector<8x1024xf32>
      %c0_18 = arith.constant 0 : index
      %c0_19 = arith.constant 0 : index
      %23 = vector.load %arg5[%c0_18, %c0_19] : memref<1x1024xf32, #tpu.memory_space<vmem>>, vector<1x1024xf32>
      %24 = vector.broadcast %23 : vector<1x1024xf32> to vector<8x1024xf32>
      %25 = arith.subf %22, %24 : vector<8x1024xf32>
      %c0_20 = arith.constant 0 : index
      %c0_21 = arith.constant 0 : index
      %26 = vector.load %arg8[%c0_20, %c0_21] : memref<8x1xf32, #tpu.memory_space<vmem>>, vector<8x1xf32>
      %27 = arith.mulf %25, %25 : vector<8x1024xf32>
      %cst_22 = arith.constant dense<0.000000e+00> : vector<8xf32>
      %28 = vector.multi_reduction <add>, %27, %cst_22 [1] : vector<8x1024xf32> to vector<8xf32>
      %29 = vector.shape_cast %28 : vector<8xf32> to vector<8x1xf32>
      %30 = arith.addf %26, %29 : vector<8x1xf32>
      %c0_23 = arith.constant 0 : index
      %c0_24 = arith.constant 0 : index
      %31 = vector.load %arg8[%c0_23, %c0_24] : memref<8x1xf32, #tpu.memory_space<vmem>>, vector<8x1xf32>
      tpu.vector_store %arg8[%c0_23, %c0_24], %30 {strides = array<i32>} : memref<8x1xf32, #tpu.memory_space<vmem>>, vector<8x1xf32>,
    } else {
    }
    %c0_i32_13 = arith.constant 0 : i32
    %17 = arith.cmpi eq, %arg1, %c0_i32_13 : i32
    %c0_i32_14 = arith.constant 0 : i32
    %18 = arith.cmpi eq, %arg2, %c0_i32_14 : i32
    %19 = arith.andi %17, %18 : i1
    %20 = arith.extui %19 : i1 to i32
    %c0_i32_15 = arith.constant 0 : i32
    %21 = arith.cmpi ne, %20, %c0_i32_15 : i32
    scf.if %21 {
      %c0_16 = arith.constant 0 : index
      %c0_17 = arith.constant 0 : index
      %22 = vector.load %arg8[%c0_16, %c0_17] : memref<8x1xf32, #tpu.memory_space<vmem>>, vector<8x1xf32>
      %cst_18 = arith.constant 0.000000e+00 : f32
      %23 = vector.broadcast %cst_18 : f32 to vector<8x1xf32>
      %24 = arith.subf %23, %22 : vector<8x1xf32>
      %cst_19 = arith.constant 432.273743 : f32
      %25 = vector.broadcast %cst_19 : f32 to vector<8x1xf32>
      %26 = arith.addf %24, %25 : vector<8x1xf32>
      %cst_20 = arith.constant 0.000000e+00 : f32
      %27 = vector.broadcast %cst_20 : f32 to vector<8x1xf32>
      %28 = arith.maximumf %26, %27 : vector<8x1xf32>
      %cst_21 = arith.constant 0.000000e+00 : f32
      %29 = vector.broadcast %cst_21 : f32 to vector<8x1xf32>
      %30 = arith.subf %29, %28 : vector<8x1xf32>
      %cst_22 = arith.constant 1.000000e+00 : f32
      %31 = vector.broadcast %cst_22 : f32 to vector<8x1xf32>
      %32 = arith.addf %30, %31 : vector<8x1xf32>
      %cst_23 = arith.constant 0.000000e+00 : f32
      %33 = vector.broadcast %cst_23 : f32 to vector<8x1xf32>
      %34 = arith.maximumf %32, %33 : vector<8x1xf32>
      %cst_24 = arith.constant 0.000000e+00 : f32
      %35 = vector.broadcast %cst_24 : f32 to vector<8x1xf32>
      %36 = arith.maximumf %34, %35 : vector<8x1xf32>
      %cst_25 = arith.constant 0.000000e+00 : f32
      %37 = vector.broadcast %cst_25 : f32 to vector<8x1xf32>
      %38 = arith.subf %37, %34 : vector<8x1xf32>
      %cst_26 = arith.constant 1.000000e+00 : f32
      %39 = vector.broadcast %cst_26 : f32 to vector<8x1xf32>
      %40 = arith.addf %38, %39 : vector<8x1xf32>
      %cst_27 = arith.constant 0.000000e+00 : f32
      %41 = vector.broadcast %cst_27 : f32 to vector<8x1xf32>
      %42 = arith.maximumf %40, %41 : vector<8x1xf32>
      %43 = tpu.iota {dimensions = array<i32: 1>} : vector<8x128xi32>
      %c0_i32_28 = arith.constant 0 : i32
      %44 = vector.broadcast %c0_i32_28 : i32 to vector<8x128xi32>
      %45 = arith.cmpi eq, %43, %44 : vector<8x128xi32>
      %c1_i32 = arith.constant 1 : i32
      %46 = vector.broadcast %c1_i32 : i32 to vector<8x128xi32>
      %47 = arith.cmpi eq, %43, %46 : vector<8x128xi32>
      %cst_29 = arith.constant 0.000000e+00 : f32
      %48 = vector.shape_cast %42 : vector<8x1xf32> to vector<8x1xf32>
      %49 = vector.broadcast %48 : vector<8x1xf32> to vector<8x128xf32>
      %50 = vector.broadcast %cst_29 : f32 to vector<8x128xf32>
      %51 = arith.select %47, %49, %50 : vector<8x128xi1>, vector<8x128xf32>
      %52 = vector.shape_cast %36 : vector<8x1xf32> to vector<8x1xf32>
      %53 = vector.broadcast %52 : vector<8x1xf32> to vector<8x128xf32>
      %54 = arith.select %45, %53, %51 : vector<8x128xi1>, vector<8x128xf32>
      %c0_30 = arith.constant 0 : index
      %c0_31 = arith.constant 0 : index
      %55 = vector.load %arg6[%c0_30, %c0_31] : memref<8x128xf32, #tpu.memory_space<vmem>>, vector<8x128xf32>
      tpu.vector_store %arg6[%c0_30, %c0_31], %54 {strides = array<i32>} : memref<8x128xf32, #tpu.memory_space<vmem>>, vector<8x128xf32>,
    } else {
    }
    return
  }
  func.func @transform_0(%arg0: i32, %arg1: i32, %arg2: i32) -> (i32, i32) {
    %c0_i32 = arith.constant 0 : i32
    return %arg0, %arg2 : i32, i32
  }
  func.func @transform_1(%arg0: i32, %arg1: i32, %arg2: i32) -> (i32, i32) {
    %c0_i32 = arith.constant 0 : i32
    return %arg2, %arg1 : i32, i32
  }
  func.func @transform_2(%arg0: i32, %arg1: i32, %arg2: i32) -> (i32, i32) {
    %c0_i32 = arith.constant 0 : i32
    %c0_i32_0 = arith.constant 0 : i32
    return %c0_i32, %arg1 : i32, i32
  }
  func.func @transform_3(%arg0: i32, %arg1: i32, %arg2: i32) -> (i32, i32) {
    %c0_i32 = arith.constant 0 : i32
    %c0_i32_0 = arith.constant 0 : i32
    return %arg0, %c0_i32 : i32, i32
  }
}

</mosaic_0001>

<bundles_post_ra>
// kernel: tpu_custom_call.1
= control target key start
LH: loop header
LB: loop body
LE: loop exit
PB: predicated region body
PF: predicated region fallthrough
CT: control target
= control target key end

     0   :  { %8 = vsyncpa [#allocation5], 0  ;;  %s6983_s0 = inlined_call_operand.hbm [shape: bf16[8,1024], index: 0, kind: input, shape index: {}]   ;;  %s6984_s1 = inlined_call_operand.hbm [shape: bf16[1024,1024], index: 1, kind: input, shape index: {}]   ;;  %s6985_s2 = inlined_call_operand.hbm [shape: f32[1,1024], index: 2, kind: input, shape index: {}]   ;;  %s6986_s3 = inlined_call_operand.hbm [shape: f32[8,128], index: 3, kind: output, shape index: {}]  }
   0x1   :  { %9 = vsyncpa [#allocation8], 0  ;;  %s26_s14 = sshll.u32 %s6984_s1, 4  ;;  %s27_s14 = int_to_ptr.hbm [resolvable:$true] %s26_s14 }
   0x2   :  { %10 = vsyncpa [#allocation6], 0  ;;  %s6817_s15 = smov [#allocation7]   ;;  %s16_s19 = sshll.u32 %s6983_s0, 4  ;;  %s17_s19 = int_to_ptr.hbm [resolvable:$true] %s16_s19 }
   0x3   :  { %s28_s16 = sshll.u32 %s6817_s15, 4  ;;  %s6818_s20 = smov 512   ;;  %s29_s16 = int_to_ptr.vmem [resolvable:$true] %s28_s16 }
   0x4   :  { %s6819_s21 = smov 32   ;;  %s6820_s22 = smov [#allocation4]  }
   0x5   :  { %34 = dma.hbm_to_vmem [thread:$0]  %s27_s14, 65536, %s29_s16, [#allocation8], %s6818_s20, %s6818_s20, %s6819_s21  }
   0x6   :  { %s18_s23 = sshll.u32 %s6820_s22, 4  ;;  %s40_s26 = sshll.u32 %s6985_s2, 4  ;;  %s19_s23 = int_to_ptr.vmem [resolvable:$true] %s18_s23  ;;  %s41_s26 = int_to_ptr.hbm [resolvable:$true] %s40_s26 }
   0x7   :  { %21 = dma.hbm_to_vmem [thread:$0]  %s17_s19, 512, %s19_s23, [#allocation5]  }
   0x8   :  { %s6821_s1 = smov [#allocation9]  }
   0x9   :  { %s42_s27 = sshll.u32 %s6821_s1, 4  ;;  %s43_s27 = int_to_ptr.vmem [resolvable:$true] %s42_s27 }
   0xa   :  { %45 = dma.hbm_to_vmem [thread:$0]  %s41_s26, 128, %s43_s27, [#allocation8]  }
   0xb   :  { %6811 = dma.done.wait [#allocation5], 512  }
   0xc   :  { %6812 = vsyncadd [#allocation5], 4294966784 }
   0xd   :  { %6813 = dma.done.wait [#allocation8], 65664  }
   0xe   :  { %6814 = vsyncadd [#allocation8], 4294901632  ;;  %v4369_v0 = vld [vmem:[#allocation7 + $0x1c0] sm:$0xf]  ;;  %vm64_vm0 = vcmask 7168   ;;  %s6824_s0 = smov [#allocation10]  }
   0xf   :  { %v6251_v1 = vld [vmem:[#allocation7 + $0x1dc] sm:$0xf0]  ;;  %s4130_s2 = sshll.u32 %s6824_s0, 4  ;;  %s4132_s30 = sshll.u32 %s6986_s3, 4  ;;  %s4131_s2 = int_to_ptr.vmem [resolvable:$true] %s4130_s2  ;;  %s4133_s30 = int_to_ptr.hbm [resolvable:$true] %s4132_s30 }
  0x10   :  { %v4625_v2 = vld [vmem:[#allocation7 + $0x3c0] sm:$0xf]  ;;  %v4370_v3 = vor.u32 %v6251_v1, %v4369_v0 }
  0x11   :  { %v6315_v4 = vld [vmem:[#allocation7 + $0x3dc] sm:$0xf0] }
  0x12   :  { %v4881_v5 = vld [vmem:[#allocation7 + $0x5c0] sm:$0xf]  ;;  %v4626_v7 = vor.u32 %v6315_v4, %v4625_v2  ;;  %3189 = vmatpush.bf16.msra.mxu0 %v4370_v3 }
  0x13   :  { %v6379_v6 = vld [vmem:[#allocation7 + $0x5dc] sm:$0xf0] }
  0x14   :  { %v4882_v8 = vor.u32 %v6379_v6, %v4881_v5  ;;  %v5137_v9 = vld [vmem:[#allocation7 + $0x7c0] sm:$0xf]  ;;  %3202 = vmatpush.bf16.msra.mxu1 %v4626_v7 }
  0x15   :  { %v6443_v10 = vld [vmem:[#allocation7 + $0x7dc] sm:$0xf0] }
  0x16   :  { %v4337_v11 = vld [vmem:[#allocation7 + $0x180] sm:$0xf]  ;;  %v5138_v12 = vor.u32 %v6443_v10, %v5137_v9  ;;  %3215 = vmatpush.bf16.msra.mxu2 %v4882_v8 }
  0x17   :  { %v6243_v13 = vld [vmem:[#allocation7 + $0x19c] sm:$0xf0] }
  0x18   :  { %v4593_v14 = vld [vmem:[#allocation7 + $0x380] sm:$0xf]  ;;  %v4338_v16 = vor.u32 %v6243_v13, %v4337_v11  ;;  %3228 = vmatpush.bf16.msra.mxu3 %v5138_v12 }
  0x19   :  { %v6307_v15 = vld [vmem:[#allocation7 + $0x39c] sm:$0xf0] }
  0x1a   :  { %v4594_v17 = vor.u32 %v6307_v15, %v4593_v14  ;;  %v4849_v18 = vld [vmem:[#allocation7 + $0x580] sm:$0xf]  ;;  %3190 = vmatpush.bf16.msra.mxu0 %v4338_v16 }
  0x1b   :  { %v6371_v19 = vld [vmem:[#allocation7 + $0x59c] sm:$0xf0] }
  0x1c   :  { %v5105_v20 = vld [vmem:[#allocation7 + $0x780] sm:$0xf]  ;;  %v4850_v21 = vor.u32 %v6371_v19, %v4849_v18  ;;  %3203 = vmatpush.bf16.msra.mxu1 %v4594_v17 }
  0x1d   :  { %v6435_v22 = vld [vmem:[#allocation7 + $0x79c] sm:$0xf0] }
  0x1e   :  { %v4305_v23 = vld [vmem:[#allocation7 + $0x140] sm:$0xf]  ;;  %v5106_v25 = vor.u32 %v6435_v22, %v5105_v20  ;;  %3216 = vmatpush.bf16.msra.mxu2 %v4850_v21 }
  0x1f   :  { %v6235_v24 = vld [vmem:[#allocation7 + $0x15c] sm:$0xf0] }
  0x20   :  { %v4561_v26 = vld [vmem:[#allocation7 + $0x340] sm:$0xf]  ;;  %v4306_v29 = vor.u32 %v6235_v24, %v4305_v23  ;;  %3229 = vmatpush.bf16.msra.mxu3 %v5106_v25 }
  0x21   :  { %v6299_v27 = vld [vmem:[#allocation7 + $0x35c] sm:$0xf0] }
  0x22   :  { %v4817_v28 = vld [vmem:[#allocation7 + $0x540] sm:$0xf]  ;;  %v4562_v33 = vor.u32 %v6299_v27, %v4561_v26  ;;  %3191 = vmatpush.bf16.msra.mxu0 %v4306_v29 }
  0x23   :  { %v6363_v30 = vld [vmem:[#allocation7 + $0x55c] sm:$0xf0] }
  0x24   :  { %v5073_v31 = vld [vmem:[#allocation7 + $0x740] sm:$0xf]  ;;  %v4818_v34 = vor.u32 %v6363_v30, %v4817_v28  ;;  %3204 = vmatpush.bf16.msra.mxu1 %v4562_v33 }
  0x25   :  { %v6427_v32 = vld [vmem:[#allocation7 + $0x75c] sm:$0xf0] }
  0x26   :  { %v4273_v35 = vld [vmem:[#allocation7 + $0x100] sm:$0xf]  ;;  %v5074_v38 = vor.u32 %v6427_v32, %v5073_v31  ;;  %3217 = vmatpush.bf16.msra.mxu2 %v4818_v34 }
  0x27   :  { %v6227_v36 = vld [vmem:[#allocation7 + $0x11c] sm:$0xf0] }
  0x28   :  { %v4529_v37 = vld [vmem:[#allocation7 + $0x300] sm:$0xf]  ;;  %v4274_v44 = vor.u32 %v6227_v36, %v4273_v35  ;;  %3230 = vmatpush.bf16.msra.mxu3 %v5074_v38 }
  0x29   :  { %v6291_v39 = vld [vmem:[#allocation7 + $0x31c] sm:$0xf0] }
  0x2a   :  { %v4785_v40 = vld [vmem:[#allocation7 + $0x500] sm:$0xf]  ;;  %v4530_v45 = vor.u32 %v6291_v39, %v4529_v37  ;;  %3192 = vmatpush.bf16.msra.mxu0 %v4274_v44 }
  0x2b   :  { %v6355_v41 = vld [vmem:[#allocation7 + $0x51c] sm:$0xf0] }
  0x2c   :  { %v5041_v42 = vld [vmem:[#allocation7 + $0x700] sm:$0xf]  ;;  %v4786_v46 = vor.u32 %v6355_v41, %v4785_v40  ;;  %3205 = vmatpush.bf16.msra.mxu1 %v4530_v45 }
  0x2d   :  { %v6419_v43 = vld [vmem:[#allocation7 + $0x71c] sm:$0xf0] }
  0x2e   :  { %v4241_v47 = vld [vmem:[#allocation7 + $0xc0] sm:$0xf]  ;;  %v5042_v50 = vor.u32 %v6419_v43, %v5041_v42  ;;  %3218 = vmatpush.bf16.msra.mxu2 %v4786_v46 }
  0x2f   :  { %v6219_v48 = vld [vmem:[#allocation7 + $0xdc] sm:$0xf0] }
  0x30   :  { %v4497_v49 = vld [vmem:[#allocation7 + $0x2c0] sm:$0xf]  ;;  %v4242_v56 = vor.u32 %v6219_v48, %v4241_v47  ;;  %3231 = vmatpush.bf16.msra.mxu3 %v5042_v50 }
  0x31   :  { %v6283_v51 = vld [vmem:[#allocation7 + $0x2dc] sm:$0xf0] }
  0x32   :  { %v4753_v52 = vld [vmem:[#allocation7 + $0x4c0] sm:$0xf]  ;;  %v4498_v57 = vor.u32 %v6283_v51, %v4497_v49  ;;  %3193 = vmatpush.bf16.msra.mxu0 %v4242_v56 }
  0x33   :  { %v6347_v53 = vld [vmem:[#allocation7 + $0x4dc] sm:$0xf0] }
  0x34   :  { %v5009_v54 = vld [vmem:[#allocation7 + $0x6c0] sm:$0xf]  ;;  %v4754_v58 = vor.u32 %v6347_v53, %v4753_v52  ;;  %3206 = vmatpush.bf16.msra.mxu1 %v4498_v57 }
  0x35   :  { %v6411_v55 = vld [vmem:[#allocation7 + $0x6dc] sm:$0xf0] }
  0x36   :  { %v4209_v59 = vld [vmem:[#allocation7 + $0x80] sm:$0xf]  ;;  %v5010_v62 = vor.u32 %v6411_v55, %v5009_v54  ;;  %3219 = vmatpush.bf16.msra.mxu2 %v4754_v58  ;;  %v86_v58 = vld [vmem:[#allocation4 + $0x8] sm:$0xff] }
  0x37   :  { %v6211_v60 = vld [vmem:[#allocation7 + $0x9c] sm:$0xf0] }
  0x38   :  { %v4465_v61 = vld [vmem:[#allocation7 + $0x280] sm:$0xf]  ;;  %v4210_v4 = vor.u32 %v6211_v60, %v4209_v59  ;;  %3232 = vmatpush.bf16.msra.mxu3 %v5010_v62 }
  0x39   :  { %v6275_v63 = vld [vmem:[#allocation7 + $0x29c] sm:$0xf0] }
  0x3a   :  { %v4721_v0 = vld [vmem:[#allocation7 + $0x480] sm:$0xf]  ;;  %v4466_v5 = vor.u32 %v6275_v63, %v4465_v61  ;;  %3194 = vmatpush.bf16.msra.mxu0 %v4210_v4  ;;  %v607_v63 = vunpack.c.l.b16 %v86_v58 }
  0x3b   :  { %v6339_v1 = vld [vmem:[#allocation7 + $0x49c] sm:$0xf0] }
  0x3c   :  { %v4977_v2 = vld [vmem:[#allocation7 + $0x680] sm:$0xf]  ;;  %v4722_v6 = vor.u32 %v6339_v1, %v4721_v0  ;;  %3207 = vmatpush.bf16.msra.mxu1 %v4466_v5  ;;  %v608_v0 = vunpack.c.h.b16 %v86_v58  ;;  %v6854_v4 = vpack.c.b16 %v607_v63, %v607_v63 }
  0x3d   :  { %v6403_v3 = vld [vmem:[#allocation7 + $0x69c] sm:$0xf0] }
  0x3e   :  { %v4177_v7 = vld [vmem:[#allocation7 + $0x40] sm:$0xf]  ;;  %v4978_v10 = vor.u32 %v6403_v3, %v4977_v2  ;;  %3220 = vmatpush.bf16.msra.mxu2 %v4722_v6  ;;  %v6856_v6 = vpack.c.b16 %v608_v0, %v608_v0 }
  0x3f   :  { %v6203_v8 = vld [vmem:[#allocation7 + $0x5c] sm:$0xf0] }
  0x40   :  { %v4433_v9 = vld [vmem:[#allocation7 + $0x240] sm:$0xf]  ;;  %v4178_v16 = vor.u32 %v6203_v8, %v4177_v7  ;;  %3233 = vmatpush.bf16.msra.mxu3 %v4978_v10 }
  0x41   :  { %v6267_v11 = vld [vmem:[#allocation7 + $0x25c] sm:$0xf0] }
  0x42   :  { %v4689_v12 = vld [vmem:[#allocation7 + $0x440] sm:$0xf]  ;;  %v4434_v19 = vor.u32 %v6267_v11, %v4433_v9  ;;  %3195 = vmatpush.bf16.msra.mxu0 %v4178_v16 }
  0x43   :  { %v6331_v13 = vld [vmem:[#allocation7 + $0x45c] sm:$0xf0] }
  0x44   :  { %v4945_v14 = vld [vmem:[#allocation7 + $0x640] sm:$0xf]  ;;  %v4690_v20 = vor.u32 %v6331_v13, %v4689_v12  ;;  %3208 = vmatpush.bf16.msra.mxu1 %v4434_v19 }
  0x45   :  { %v6395_v15 = vld [vmem:[#allocation7 + $0x65c] sm:$0xf0] }
  0x46   :  { %v4145_v17 = vld [vmem:[#allocation7] sm:$0xf]  ;;  %v4946_v24 = vor.u32 %v6395_v15, %v4945_v14  ;;  %3221 = vmatpush.bf16.msra.mxu2 %v4690_v20 }
  0x47   :  { %v6195_v18 = vld [vmem:[#allocation7 + $0x1c] sm:$0xf0] }
  0x48   :  { %v4401_v21 = vld [vmem:[#allocation7 + $0x200] sm:$0xf]  ;;  %v4146_v31 = vor.u32 %v6195_v18, %v4145_v17  ;;  %3234 = vmatpush.bf16.msra.mxu3 %v4946_v24 }
  0x49   :  { %v6259_v22 = vld [vmem:[#allocation7 + $0x21c] sm:$0xf0] }
  0x4a   :  { %v4657_v23 = vld [vmem:[#allocation7 + $0x400] sm:$0xf]  ;;  %v4402_v35 = vor.u32 %v6259_v22, %v4401_v21  ;;  %3196 = vmatpush.bf16.msra.mxu0 %v4146_v31 }
  0x4b   :  { %v6323_v25 = vld [vmem:[#allocation7 + $0x41c] sm:$0xf0] }
  0x4c   :  { %v4913_v26 = vld [vmem:[#allocation7 + $0x600] sm:$0xf]  ;;  %v4658_v36 = vor.u32 %v6323_v25, %v4657_v23  ;;  %3209 = vmatpush.bf16.msra.mxu1 %v4402_v35 }
  0x4d   :  { %v6387_v27 = vld [vmem:[#allocation7 + $0x61c] sm:$0xf0] }
  0x4e   :  { %v5393_v28 = vld [vmem:[#allocation7 + $0x9c0] sm:$0xf]  ;;  %v4914_v39 = vor.u32 %v6387_v27, %v4913_v26  ;;  %3222 = vmatpush.bf16.msra.mxu2 %v4658_v36 }
  0x4f   :  { %v6507_v29 = vld [vmem:[#allocation7 + $0x9dc] sm:$0xf0] }
  0x50   :  { %v5649_v30 = vld [vmem:[#allocation7 + $0xbc0] sm:$0xf]  ;;  %v5394_v40 = vor.u32 %v6507_v29, %v5393_v28  ;;  %3235 = vmatpush.bf16.msra.mxu3 %v4914_v39 }
  0x51   :  { %v6571_v32 = vld [vmem:[#allocation7 + $0xbdc] sm:$0xf0]  ;;  %3223 = vmatmul.bf16.vlgmr.msra.gmra.mxu2 %v6854_v4 }
  0x52   :  { %v5905_v33 = vld [vmem:[#allocation7 + $0xdc0] sm:$0xf]  ;;  %v5650_v41 = vor.u32 %v6571_v32, %v5649_v30  ;;  %3241 = vmatpush.bf16.msrb.mxu0 %v5394_v40 }
  0x53   :  { %v6635_v34 = vld [vmem:[#allocation7 + $0xddc] sm:$0xf0]  ;;  %3236 = vmatmul.bf16.vlgmr.msra.gmra.mxu3 %v6856_v6 }
  0x54   :  { %v6161_v37 = vld [vmem:[#allocation7 + $0xfc0] sm:$0xf]  ;;  %v5906_v42 = vor.u32 %v6635_v34, %v5905_v33  ;;  %3254 = vmatpush.bf16.msrb.mxu1 %v5650_v41 }
  0x55   :  { %v6699_v38 = vld [vmem:[#allocation7 + $0xfdc] sm:$0xf0] }
  0x56   :  { %v5361_v43 = vld [vmem:[#allocation7 + $0x980] sm:$0xf]  ;;  %v6162_v46 = vor.u32 %v6699_v38, %v6161_v37  ;;  %3267 = vmatpush.bf16.msrb.mxu2 %v5906_v42 }
  0x57   :  { %v6499_v44 = vld [vmem:[#allocation7 + $0x99c] sm:$0xf0] }
  0x58   :  { %v5617_v45 = vld [vmem:[#allocation7 + $0xb80] sm:$0xf]  ;;  %v5362_v52 = vor.u32 %v6499_v44, %v5361_v43  ;;  %3280 = vmatpush.bf16.msrb.mxu3 %v6162_v46 }
  0x59   :  { %v6563_v47 = vld [vmem:[#allocation7 + $0xb9c] sm:$0xf0] }
  0x5a   :  { %v5873_v48 = vld [vmem:[#allocation7 + $0xd80] sm:$0xf]  ;;  %v5618_v54 = vor.u32 %v6563_v47, %v5617_v45  ;;  %3242 = vmatpush.bf16.msrb.mxu0 %v5362_v52 }
  0x5b   :  { %v6627_v49 = vld [vmem:[#allocation7 + $0xd9c] sm:$0xf0] }
  0x5c   :  { %v6129_v50 = vld [vmem:[#allocation7 + $0xf80] sm:$0xf]  ;;  %v5874_v55 = vor.u32 %v6627_v49, %v5873_v48  ;;  %3255 = vmatpush.bf16.msrb.mxu1 %v5618_v54 }
  0x5d   :  { %v6691_v51 = vld [vmem:[#allocation7 + $0xf9c] sm:$0xf0] }
  0x5e   :  { %v5329_v53 = vld [vmem:[#allocation7 + $0x940] sm:$0xf]  ;;  %v6130_v59 = vor.u32 %v6691_v51, %v6129_v50  ;;  %3268 = vmatpush.bf16.msrb.mxu2 %v5874_v55 }
  0x5f   :  { %v6491_v56 = vld [vmem:[#allocation7 + $0x95c] sm:$0xf0] }
  0x60   :  { %v5585_v57 = vld [vmem:[#allocation7 + $0xb40] sm:$0xf]  ;;  %v5330_v3 = vor.u32 %v6491_v56, %v5329_v53  ;;  %3281 = vmatpush.bf16.msrb.mxu3 %v6130_v59 }
  0x61   :  { %v6555_v60 = vld [vmem:[#allocation7 + $0xb5c] sm:$0xf0] }
  0x62   :  { %v5841_v61 = vld [vmem:[#allocation7 + $0xd40] sm:$0xf]  ;;  %v5586_v7 = vor.u32 %v6555_v60, %v5585_v57  ;;  %3243 = vmatpush.bf16.msrb.mxu0 %v5330_v3  ;;  %v88_v3 = vld [vmem:[#allocation4 + $0x18] sm:$0xff] }
  0x63   :  { %v6619_v62 = vld [vmem:[#allocation7 + $0xd5c] sm:$0xf0] }
  0x64   :  { %v6097_v1 = vld [vmem:[#allocation7 + $0xf40] sm:$0xf]  ;;  %v5842_v8 = vor.u32 %v6619_v62, %v5841_v61  ;;  %3256 = vmatpush.bf16.msrb.mxu1 %v5586_v7 }
  0x65   :  { %v6683_v2 = vld [vmem:[#allocation7 + $0xf5c] sm:$0xf0] }
  0x66   :  { %v85_v5 = vld [vmem:[#allocation4] sm:$0xff]  ;;  %v6098_v14 = vor.u32 %v6683_v2, %v6097_v1  ;;  %3269 = vmatpush.bf16.msrb.mxu2 %v5842_v8 }
  0x67   :  { %v5297_v9 = vld [vmem:[#allocation7 + $0x900] sm:$0xf]  ;;  %v605_v12 = vunpack.c.l.b16 %v85_v5  ;;  %v606_v13 = vunpack.c.h.b16 %v85_v5 }
  0x68   :  { %v6483_v10 = vld [vmem:[#allocation7 + $0x91c] sm:$0xf0]  ;;  %3282 = vmatpush.bf16.msrb.mxu3 %v6098_v14  ;;  %v4627_v14 = vld [vmem:[#allocation7 + $0x3e0] sm:$0xf0] }
  0x69   :  { %v5553_v11 = vld [vmem:[#allocation7 + $0xb00] sm:$0xf]  ;;  %v6859_v20 = vpack.c.b16 %v605_v12, %v605_v12  ;;  %v6862_v21 = vpack.c.b16 %v606_v13, %v606_v13  ;;  %v5298_v22 = vor.u32 %v6483_v10, %v5297_v9  ;;  %v87_v9 = vld [vmem:[#allocation4 + $0x10] sm:$0xff]  ;;  %v6247_v10 = vld [vmem:[#allocation7 + $0x1c4] sm:$0xf] }
  0x6a   :  { %v6547_v15 = vld [vmem:[#allocation7 + $0xb1c] sm:$0xf0]  ;;  %v6311_v12 = vld [vmem:[#allocation7 + $0x3c4] sm:$0xf] }
  0x6b   :  { %v5809_v16 = vld [vmem:[#allocation7 + $0xd00] sm:$0xf]  ;;  %v5554_v23 = vor.u32 %v6547_v15, %v5553_v11  ;;  %3197 = vmatmul.bf16.vlgmr.msra.gmra.mxu0 %v6859_v20  ;;  %3210 = vmatmul.bf16.vlgmr.msra.gmra.mxu1 %v6862_v21  ;;  %v4371_v11 = vld [vmem:[#allocation7 + $0x1e0] sm:$0xf0] }
  0x6c   :  { %v6611_v17 = vld [vmem:[#allocation7 + $0xd1c] sm:$0xf0]  ;;  %3244 = vmatpush.bf16.msrb.mxu0 %v5298_v22  ;;  %v6375_v15 = vld [vmem:[#allocation7 + $0x5c4] sm:$0xf] }
  0x6d   :  { %v6065_v18 = vld [vmem:[#allocation7 + $0xf00] sm:$0xf]  ;;  %v5810_v24 = vor.u32 %v6611_v17, %v5809_v16  ;;  %3257 = vmatpush.bf16.msrb.mxu1 %v5554_v23  ;;  %v4883_v16 = vld [vmem:[#allocation7 + $0x5e0] sm:$0xf0]  ;;  %v611_v17 = vunpack.c.l.b16 %v88_v3 }
  0x6e   :  { %v6675_v19 = vld [vmem:[#allocation7 + $0xf1c] sm:$0xf0]  ;;  %v6439_v22 = vld [vmem:[#allocation7 + $0x7c4] sm:$0xf] }
  0x6f   :  { %v5265_v25 = vld [vmem:[#allocation7 + $0x8c0] sm:$0xf]  ;;  %v6066_v28 = vor.u32 %v6675_v19, %v6065_v18  ;;  %3270 = vmatpush.bf16.msrb.mxu2 %v5810_v24  ;;  %v5139_v23 = vld [vmem:[#allocation7 + $0x7e0] sm:$0xf0]  ;;  %v609_v24 = vunpack.c.l.b16 %v87_v9 }
  0x70   :  { %v6475_v26 = vld [vmem:[#allocation7 + $0x8dc] sm:$0xf0] }
  0x71   :  { %v5521_v27 = vld [vmem:[#allocation7 + $0xac0] sm:$0xf]  ;;  %v5266_v34 = vor.u32 %v6475_v26, %v5265_v25  ;;  %3283 = vmatpush.bf16.msrb.mxu3 %v6066_v28  ;;  %v612_v25 = vunpack.c.h.b16 %v88_v3  ;;  %v610_v28 = vunpack.c.h.b16 %v87_v9  ;;  %v5043_v3 = vld [vmem:[#allocation7 + $0x720] sm:$0xf0] }
  0x72   :  { %v6539_v29 = vld [vmem:[#allocation7 + $0xadc] sm:$0xf0]  ;;  %v6215_v9 = vld [vmem:[#allocation7 + $0xc4] sm:$0xf] }
  0x73   :  { %v5777_v30 = vld [vmem:[#allocation7 + $0xcc0] sm:$0xf]  ;;  %v5522_v35 = vor.u32 %v6539_v29, %v5521_v27  ;;  %3245 = vmatpush.bf16.msrb.mxu0 %v5266_v34  ;;  %v4374_v27 = vor.u32 %v6247_v10, %v4371_v11  ;;  %v4630_v29 = vor.u32 %v6311_v12, %v4627_v14  ;;  %v5142_v34 = vor.u32 %v6439_v22, %v5139_v23  ;;  %v4243_v10 = vld [vmem:[#allocation7 + $0xe0] sm:$0xf0] }
  0x74   :  { %v6603_v31 = vld [vmem:[#allocation7 + $0xcdc] sm:$0xf0]  ;;  %v6279_v11 = vld [vmem:[#allocation7 + $0x2c4] sm:$0xf] }
  0x75   :  { %v6033_v32 = vld [vmem:[#allocation7 + $0xec0] sm:$0xf]  ;;  %v5778_v36 = vor.u32 %v6603_v31, %v5777_v30  ;;  %3258 = vmatpush.bf16.msrb.mxu1 %v5522_v35  ;;  %v4886_v30 = vor.u32 %v6375_v15, %v4883_v16  ;;  %v6239_v31 = vld [vmem:[#allocation7 + $0x184] sm:$0xf] }
  0x76   :  { %v6667_v33 = vld [vmem:[#allocation7 + $0xedc] sm:$0xf0]  ;;  %v4595_v35 = vld [vmem:[#allocation7 + $0x3a0] sm:$0xf0] }
  0x77   :  { %v5233_v37 = vld [vmem:[#allocation7 + $0x880] sm:$0xf]  ;;  %v6034_v40 = vor.u32 %v6667_v33, %v6033_v32  ;;  %3271 = vmatpush.bf16.msrb.mxu2 %v5778_v36  ;;  %v4339_v32 = vld [vmem:[#allocation7 + $0x1a0] sm:$0xf0] }
  0x78   :  { %v6467_v38 = vld [vmem:[#allocation7 + $0x89c] sm:$0xf0]  ;;  %v6303_v33 = vld [vmem:[#allocation7 + $0x384] sm:$0xf] }
  0x79   :  { %v5489_v39 = vld [vmem:[#allocation7 + $0xa80] sm:$0xf]  ;;  %v5234_v46 = vor.u32 %v6467_v38, %v5233_v37  ;;  %3284 = vmatpush.bf16.msrb.mxu3 %v6034_v40  ;;  %v6367_v36 = vld [vmem:[#allocation7 + $0x584] sm:$0xf]  ;;  %v6866_v38 = vpack.c.b16 %v611_v17, %v611_v17 }
  0x7a   :  { %v6531_v41 = vld [vmem:[#allocation7 + $0xa9c] sm:$0xf0]  ;;  %v4851_v37 = vld [vmem:[#allocation7 + $0x5a0] sm:$0xf0] }
  0x7b   :  { %v5745_v42 = vld [vmem:[#allocation7 + $0xc80] sm:$0xf]  ;;  %v5490_v47 = vor.u32 %v6531_v41, %v5489_v39  ;;  %3246 = vmatpush.bf16.msrb.mxu0 %v5234_v46  ;;  %v6431_v39 = vld [vmem:[#allocation7 + $0x784] sm:$0xf]  ;;  %v6868_v41 = vpack.c.b16 %v609_v24, %v609_v24  ;;  %v4854_v46 = vor.u32 %v6367_v36, %v4851_v37 }
  0x7c   :  { %v6595_v43 = vld [vmem:[#allocation7 + $0xc9c] sm:$0xf0]  ;;  %v5107_v40 = vld [vmem:[#allocation7 + $0x7a0] sm:$0xf0] }
  0x7d   :  { %v6001_v44 = vld [vmem:[#allocation7 + $0xe80] sm:$0xf]  ;;  %v5746_v48 = vor.u32 %v6595_v43, %v5745_v42  ;;  %3259 = vmatpush.bf16.msrb.mxu1 %v5490_v47  ;;  %v6870_v42 = vpack.c.b16 %v612_v25, %v612_v25  ;;  %v4342_v43 = vor.u32 %v6239_v31, %v4339_v32  ;;  %v6231_v47 = vld [vmem:[#allocation7 + $0x144] sm:$0xf] }
  0x7e   :  { %v6659_v45 = vld [vmem:[#allocation7 + $0xe9c] sm:$0xf0]  ;;  %v6343_v14 = vld [vmem:[#allocation7 + $0x4c4] sm:$0xf] }
  0x7f   :  { %v5201_v49 = vld [vmem:[#allocation7 + $0x840] sm:$0xf]  ;;  %v6002_v52 = vor.u32 %v6659_v45, %v6001_v44  ;;  %3272 = vmatpush.bf16.msrb.mxu2 %v5746_v48  ;;  %v6872_v44 = vpack.c.b16 %v610_v28, %v610_v28  ;;  %v4598_v45 = vor.u32 %v6303_v33, %v4595_v35  ;;  %v4307_v48 = vld [vmem:[#allocation7 + $0x160] sm:$0xf0] }
  0x80   :  { %v6459_v50 = vld [vmem:[#allocation7 + $0x85c] sm:$0xf0]  ;;  %v4755_v15 = vld [vmem:[#allocation7 + $0x4e0] sm:$0xf0] }
  0x81   :  { %v5457_v51 = vld [vmem:[#allocation7 + $0xa40] sm:$0xf]  ;;  %v5202_v59 = vor.u32 %v6459_v50, %v5201_v49  ;;  %3285 = vmatpush.bf16.msrb.mxu3 %v6002_v52  ;;  %v6295_v49 = vld [vmem:[#allocation7 + $0x344] sm:$0xf]  ;;  %v5110_v50 = vor.u32 %v6431_v39, %v5107_v40  ;;  %v4758_v22 = vor.u32 %v6343_v14, %v4755_v15 }
  0x82   :  { %v6523_v53 = vld [vmem:[#allocation7 + $0xa5c] sm:$0xf0]  ;;  %v6359_v52 = vld [vmem:[#allocation7 + $0x544] sm:$0xf] }
  0x83   :  { %v5713_v54 = vld [vmem:[#allocation7 + $0xc40] sm:$0xf]  ;;  %v5458_v63 = vor.u32 %v6523_v53, %v5457_v51  ;;  %3247 = vmatpush.bf16.msrb.mxu0 %v5202_v59  ;;  %v4563_v51 = vld [vmem:[#allocation7 + $0x360] sm:$0xf0] }
  0x84   :  { %v6587_v55 = vld [vmem:[#allocation7 + $0xc5c] sm:$0xf0]  ;;  %v4819_v53 = vld [vmem:[#allocation7 + $0x560] sm:$0xf0] }
  0x85   :  { %v5969_v56 = vld [vmem:[#allocation7 + $0xe40] sm:$0xf]  ;;  %v5714_v0 = vor.u32 %v6587_v55, %v5713_v54  ;;  %3260 = vmatpush.bf16.msrb.mxu1 %v5458_v63  ;;  %v6423_v54 = vld [vmem:[#allocation7 + $0x744] sm:$0xf] }
  0x86   :  { %v6651_v57 = vld [vmem:[#allocation7 + $0xe5c] sm:$0xf0]  ;;  %v5075_v55 = vld [vmem:[#allocation7 + $0x760] sm:$0xf0] }
  0x87   :  { %v5169_v58 = vld [vmem:[#allocation7 + $0x800] sm:$0xf]  ;;  %v5970_v5 = vor.u32 %v6651_v57, %v5969_v56  ;;  %3273 = vmatpush.bf16.msrb.mxu2 %v5714_v0  ;;  %v4310_v56 = vor.u32 %v6231_v47, %v4307_v48  ;;  %v4566_v57 = vor.u32 %v6295_v49, %v4563_v51  ;;  %v6223_v59 = vld [vmem:[#allocation7 + $0x104] sm:$0xf] }
  0x88   :  { %v6451_v60 = vld [vmem:[#allocation7 + $0x81c] sm:$0xf0]  ;;  %v4531_v63 = vld [vmem:[#allocation7 + $0x320] sm:$0xf0] }
  0x89   :  { %v5425_v61 = vld [vmem:[#allocation7 + $0xa00] sm:$0xf]  ;;  %v5170_v13 = vor.u32 %v6451_v60, %v5169_v58  ;;  %3286 = vmatpush.bf16.msrb.mxu3 %v5970_v5  ;;  %v4822_v58 = vor.u32 %v6359_v52, %v4819_v53  ;;  %v4275_v60 = vld [vmem:[#allocation7 + $0x120] sm:$0xf0] }
  0x8a   :  { %v6515_v62 = vld [vmem:[#allocation7 + $0xa1c] sm:$0xf0]  ;;  %v6351_v0 = vld [vmem:[#allocation7 + $0x504] sm:$0xf]  ;;  %v4278_v5 = vor.u32 %v6223_v59, %v4275_v60 }
  0x8b   :  { %v5681_v1 = vld [vmem:[#allocation7 + $0xc00] sm:$0xf]  ;;  %v5426_v18 = vor.u32 %v6515_v62, %v5425_v61  ;;  %3248 = vmatpush.bf16.msrb.mxu0 %v5170_v13  ;;  %v6287_v61 = vld [vmem:[#allocation7 + $0x304] sm:$0xf]  ;;  %v5078_v62 = vor.u32 %v6423_v54, %v5075_v55 }
  0x8c   :  { %v6579_v2 = vld [vmem:[#allocation7 + $0xc1c] sm:$0xf0]  ;;  %v4499_v13 = vld [vmem:[#allocation7 + $0x2e0] sm:$0xf0] }
  0x8d   :  { %v5937_v7 = vld [vmem:[#allocation7 + $0xe00] sm:$0xf]  ;;  %v5682_v19 = vor.u32 %v6579_v2, %v5681_v1  ;;  %3261 = vmatpush.bf16.msrb.mxu1 %v5426_v18  ;;  %v4787_v1 = vld [vmem:[#allocation7 + $0x520] sm:$0xf0]  ;;  %v4246_v18 = vor.u32 %v6215_v9, %v4243_v10 }
  0x8e   :  { %v6643_v8 = vld [vmem:[#allocation7 + $0xe1c] sm:$0xf0]  ;;  %3249 = vmatmul.bf16.vlgmr.msrb.gmra.mxu0 %v6868_v41  ;;  %v6415_v2 = vld [vmem:[#allocation7 + $0x704] sm:$0xf] }
  0x8f   :  { %v5938_v26 = vor.u32 %v6643_v8, %v5937_v7  ;;  %3274 = vmatpush.bf16.msrb.mxu2 %v5682_v19  ;;  %3293 = vmatpush.bf16.msra.mxu0 %v4374_v27  ;;  %v4534_v7 = vor.u32 %v6287_v61, %v4531_v63  ;;  %v4790_v8 = vor.u32 %v6351_v0, %v4787_v1  ;;  %v6407_v16 = vld [vmem:[#allocation7 + $0x6c4] sm:$0xf] }
  0x90   :  { %3262 = vmatmul.bf16.vlgmr.msrb.gmra.mxu1 %v6872_v44  ;;  %v5046_v12 = vor.u32 %v6415_v2, %v5043_v3  ;;  %v5011_v17 = vld [vmem:[#allocation7 + $0x6e0] sm:$0xf0]  ;;  %v4502_v19 = vor.u32 %v6279_v11, %v4499_v13 }
  0x91   :  { %3287 = vmatpush.bf16.msrb.mxu3 %v5938_v26  ;;  %3306 = vmatpush.bf16.msra.mxu1 %v4630_v29  ;;  %v6207_v23 = vld [vmem:[#allocation7 + $0x84] sm:$0xf]  ;;  %v5014_v26 = vor.u32 %v6407_v16, %v5011_v17 }
  0x92   :  { %3275 = vmatmul.bf16.vlgmr.msrb.gmra.mxu2 %v6866_v38  ;;  %v4211_v24 = vld [vmem:[#allocation7 + $0xa0] sm:$0xf0] }
  0x93   :  { %3319 = vmatpush.bf16.msra.mxu2 %v4886_v30  ;;  %3294 = vmatpush.bf16.msra.mxu0 %v4342_v43  ;;  %v6271_v25 = vld [vmem:[#allocation7 + $0x284] sm:$0xf]  ;;  %v4214_v32 = vor.u32 %v6207_v23, %v4211_v24 }
  0x94   :  { %3288 = vmatmul.bf16.vlgmr.msrb.gmra.mxu3 %v6870_v42  ;;  %v4467_v27 = vld [vmem:[#allocation7 + $0x2a0] sm:$0xf0] }
  0x95   :  { %3332 = vmatpush.bf16.msra.mxu3 %v5142_v34  ;;  %3307 = vmatpush.bf16.msra.mxu1 %v4598_v45  ;;  %v6335_v28 = vld [vmem:[#allocation7 + $0x484] sm:$0xf]  ;;  %v4470_v33 = vor.u32 %v6271_v25, %v4467_v27 }
  0x96   :  { %v4723_v29 = vld [vmem:[#allocation7 + $0x4a0] sm:$0xf0] }
  0x97   :  { %3320 = vmatpush.bf16.msra.mxu2 %v4854_v46  ;;  %3295 = vmatpush.bf16.msra.mxu0 %v4310_v56  ;;  %v6399_v30 = vld [vmem:[#allocation7 + $0x684] sm:$0xf]  ;;  %v4726_v34 = vor.u32 %v6335_v28, %v4723_v29 }
  0x98   :  { %v4979_v31 = vld [vmem:[#allocation7 + $0x6a0] sm:$0xf0] }
  0x99   :  { %3333 = vmatpush.bf16.msra.mxu3 %v5110_v50  ;;  %3308 = vmatpush.bf16.msra.mxu1 %v4566_v57  ;;  %v6199_v35 = vld [vmem:[#allocation7 + $0x44] sm:$0xf]  ;;  %v4982_v39 = vor.u32 %v6399_v30, %v4979_v31 }
  0x9a   :  { %v4179_v36 = vld [vmem:[#allocation7 + $0x60] sm:$0xf0] }
  0x9b   :  { %3321 = vmatpush.bf16.msra.mxu2 %v4822_v58  ;;  %3296 = vmatpush.bf16.msra.mxu0 %v4278_v5  ;;  %v6263_v37 = vld [vmem:[#allocation7 + $0x244] sm:$0xf]  ;;  %v4182_v48 = vor.u32 %v6199_v35, %v4179_v36 }
  0x9c   :  { %v4435_v40 = vld [vmem:[#allocation7 + $0x260] sm:$0xf0] }
  0x9d   :  { %3334 = vmatpush.bf16.msra.mxu3 %v5078_v62  ;;  %3309 = vmatpush.bf16.msra.mxu1 %v4534_v7  ;;  %v6327_v43 = vld [vmem:[#allocation7 + $0x444] sm:$0xf]  ;;  %v4438_v51 = vor.u32 %v6263_v37, %v4435_v40 }
  0x9e   :  { %v4691_v45 = vld [vmem:[#allocation7 + $0x460] sm:$0xf0] }
  0x9f   :  { %3322 = vmatpush.bf16.msra.mxu2 %v4790_v8  ;;  %3297 = vmatpush.bf16.msra.mxu0 %v4246_v18  ;;  %v6391_v46 = vld [vmem:[#allocation7 + $0x644] sm:$0xf]  ;;  %v4694_v52 = vor.u32 %v6327_v43, %v4691_v45 }
  0xa0   :  { %v4947_v47 = vld [vmem:[#allocation7 + $0x660] sm:$0xf0] }
  0xa1   :  { %3335 = vmatpush.bf16.msra.mxu3 %v5046_v12  ;;  %3310 = vmatpush.bf16.msra.mxu1 %v4502_v19  ;;  %v6191_v49 = vld [vmem:[#allocation7 + $0x4] sm:$0xf]  ;;  %v4950_v56 = vor.u32 %v6391_v46, %v4947_v47 }
  0xa2   :  { %v4147_v50 = vld [vmem:[#allocation7 + $0x20] sm:$0xf0] }
  0xa3   :  { %3323 = vmatpush.bf16.msra.mxu2 %v4758_v22  ;;  %3298 = vmatpush.bf16.msra.mxu0 %v4214_v32  ;;  %v6255_v53 = vld [vmem:[#allocation7 + $0x204] sm:$0xf]  ;;  %v4150_v63 = vor.u32 %v6191_v49, %v4147_v50 }
  0xa4   :  { %v4403_v54 = vld [vmem:[#allocation7 + $0x220] sm:$0xf0] }
  0xa5   :  { %3336 = vmatpush.bf16.msra.mxu3 %v5014_v26  ;;  %3311 = vmatpush.bf16.msra.mxu1 %v4470_v33  ;;  %v6319_v55 = vld [vmem:[#allocation7 + $0x404] sm:$0xf]  ;;  %v4406_v3 = vor.u32 %v6255_v53, %v4403_v54 }
  0xa6   :  { %v4659_v57 = vld [vmem:[#allocation7 + $0x420] sm:$0xf0] }
  0xa7   :  { %3324 = vmatpush.bf16.msra.mxu2 %v4726_v34  ;;  %v6383_v58 = vld [vmem:[#allocation7 + $0x604] sm:$0xf]  ;;  %3299 = vmatpush.bf16.msra.mxu0 %v4182_v48  ;;  %v4662_v5 = vor.u32 %v6319_v55, %v4659_v57 }
  0xa8   :  { %v4915_v59 = vld [vmem:[#allocation7 + $0x620] sm:$0xf0] }
  0xa9   :  { %3337 = vmatpush.bf16.msra.mxu3 %v4982_v39  ;;  %v6503_v60 = vld [vmem:[#allocation7 + $0x9c4] sm:$0xf]  ;;  %3312 = vmatpush.bf16.msra.mxu1 %v4438_v51  ;;  %v4918_v9 = vor.u32 %v6383_v58, %v4915_v59 }
  0xaa   :  { %v5395_v61 = vld [vmem:[#allocation7 + $0x9e0] sm:$0xf0] }
  0xab   :  { %v6567_v62 = vld [vmem:[#allocation7 + $0xbc4] sm:$0xf]  ;;  %3325 = vmatpush.bf16.msra.mxu2 %v4694_v52  ;;  %v5398_v10 = vor.u32 %v6503_v60, %v5395_v61  ;;  %3300 = vmatpush.bf16.msra.mxu0 %v4150_v63 }
  0xac   :  { %v5651_v0 = vld [vmem:[#allocation7 + $0xbe0] sm:$0xf0] }
  0xad   :  { %v6631_v1 = vld [vmem:[#allocation7 + $0xdc4] sm:$0xf]  ;;  %3338 = vmatpush.bf16.msra.mxu3 %v4950_v56  ;;  %v5654_v11 = vor.u32 %v6567_v62, %v5651_v0  ;;  %3313 = vmatpush.bf16.msra.mxu1 %v4406_v3 }
  0xae   :  { %v5907_v2 = vld [vmem:[#allocation7 + $0xde0] sm:$0xf0]  ;;  %3301 = vmatmul.bf16.vlgmr.msra.gmra.mxu0 %v6859_v20 }
  0xaf   :  { %v6695_v7 = vld [vmem:[#allocation7 + $0xfc4] sm:$0xf]  ;;  %v5910_v12 = vor.u32 %v6631_v1, %v5907_v2  ;;  %3326 = vmatpush.bf16.msra.mxu2 %v4662_v5  ;;  %3345 = vmatpush.bf16.msrb.mxu0 %v5398_v10 }
  0xb0   :  { %v6163_v8 = vld [vmem:[#allocation7 + $0xfe0] sm:$0xf0]  ;;  %3314 = vmatmul.bf16.vlgmr.msra.gmra.mxu1 %v6862_v21 }
  0xb1   :  { %v6495_v13 = vld [vmem:[#allocation7 + $0x984] sm:$0xf]  ;;  %v6166_v16 = vor.u32 %v6695_v7, %v6163_v8  ;;  %3339 = vmatpush.bf16.msra.mxu3 %v4918_v9  ;;  %3358 = vmatpush.bf16.msrb.mxu1 %v5654_v11 }
  0xb2   :  { %v5363_v14 = vld [vmem:[#allocation7 + $0x9a0] sm:$0xf0]  ;;  %3327 = vmatmul.bf16.vlgmr.msra.gmra.mxu2 %v6854_v4 }
  0xb3   :  { %v6559_v15 = vld [vmem:[#allocation7 + $0xb84] sm:$0xf]  ;;  %v5366_v24 = vor.u32 %v6495_v13, %v5363_v14  ;;  %3371 = vmatpush.bf16.msrb.mxu2 %v5910_v12 }
  0xb4   :  { %v5619_v17 = vld [vmem:[#allocation7 + $0xba0] sm:$0xf0]  ;;  %3340 = vmatmul.bf16.vlgmr.msra.gmra.mxu3 %v6856_v6 }
  0xb5   :  { %v6623_v18 = vld [vmem:[#allocation7 + $0xd84] sm:$0xf]  ;;  %v5622_v25 = vor.u32 %v6559_v15, %v5619_v17  ;;  %3384 = vmatpush.bf16.msrb.mxu3 %v6166_v16  ;;  %3346 = vmatpush.bf16.msrb.mxu0 %v5366_v24 }
  0xb6   :  { %v5875_v19 = vld [vmem:[#allocation7 + $0xda0] sm:$0xf0] }
  0xb7   :  { %v6687_v22 = vld [vmem:[#allocation7 + $0xf84] sm:$0xf]  ;;  %v5878_v26 = vor.u32 %v6623_v18, %v5875_v19  ;;  %3359 = vmatpush.bf16.msrb.mxu1 %v5622_v25 }
  0xb8   :  { %v6131_v23 = vld [vmem:[#allocation7 + $0xfa0] sm:$0xf0] }
  0xb9   :  { %v6487_v27 = vld [vmem:[#allocation7 + $0x944] sm:$0xf]  ;;  %v6134_v30 = vor.u32 %v6687_v22, %v6131_v23  ;;  %3372 = vmatpush.bf16.msrb.mxu2 %v5878_v26 }
  0xba   :  { %v5331_v28 = vld [vmem:[#allocation7 + $0x960] sm:$0xf0] }
  0xbb   :  { %v6551_v29 = vld [vmem:[#allocation7 + $0xb44] sm:$0xf]  ;;  %v5334_v36 = vor.u32 %v6487_v27, %v5331_v28  ;;  %3385 = vmatpush.bf16.msrb.mxu3 %v6134_v30 }
  0xbc   :  { %v5587_v31 = vld [vmem:[#allocation7 + $0xb60] sm:$0xf0] }
  0xbd   :  { %v6615_v32 = vld [vmem:[#allocation7 + $0xd44] sm:$0xf]  ;;  %v5590_v37 = vor.u32 %v6551_v29, %v5587_v31  ;;  %3347 = vmatpush.bf16.msrb.mxu0 %v5334_v36 }
  0xbe   :  { %v5843_v33 = vld [vmem:[#allocation7 + $0xd60] sm:$0xf0] }
  0xbf   :  { %v6679_v34 = vld [vmem:[#allocation7 + $0xf44] sm:$0xf]  ;;  %v5846_v39 = vor.u32 %v6615_v32, %v5843_v33  ;;  %3360 = vmatpush.bf16.msrb.mxu1 %v5590_v37 }
  0xc0   :  { %v6099_v35 = vld [vmem:[#allocation7 + $0xf60] sm:$0xf0] }
  0xc1   :  { %v6479_v40 = vld [vmem:[#allocation7 + $0x904] sm:$0xf]  ;;  %v6102_v46 = vor.u32 %v6679_v34, %v6099_v35  ;;  %3373 = vmatpush.bf16.msrb.mxu2 %v5846_v39 }
  0xc2   :  { %v5299_v43 = vld [vmem:[#allocation7 + $0x920] sm:$0xf0] }
  0xc3   :  { %v6543_v45 = vld [vmem:[#allocation7 + $0xb04] sm:$0xf]  ;;  %v5302_v52 = vor.u32 %v6479_v40, %v5299_v43  ;;  %3386 = vmatpush.bf16.msrb.mxu3 %v6102_v46  ;;  %v4377_v43 = vld [vmem:[#allocation7 + $0x1c8] sm:$0xf] }
  0xc4   :  { %v5555_v47 = vld [vmem:[#allocation7 + $0xb20] sm:$0xf0]  ;;  %v4633_v46 = vld [vmem:[#allocation7 + $0x3c8] sm:$0xf] }
  0xc5   :  { %v6607_v48 = vld [vmem:[#allocation7 + $0xd04] sm:$0xf]  ;;  %v5558_v53 = vor.u32 %v6543_v45, %v5555_v47  ;;  %3348 = vmatpush.bf16.msrb.mxu0 %v5302_v52  ;;  %v6252_v45 = vld [vmem:[#allocation7 + $0x1e4] sm:$0xf0] }
  0xc6   :  { %v5811_v49 = vld [vmem:[#allocation7 + $0xd20] sm:$0xf0] }
  0xc7   :  { %v6671_v50 = vld [vmem:[#allocation7 + $0xf04] sm:$0xf]  ;;  %v5814_v54 = vor.u32 %v6607_v48, %v5811_v49  ;;  %3361 = vmatpush.bf16.msrb.mxu1 %v5558_v53  ;;  %v6316_v48 = vld [vmem:[#allocation7 + $0x3e4] sm:$0xf0] }
  0xc8   :  { %v6067_v51 = vld [vmem:[#allocation7 + $0xf20] sm:$0xf0]  ;;  %v4889_v49 = vld [vmem:[#allocation7 + $0x5c8] sm:$0xf] }
  0xc9   :  { %v6471_v55 = vld [vmem:[#allocation7 + $0x8c4] sm:$0xf]  ;;  %v6070_v58 = vor.u32 %v6671_v50, %v6067_v51  ;;  %3374 = vmatpush.bf16.msrb.mxu2 %v5814_v54  ;;  %v6380_v50 = vld [vmem:[#allocation7 + $0x5e4] sm:$0xf0] }
  0xca   :  { %v5267_v56 = vld [vmem:[#allocation7 + $0x8e0] sm:$0xf0]  ;;  %v5145_v53 = vld [vmem:[#allocation7 + $0x7c8] sm:$0xf] }
  0xcb   :  { %v6535_v57 = vld [vmem:[#allocation7 + $0xac4] sm:$0xf]  ;;  %v5270_v0 = vor.u32 %v6471_v55, %v5267_v56  ;;  %3387 = vmatpush.bf16.msrb.mxu3 %v6070_v58  ;;  %v6444_v54 = vld [vmem:[#allocation7 + $0x7e4] sm:$0xf0]  ;;  %v4378_v56 = vor.u32 %v6252_v45, %v4377_v43  ;;  %v4890_v58 = vor.u32 %v6380_v50, %v4889_v49 }
  0xcc   :  { %v5523_v59 = vld [vmem:[#allocation7 + $0xae0] sm:$0xf0]  ;;  %v4761_v43 = vld [vmem:[#allocation7 + $0x4c8] sm:$0xf] }
  0xcd   :  { %v6599_v60 = vld [vmem:[#allocation7 + $0xcc4] sm:$0xf]  ;;  %v5526_v1 = vor.u32 %v6535_v57, %v5523_v59  ;;  %3349 = vmatpush.bf16.msrb.mxu0 %v5270_v0  ;;  %v4634_v57 = vor.u32 %v6316_v48, %v4633_v46  ;;  %v4345_v59 = vld [vmem:[#allocation7 + $0x188] sm:$0xf] }
  0xce   :  { %v5779_v61 = vld [vmem:[#allocation7 + $0xce0] sm:$0xf0]  ;;  %v4857_v0 = vld [vmem:[#allocation7 + $0x588] sm:$0xf] }
  0xcf   :  { %v6663_v62 = vld [vmem:[#allocation7 + $0xec4] sm:$0xf]  ;;  %v5782_v2 = vor.u32 %v6599_v60, %v5779_v61  ;;  %3362 = vmatpush.bf16.msrb.mxu1 %v5526_v1  ;;  %v6244_v60 = vld [vmem:[#allocation7 + $0x1a4] sm:$0xf0] }
  0xd0   :  { %v6035_v63 = vld [vmem:[#allocation7 + $0xee0] sm:$0xf0]  ;;  %v4601_v61 = vld [vmem:[#allocation7 + $0x388] sm:$0xf] }
  0xd1   :  { %v6463_v3 = vld [vmem:[#allocation7 + $0x884] sm:$0xf]  ;;  %v6038_v8 = vor.u32 %v6663_v62, %v6035_v63  ;;  %3375 = vmatpush.bf16.msrb.mxu2 %v5782_v2  ;;  %v5146_v62 = vor.u32 %v6444_v54, %v5145_v53  ;;  %v6308_v63 = vld [vmem:[#allocation7 + $0x3a4] sm:$0xf0] }
  0xd2   :  { %v5235_v5 = vld [vmem:[#allocation7 + $0x8a0] sm:$0xf0]  ;;  %v6372_v1 = vld [vmem:[#allocation7 + $0x5a4] sm:$0xf0] }
  0xd3   :  { %v6527_v7 = vld [vmem:[#allocation7 + $0xa84] sm:$0xf]  ;;  %v5238_v14 = vor.u32 %v6463_v3, %v5235_v5  ;;  %3388 = vmatpush.bf16.msrb.mxu3 %v6038_v8  ;;  %v5113_v2 = vld [vmem:[#allocation7 + $0x788] sm:$0xf]  ;;  %v4346_v5 = vor.u32 %v6244_v60, %v4345_v59  ;;  %v4858_v8 = vor.u32 %v6372_v1, %v4857_v0 }
  0xd4   :  { %v5491_v9 = vld [vmem:[#allocation7 + $0xaa0] sm:$0xf0]  ;;  %v6436_v3 = vld [vmem:[#allocation7 + $0x7a4] sm:$0xf0] }
  0xd5   :  { %v6591_v10 = vld [vmem:[#allocation7 + $0xc84] sm:$0xf]  ;;  %v5494_v15 = vor.u32 %v6527_v7, %v5491_v9  ;;  %3350 = vmatpush.bf16.msrb.mxu0 %v5238_v14  ;;  %v4602_v7 = vor.u32 %v6308_v63, %v4601_v61  ;;  %v4313_v9 = vld [vmem:[#allocation7 + $0x148] sm:$0xf] }
  0xd6   :  { %v5747_v11 = vld [vmem:[#allocation7 + $0xca0] sm:$0xf0]  ;;  %v4825_v14 = vld [vmem:[#allocation7 + $0x548] sm:$0xf] }
  0xd7   :  { %v6655_v12 = vld [vmem:[#allocation7 + $0xe84] sm:$0xf]  ;;  %v5750_v16 = vor.u32 %v6591_v10, %v5747_v11  ;;  %3363 = vmatpush.bf16.msrb.mxu1 %v5494_v15  ;;  %v6236_v10 = vld [vmem:[#allocation7 + $0x164] sm:$0xf0] }
  0xd8   :  { %v6003_v13 = vld [vmem:[#allocation7 + $0xea0] sm:$0xf0]  ;;  %v4569_v11 = vld [vmem:[#allocation7 + $0x348] sm:$0xf] }
  0xd9   :  { %v6455_v17 = vld [vmem:[#allocation7 + $0x844] sm:$0xf]  ;;  %v6006_v22 = vor.u32 %v6655_v12, %v6003_v13  ;;  %3376 = vmatpush.bf16.msrb.mxu2 %v5750_v16  ;;  %v5114_v12 = vor.u32 %v6436_v3, %v5113_v2  ;;  %v6300_v13 = vld [vmem:[#allocation7 + $0x364] sm:$0xf0] }
  0xda   :  { %v5203_v18 = vld [vmem:[#allocation7 + $0x860] sm:$0xf0]  ;;  %v6364_v15 = vld [vmem:[#allocation7 + $0x564] sm:$0xf0] }
  0xdb   :  { %v6519_v19 = vld [vmem:[#allocation7 + $0xa44] sm:$0xf]  ;;  %v5206_v28 = vor.u32 %v6455_v17, %v5203_v18  ;;  %3389 = vmatpush.bf16.msrb.mxu3 %v6006_v22  ;;  %v5081_v16 = vld [vmem:[#allocation7 + $0x748] sm:$0xf]  ;;  %v4314_v18 = vor.u32 %v6236_v10, %v4313_v9  ;;  %v4826_v22 = vor.u32 %v6364_v15, %v4825_v14 }
  0xdc   :  { %v5459_v23 = vld [vmem:[#allocation7 + $0xa60] sm:$0xf0]  ;;  %v6428_v17 = vld [vmem:[#allocation7 + $0x764] sm:$0xf0] }
  0xdd   :  { %v6583_v24 = vld [vmem:[#allocation7 + $0xc44] sm:$0xf]  ;;  %v5462_v31 = vor.u32 %v6519_v19, %v5459_v23  ;;  %3351 = vmatpush.bf16.msrb.mxu0 %v5206_v28  ;;  %v4570_v19 = vor.u32 %v6300_v13, %v4569_v11  ;;  %v4281_v23 = vld [vmem:[#allocation7 + $0x108] sm:$0xf] }
  0xde   :  { %v5715_v25 = vld [vmem:[#allocation7 + $0xc60] sm:$0xf0]  ;;  %v4793_v28 = vld [vmem:[#allocation7 + $0x508] sm:$0xf] }
  0xdf   :  { %v6647_v26 = vld [vmem:[#allocation7 + $0xe44] sm:$0xf]  ;;  %v5718_v32 = vor.u32 %v6583_v24, %v5715_v25  ;;  %3364 = vmatpush.bf16.msrb.mxu1 %v5462_v31  ;;  %v6228_v24 = vld [vmem:[#allocation7 + $0x124] sm:$0xf0] }
  0xe0   :  { %v5971_v27 = vld [vmem:[#allocation7 + $0xe60] sm:$0xf0]  ;;  %v4537_v25 = vld [vmem:[#allocation7 + $0x308] sm:$0xf] }
  0xe1   :  { %v6447_v29 = vld [vmem:[#allocation7 + $0x804] sm:$0xf]  ;;  %v5974_v36 = vor.u32 %v6647_v26, %v5971_v27  ;;  %3377 = vmatpush.bf16.msrb.mxu2 %v5718_v32  ;;  %v5082_v26 = vor.u32 %v6428_v17, %v5081_v16  ;;  %v6292_v27 = vld [vmem:[#allocation7 + $0x324] sm:$0xf0]  ;;  %v4282_v32 = vor.u32 %v6228_v24, %v4281_v23 }
  0xe2   :  { %v5171_v30 = vld [vmem:[#allocation7 + $0x820] sm:$0xf0]  ;;  %v6420_v31 = vld [vmem:[#allocation7 + $0x724] sm:$0xf0] }
  0xe3   :  { %v6511_v33 = vld [vmem:[#allocation7 + $0xa04] sm:$0xf]  ;;  %v5174_v47 = vor.u32 %v6447_v29, %v5171_v30  ;;  %3390 = vmatpush.bf16.msrb.mxu3 %v5974_v36  ;;  %v6356_v29 = vld [vmem:[#allocation7 + $0x524] sm:$0xf0] }
  0xe4   :  { %v5427_v34 = vld [vmem:[#allocation7 + $0xa20] sm:$0xf0]  ;;  %v5049_v30 = vld [vmem:[#allocation7 + $0x708] sm:$0xf] }
  0xe5   :  { %v6575_v35 = vld [vmem:[#allocation7 + $0xc04] sm:$0xf]  ;;  %v5430_v51 = vor.u32 %v6511_v33, %v5427_v34  ;;  %3352 = vmatpush.bf16.msrb.mxu0 %v5174_v47  ;;  %v4538_v33 = vor.u32 %v6292_v27, %v4537_v25  ;;  %v4794_v34 = vor.u32 %v6356_v29, %v4793_v28  ;;  %v6220_v36 = vld [vmem:[#allocation7 + $0xe4] sm:$0xf0] }
  0xe6   :  { %v5683_v37 = vld [vmem:[#allocation7 + $0xc20] sm:$0xf0]  ;;  %v6348_v45 = vld [vmem:[#allocation7 + $0x4e4] sm:$0xf0] }
  0xe7   :  { %v6639_v39 = vld [vmem:[#allocation7 + $0xe04] sm:$0xf]  ;;  %v5686_v52 = vor.u32 %v6575_v35, %v5683_v37  ;;  %3365 = vmatpush.bf16.msrb.mxu1 %v5430_v51  ;;  %v4249_v35 = vld [vmem:[#allocation7 + $0xc8] sm:$0xf]  ;;  %v4762_v50 = vor.u32 %v6348_v45, %v4761_v43 }
  0xe8   :  { %v5939_v40 = vld [vmem:[#allocation7 + $0xe20] sm:$0xf0]  ;;  %3353 = vmatmul.bf16.vlgmr.msrb.gmra.mxu0 %v6868_v41  ;;  %v4505_v37 = vld [vmem:[#allocation7 + $0x2c8] sm:$0xf]  ;;  %v4250_v48 = vor.u32 %v6220_v36, %v4249_v35 }
  0xe9   :  { %v5942_v55 = vor.u32 %v6639_v39, %v5939_v40  ;;  %3378 = vmatpush.bf16.msrb.mxu2 %v5686_v52  ;;  %3397 = vmatpush.bf16.msra.mxu0 %v4378_v56  ;;  %v5050_v39 = vor.u32 %v6420_v31, %v5049_v30  ;;  %v6284_v40 = vld [vmem:[#allocation7 + $0x2e4] sm:$0xf0] }
  0xea   :  { %3366 = vmatmul.bf16.vlgmr.msrb.gmra.mxu1 %v6872_v44  ;;  %v5017_v46 = vld [vmem:[#allocation7 + $0x6c8] sm:$0xf]  ;;  %v4506_v49 = vor.u32 %v6284_v40, %v4505_v37 }
  0xeb   :  { %3391 = vmatpush.bf16.msrb.mxu3 %v5942_v55  ;;  %3410 = vmatpush.bf16.msra.mxu1 %v4634_v57  ;;  %v6412_v47 = vld [vmem:[#allocation7 + $0x6e4] sm:$0xf0] }
  0xec   :  { %3379 = vmatmul.bf16.vlgmr.msrb.gmra.mxu2 %v6866_v38  ;;  %v4217_v51 = vld [vmem:[#allocation7 + $0x88] sm:$0xf]  ;;  %v5018_v54 = vor.u32 %v6412_v47, %v5017_v46 }
  0xed   :  { %3423 = vmatpush.bf16.msra.mxu2 %v4890_v58  ;;  %3398 = vmatpush.bf16.msra.mxu0 %v4346_v5  ;;  %v6212_v52 = vld [vmem:[#allocation7 + $0xa4] sm:$0xf0] }
  0xee   :  { %3392 = vmatmul.bf16.vlgmr.msrb.gmra.mxu3 %v6870_v42  ;;  %v4473_v53 = vld [vmem:[#allocation7 + $0x288] sm:$0xf]  ;;  %v4218_v60 = vor.u32 %v6212_v52, %v4217_v51 }
  0xef   :  { %3436 = vmatpush.bf16.msra.mxu3 %v5146_v62  ;;  %3411 = vmatpush.bf16.msra.mxu1 %v4602_v7  ;;  %v6276_v55 = vld [vmem:[#allocation7 + $0x2a4] sm:$0xf0] }
  0xf0   :  { %v4729_v56 = vld [vmem:[#allocation7 + $0x488] sm:$0xf]  ;;  %v4474_v61 = vor.u32 %v6276_v55, %v4473_v53 }
  0xf1   :  { %3424 = vmatpush.bf16.msra.mxu2 %v4858_v8  ;;  %3399 = vmatpush.bf16.msra.mxu0 %v4314_v18  ;;  %v6340_v57 = vld [vmem:[#allocation7 + $0x4a4] sm:$0xf0] }
  0xf2   :  { %v4985_v58 = vld [vmem:[#allocation7 + $0x688] sm:$0xf]  ;;  %v4730_v62 = vor.u32 %v6340_v57, %v4729_v56 }
  0xf3   :  { %3437 = vmatpush.bf16.msra.mxu3 %v5114_v12  ;;  %3412 = vmatpush.bf16.msra.mxu1 %v4570_v19  ;;  %v6404_v59 = vld [vmem:[#allocation7 + $0x6a4] sm:$0xf0] }
  0xf4   :  { %v4185_v63 = vld [vmem:[#allocation7 + $0x48] sm:$0xf]  ;;  %v4986_v2 = vor.u32 %v6404_v59, %v4985_v58 }
  0xf5   :  { %3425 = vmatpush.bf16.msra.mxu2 %v4826_v22  ;;  %3400 = vmatpush.bf16.msra.mxu0 %v4282_v32  ;;  %v6204_v0 = vld [vmem:[#allocation7 + $0x64] sm:$0xf0] }
  0xf6   :  { %v4441_v1 = vld [vmem:[#allocation7 + $0x248] sm:$0xf]  ;;  %v4186_v10 = vor.u32 %v6204_v0, %v4185_v63 }
  0xf7   :  { %3438 = vmatpush.bf16.msra.mxu3 %v5082_v26  ;;  %3413 = vmatpush.bf16.msra.mxu1 %v4538_v33  ;;  %v6268_v3 = vld [vmem:[#allocation7 + $0x264] sm:$0xf0] }
  0xf8   :  { %v4697_v5 = vld [vmem:[#allocation7 + $0x448] sm:$0xf]  ;;  %v4442_v13 = vor.u32 %v6268_v3, %v4441_v1 }
  0xf9   :  { %3426 = vmatpush.bf16.msra.mxu2 %v4794_v34  ;;  %3401 = vmatpush.bf16.msra.mxu0 %v4250_v48  ;;  %v6332_v7 = vld [vmem:[#allocation7 + $0x464] sm:$0xf0] }
  0xfa   :  { %v4953_v8 = vld [vmem:[#allocation7 + $0x648] sm:$0xf]  ;;  %v4698_v14 = vor.u32 %v6332_v7, %v4697_v5 }
  0xfb   :  { %3439 = vmatpush.bf16.msra.mxu3 %v5050_v39  ;;  %3414 = vmatpush.bf16.msra.mxu1 %v4506_v49  ;;  %v6396_v9 = vld [vmem:[#allocation7 + $0x664] sm:$0xf0] }
  0xfc   :  { %v4153_v11 = vld [vmem:[#allocation7 + $0x8] sm:$0xf]  ;;  %v4954_v18 = vor.u32 %v6396_v9, %v4953_v8 }
  0xfd   :  { %3427 = vmatpush.bf16.msra.mxu2 %v4762_v50  ;;  %3402 = vmatpush.bf16.msra.mxu0 %v4218_v60  ;;  %v6196_v12 = vld [vmem:[#allocation7 + $0x24] sm:$0xf0] }
  0xfe   :  { %v4409_v15 = vld [vmem:[#allocation7 + $0x208] sm:$0xf]  ;;  %v4154_v27 = vor.u32 %v6196_v12, %v4153_v11 }
  0xff   :  { %3440 = vmatpush.bf16.msra.mxu3 %v5018_v54  ;;  %3415 = vmatpush.bf16.msra.mxu1 %v4474_v61  ;;  %v6260_v16 = vld [vmem:[#allocation7 + $0x224] sm:$0xf0] }
 0x100   :  { %v4665_v17 = vld [vmem:[#allocation7 + $0x408] sm:$0xf]  ;;  %v4410_v31 = vor.u32 %v6260_v16, %v4409_v15 }
 0x101   :  { %3428 = vmatpush.bf16.msra.mxu2 %v4730_v62  ;;  %v6324_v19 = vld [vmem:[#allocation7 + $0x424] sm:$0xf0]  ;;  %3403 = vmatpush.bf16.msra.mxu0 %v4186_v10 }
 0x102   :  { %v4921_v22 = vld [vmem:[#allocation7 + $0x608] sm:$0xf]  ;;  %v4666_v32 = vor.u32 %v6324_v19, %v4665_v17 }
 0x103   :  { %3441 = vmatpush.bf16.msra.mxu3 %v4986_v2  ;;  %v6388_v23 = vld [vmem:[#allocation7 + $0x624] sm:$0xf0]  ;;  %3416 = vmatpush.bf16.msra.mxu1 %v4442_v13 }
 0x104   :  { %v5401_v24 = vld [vmem:[#allocation7 + $0x9c8] sm:$0xf]  ;;  %v4922_v35 = vor.u32 %v6388_v23, %v4921_v22 }
 0x105   :  { %v6508_v25 = vld [vmem:[#allocation7 + $0x9e4] sm:$0xf0]  ;;  %3429 = vmatpush.bf16.msra.mxu2 %v4698_v14  ;;  %3404 = vmatpush.bf16.msra.mxu0 %v4154_v27 }
 0x106   :  { %v5657_v26 = vld [vmem:[#allocation7 + $0xbc8] sm:$0xf]  ;;  %v5402_v36 = vor.u32 %v6508_v25, %v5401_v24 }
 0x107   :  { %v6572_v28 = vld [vmem:[#allocation7 + $0xbe4] sm:$0xf0]  ;;  %3442 = vmatpush.bf16.msra.mxu3 %v4954_v18  ;;  %3417 = vmatpush.bf16.msra.mxu1 %v4410_v31 }
 0x108   :  { %v5913_v29 = vld [vmem:[#allocation7 + $0xdc8] sm:$0xf]  ;;  %v5658_v37 = vor.u32 %v6572_v28, %v5657_v26  ;;  %3405 = vmatmul.bf16.vlgmr.msra.gmra.mxu0 %v6859_v20 }
 0x109   :  { %v6636_v30 = vld [vmem:[#allocation7 + $0xde4] sm:$0xf0]  ;;  %3430 = vmatpush.bf16.msra.mxu2 %v4666_v32  ;;  %3449 = vmatpush.bf16.msrb.mxu0 %v5402_v36 }
 0x10a   :  { %v6169_v33 = vld [vmem:[#allocation7 + $0xfc8] sm:$0xf]  ;;  %v5914_v39 = vor.u32 %v6636_v30, %v5913_v29  ;;  %3418 = vmatmul.bf16.vlgmr.msra.gmra.mxu1 %v6862_v21 }
 0x10b   :  { %v6700_v34 = vld [vmem:[#allocation7 + $0xfe4] sm:$0xf0]  ;;  %3443 = vmatpush.bf16.msra.mxu3 %v4922_v35  ;;  %3462 = vmatpush.bf16.msrb.mxu1 %v5658_v37 }
 0x10c   :  { %v5369_v40 = vld [vmem:[#allocation7 + $0x988] sm:$0xf]  ;;  %v6170_v46 = vor.u32 %v6700_v34, %v6169_v33  ;;  %3431 = vmatmul.bf16.vlgmr.msra.gmra.mxu2 %v6854_v4 }
 0x10d   :  { %v6500_v43 = vld [vmem:[#allocation7 + $0x9a4] sm:$0xf0]  ;;  %3475 = vmatpush.bf16.msrb.mxu2 %v5914_v39 }
 0x10e   :  { %v5625_v45 = vld [vmem:[#allocation7 + $0xb88] sm:$0xf]  ;;  %v5370_v52 = vor.u32 %v6500_v43, %v5369_v40  ;;  %3444 = vmatmul.bf16.vlgmr.msra.gmra.mxu3 %v6856_v6  ;;  %v3198_v43 = vpop.f32.mrf.mxu0 }
 0x10f   :  { %v6564_v47 = vld [vmem:[#allocation7 + $0xba4] sm:$0xf0]  ;;  %3488 = vmatpush.bf16.msrb.mxu3 %v6170_v46  ;;  %v3211_v46 = vpop.f32.mrf.mxu1 }
 0x110   :  { %v5881_v48 = vld [vmem:[#allocation7 + $0xd88] sm:$0xf]  ;;  %v5626_v53 = vor.u32 %v6564_v47, %v5625_v45  ;;  %3450 = vmatpush.bf16.msrb.mxu0 %v5370_v52  ;;  %v3212_v52 = vadd.f32 %v3211_v46, %v3198_v43  ;;  %v4859_v43 = vld [vmem:[#allocation7 + $0x5a8] sm:$0xf0] }
 0x111   :  { %v6628_v49 = vld [vmem:[#allocation7 + $0xda4] sm:$0xf0]  ;;  %v5115_v46 = vld [vmem:[#allocation7 + $0x7a8] sm:$0xf0] }
 0x112   :  { %v6137_v50 = vld [vmem:[#allocation7 + $0xf88] sm:$0xf]  ;;  %v5882_v54 = vor.u32 %v6628_v49, %v5881_v48  ;;  %3463 = vmatpush.bf16.msrb.mxu1 %v5626_v53  ;;  %v3224_v53 = vpop.f32.mrf.mxu2 }
 0x113   :  { %v6692_v51 = vld [vmem:[#allocation7 + $0xfa4] sm:$0xf0] }
 0x114   :  { %v5337_v55 = vld [vmem:[#allocation7 + $0x948] sm:$0xf]  ;;  %v6138_v58 = vor.u32 %v6692_v51, %v6137_v50  ;;  %3476 = vmatpush.bf16.msrb.mxu2 %v5882_v54 }
 0x115   :  { %v6492_v56 = vld [vmem:[#allocation7 + $0x964] sm:$0xf0] }
 0x116   :  { %v5593_v57 = vld [vmem:[#allocation7 + $0xb48] sm:$0xf]  ;;  %v5338_v0 = vor.u32 %v6492_v56, %v5337_v55  ;;  %3489 = vmatpush.bf16.msrb.mxu3 %v6138_v58  ;;  %v3237_v58 = vpop.f32.mrf.mxu3 }
 0x117   :  { %v6556_v59 = vld [vmem:[#allocation7 + $0xb64] sm:$0xf0] }
 0x118   :  { %v5849_v60 = vld [vmem:[#allocation7 + $0xd48] sm:$0xf]  ;;  %v5594_v1 = vor.u32 %v6556_v59, %v5593_v57  ;;  %3451 = vmatpush.bf16.msrb.mxu0 %v5338_v0 }
 0x119   :  { %v6620_v61 = vld [vmem:[#allocation7 + $0xd64] sm:$0xf0] }
 0x11a   :  { %v6105_v62 = vld [vmem:[#allocation7 + $0xf48] sm:$0xf]  ;;  %v5850_v2 = vor.u32 %v6620_v61, %v5849_v60  ;;  %3464 = vmatpush.bf16.msrb.mxu1 %v5594_v1  ;;  %v3225_v61 = vadd.f32 %v3224_v53, %v3212_v52  ;;  %v6296_v52 = vld [vmem:[#allocation7 + $0x34c] sm:$0xf] }
 0x11b   :  { %v6684_v63 = vld [vmem:[#allocation7 + $0xf64] sm:$0xf0] }
 0x11c   :  { %v5305_v3 = vld [vmem:[#allocation7 + $0x908] sm:$0xf]  ;;  %v6106_v8 = vor.u32 %v6684_v63, %v6105_v62  ;;  %3477 = vmatpush.bf16.msrb.mxu2 %v5850_v2 }
 0x11d   :  { %v6484_v5 = vld [vmem:[#allocation7 + $0x924] sm:$0xf0] }
 0x11e   :  { %v5561_v7 = vld [vmem:[#allocation7 + $0xb08] sm:$0xf]  ;;  %v5306_v14 = vor.u32 %v6484_v5, %v5305_v3  ;;  %3490 = vmatpush.bf16.msrb.mxu3 %v6106_v8  ;;  %v6890_v8 = vadd.f32 %v3237_v58, %v3225_v61  ;;  %v5083_v58 = vld [vmem:[#allocation7 + $0x768] sm:$0xf0] }
 0x11f   :  { %v6548_v9 = vld [vmem:[#allocation7 + $0xb24] sm:$0xf0] }
 0x120   :  { %v5817_v10 = vld [vmem:[#allocation7 + $0xd08] sm:$0xf]  ;;  %v5562_v15 = vor.u32 %v6548_v9, %v5561_v7  ;;  %3452 = vmatpush.bf16.msrb.mxu0 %v5306_v14  ;;  %v4379_v14 = vld [vmem:[#allocation7 + $0x1e8] sm:$0xf0] }
 0x121   :  { %v6612_v11 = vld [vmem:[#allocation7 + $0xd24] sm:$0xf0] }
 0x122   :  { %v6073_v12 = vld [vmem:[#allocation7 + $0xf08] sm:$0xf]  ;;  %v5818_v16 = vor.u32 %v6612_v11, %v5817_v10  ;;  %3465 = vmatpush.bf16.msrb.mxu1 %v5562_v15  ;;  %v6312_v15 = vld [vmem:[#allocation7 + $0x3cc] sm:$0xf] }
 0x123   :  { %v6676_v13 = vld [vmem:[#allocation7 + $0xf24] sm:$0xf0] }
 0x124   :  { %v5273_v17 = vld [vmem:[#allocation7 + $0x8c8] sm:$0xf]  ;;  %v6074_v22 = vor.u32 %v6676_v13, %v6073_v12  ;;  %3478 = vmatpush.bf16.msrb.mxu2 %v5818_v16  ;;  %v6248_v13 = vld [vmem:[#allocation7 + $0x1cc] sm:$0xf]  ;;  %v3200_v16 = vpop.f32.mrf.mxu0 }
 0x125   :  { %v6476_v18 = vld [vmem:[#allocation7 + $0x8e4] sm:$0xf0]  ;;  %v6280_v16 = vld [vmem:[#allocation7 + $0x2cc] sm:$0xf] }
 0x126   :  { %v5529_v19 = vld [vmem:[#allocation7 + $0xac8] sm:$0xf]  ;;  %v5274_v28 = vor.u32 %v6476_v18, %v5273_v17  ;;  %3491 = vmatpush.bf16.msrb.mxu3 %v6074_v22  ;;  %v4635_v18 = vld [vmem:[#allocation7 + $0x3e8] sm:$0xf0] }
 0x127   :  { %v6540_v23 = vld [vmem:[#allocation7 + $0xae4] sm:$0xf0]  ;;  %v4891_v22 = vld [vmem:[#allocation7 + $0x5e8] sm:$0xf0] }
 0x128   :  { %v5785_v24 = vld [vmem:[#allocation7 + $0xcc8] sm:$0xf]  ;;  %v5530_v29 = vor.u32 %v6540_v23, %v5529_v19  ;;  %3453 = vmatpush.bf16.msrb.mxu0 %v5274_v28  ;;  %v6376_v19 = vld [vmem:[#allocation7 + $0x5cc] sm:$0xf]  ;;  %v3213_v23 = vpop.f32.mrf.mxu1  ;;  %v3226_v28 = vpop.f32.mrf.mxu2 }
 0x129   :  { %v6604_v25 = vld [vmem:[#allocation7 + $0xce4] sm:$0xf0]  ;;  %v6344_v23 = vld [vmem:[#allocation7 + $0x4cc] sm:$0xf] }
 0x12a   :  { %v6041_v26 = vld [vmem:[#allocation7 + $0xec8] sm:$0xf]  ;;  %v5786_v30 = vor.u32 %v6604_v25, %v5785_v24  ;;  %3466 = vmatpush.bf16.msrb.mxu1 %v5530_v29 }
 0x12b   :  { %v6668_v27 = vld [vmem:[#allocation7 + $0xee4] sm:$0xf0] }
 0x12c   :  { %v5241_v31 = vld [vmem:[#allocation7 + $0x888] sm:$0xf]  ;;  %v6042_v34 = vor.u32 %v6668_v27, %v6041_v26  ;;  %3479 = vmatpush.bf16.msrb.mxu2 %v5786_v30  ;;  %v6440_v26 = vld [vmem:[#allocation7 + $0x7cc] sm:$0xf]  ;;  %v4382_v30 = vor.u32 %v6248_v13, %v4379_v14 }
 0x12d   :  { %v6468_v32 = vld [vmem:[#allocation7 + $0x8a4] sm:$0xf0]  ;;  %v5147_v27 = vld [vmem:[#allocation7 + $0x7e8] sm:$0xf0] }
 0x12e   :  { %v5497_v33 = vld [vmem:[#allocation7 + $0xa88] sm:$0xf]  ;;  %v5242_v45 = vor.u32 %v6468_v32, %v5241_v31  ;;  %3492 = vmatpush.bf16.msrb.mxu3 %v6042_v34  ;;  %v3239_v31 = vpop.f32.mrf.mxu3  ;;  %v4638_v32 = vor.u32 %v6312_v15, %v4635_v18  ;;  %v6240_v34 = vld [vmem:[#allocation7 + $0x18c] sm:$0xf] }
 0x12f   :  { %v6532_v35 = vld [vmem:[#allocation7 + $0xaa4] sm:$0xf0]  ;;  %v6216_v14 = vld [vmem:[#allocation7 + $0xcc] sm:$0xf] }
 0x130   :  { %v5753_v36 = vld [vmem:[#allocation7 + $0xc88] sm:$0xf]  ;;  %v5498_v47 = vor.u32 %v6532_v35, %v5497_v33  ;;  %3454 = vmatpush.bf16.msrb.mxu0 %v5242_v45  ;;  %v4894_v33 = vor.u32 %v6376_v19, %v4891_v22  ;;  %v4347_v35 = vld [vmem:[#allocation7 + $0x1a8] sm:$0xf0]  ;;  %v3263_v18 = vpop.f32.mrf.mxu1 }
 0x131   :  { %v6596_v37 = vld [vmem:[#allocation7 + $0xca4] sm:$0xf0]  ;;  %v6432_v45 = vld [vmem:[#allocation7 + $0x78c] sm:$0xf] }
 0x132   :  { %v6009_v39 = vld [vmem:[#allocation7 + $0xe88] sm:$0xf]  ;;  %v5754_v48 = vor.u32 %v6596_v37, %v5753_v36  ;;  %3467 = vmatpush.bf16.msrb.mxu1 %v5498_v47  ;;  %v6304_v36 = vld [vmem:[#allocation7 + $0x38c] sm:$0xf]  ;;  %v5150_v37 = vor.u32 %v6440_v26, %v5147_v27  ;;  %v4350_v47 = vor.u32 %v6240_v34, %v4347_v35  ;;  %v5118_v53 = vor.u32 %v6432_v45, %v5115_v46  ;;  %v3276_v34 = vpop.f32.mrf.mxu2 }
 0x133   :  { %v6660_v40 = vld [vmem:[#allocation7 + $0xea4] sm:$0xf0]  ;;  %v4251_v15 = vld [vmem:[#allocation7 + $0xe8] sm:$0xf0] }
 0x134   :  { %v5209_v49 = vld [vmem:[#allocation7 + $0x848] sm:$0xf]  ;;  %v6010_v54 = vor.u32 %v6660_v40, %v6009_v39  ;;  %3480 = vmatpush.bf16.msrb.mxu2 %v5754_v48  ;;  %v4603_v39 = vld [vmem:[#allocation7 + $0x3a8] sm:$0xf0]  ;;  %v4254_v28 = vor.u32 %v6216_v14, %v4251_v15 }
 0x135   :  { %v6460_v50 = vld [vmem:[#allocation7 + $0x864] sm:$0xf0]  ;;  %v6368_v40 = vld [vmem:[#allocation7 + $0x58c] sm:$0xf]  ;;  %v4606_v48 = vor.u32 %v6304_v36, %v4603_v39 }
 0x136   :  { %v5465_v51 = vld [vmem:[#allocation7 + $0xa48] sm:$0xf]  ;;  %v5210_v62 = vor.u32 %v6460_v50, %v5209_v49  ;;  %3493 = vmatpush.bf16.msrb.mxu3 %v6010_v54  ;;  %v4862_v49 = vor.u32 %v6368_v40, %v4859_v43  ;;  %v6232_v50 = vld [vmem:[#allocation7 + $0x14c] sm:$0xf]  ;;  %v3289_v40 = vpop.f32.mrf.mxu3 }
 0x137   :  { %v6524_v55 = vld [vmem:[#allocation7 + $0xa64] sm:$0xf0]  ;;  %v4571_v54 = vld [vmem:[#allocation7 + $0x368] sm:$0xf0] }
 0x138   :  { %v5721_v56 = vld [vmem:[#allocation7 + $0xc48] sm:$0xf]  ;;  %v5466_v1 = vor.u32 %v6524_v55, %v5465_v51  ;;  %3455 = vmatpush.bf16.msrb.mxu0 %v5210_v62  ;;  %v4315_v51 = vld [vmem:[#allocation7 + $0x168] sm:$0xf0] }
 0x139   :  { %v6588_v57 = vld [vmem:[#allocation7 + $0xc64] sm:$0xf0]  ;;  %v6360_v55 = vld [vmem:[#allocation7 + $0x54c] sm:$0xf] }
 0x13a   :  { %v5977_v59 = vld [vmem:[#allocation7 + $0xe48] sm:$0xf]  ;;  %v5722_v2 = vor.u32 %v6588_v57, %v5721_v56  ;;  %3468 = vmatpush.bf16.msrb.mxu1 %v5466_v1  ;;  %v4827_v56 = vld [vmem:[#allocation7 + $0x568] sm:$0xf0] }
 0x13b   :  { %v6652_v60 = vld [vmem:[#allocation7 + $0xe64] sm:$0xf0]  ;;  %v6424_v57 = vld [vmem:[#allocation7 + $0x74c] sm:$0xf]  ;;  %v4830_v61 = vor.u32 %v6360_v55, %v4827_v56 }
 0x13c   :  { %v5177_v63 = vld [vmem:[#allocation7 + $0x808] sm:$0xf]  ;;  %v5978_v9 = vor.u32 %v6652_v60, %v5977_v59  ;;  %3481 = vmatpush.bf16.msrb.mxu2 %v5722_v2  ;;  %v4318_v59 = vor.u32 %v6232_v50, %v4315_v51  ;;  %v4574_v60 = vor.u32 %v6296_v52, %v4571_v54  ;;  %v6224_v62 = vld [vmem:[#allocation7 + $0x10c] sm:$0xf]  ;;  %v5086_v1 = vor.u32 %v6424_v57, %v5083_v58  ;;  %v3265_v54 = vpop.f32.mrf.mxu1 }
 0x13d   :  { %v6452_v0 = vld [vmem:[#allocation7 + $0x824] sm:$0xf0]  ;;  %v4539_v2 = vld [vmem:[#allocation7 + $0x328] sm:$0xf0] }
 0x13e   :  { %v5433_v3 = vld [vmem:[#allocation7 + $0xa08] sm:$0xf]  ;;  %v5178_v17 = vor.u32 %v6452_v0, %v5177_v63  ;;  %3494 = vmatpush.bf16.msrb.mxu3 %v5978_v9  ;;  %v4283_v63 = vld [vmem:[#allocation7 + $0x128] sm:$0xf0] }
 0x13f   :  { %v6516_v5 = vld [vmem:[#allocation7 + $0xa24] sm:$0xf0]  ;;  %v6288_v0 = vld [vmem:[#allocation7 + $0x30c] sm:$0xf] }
 0x140   :  { %v5689_v7 = vld [vmem:[#allocation7 + $0xc08] sm:$0xf]  ;;  %v5434_v24 = vor.u32 %v6516_v5, %v5433_v3  ;;  %3456 = vmatpush.bf16.msrb.mxu0 %v5178_v17  ;;  %v6352_v3 = vld [vmem:[#allocation7 + $0x50c] sm:$0xf] }
 0x141   :  { %v6580_v10 = vld [vmem:[#allocation7 + $0xc24] sm:$0xf0]  ;;  %v4795_v5 = vld [vmem:[#allocation7 + $0x528] sm:$0xf0] }
 0x142   :  { %v5945_v11 = vld [vmem:[#allocation7 + $0xe08] sm:$0xf]  ;;  %v5690_v25 = vor.u32 %v6580_v10, %v5689_v7  ;;  %3469 = vmatpush.bf16.msrb.mxu1 %v5434_v24  ;;  %v6416_v7 = vld [vmem:[#allocation7 + $0x70c] sm:$0xf]  ;;  %v4286_v10 = vor.u32 %v6224_v62, %v4283_v63  ;;  %v4798_v13 = vor.u32 %v6352_v3, %v4795_v5 }
 0x143   :  { %v6644_v12 = vld [vmem:[#allocation7 + $0xe24] sm:$0xf0]  ;;  %3457 = vmatmul.bf16.vlgmr.msrb.gmra.mxu0 %v6868_v41  ;;  %v5051_v9 = vld [vmem:[#allocation7 + $0x728] sm:$0xf0] }
 0x144   :  { %v5946_v29 = vor.u32 %v6644_v12, %v5945_v11  ;;  %3482 = vmatpush.bf16.msrb.mxu2 %v5690_v25  ;;  %3501 = vmatpush.bf16.msra.mxu0 %v4382_v30  ;;  %v3250_v11 = vpop.f32.mrf.mxu0  ;;  %v4542_v12 = vor.u32 %v6288_v0, %v4539_v2  ;;  %v5054_v19 = vor.u32 %v6416_v7, %v5051_v9  ;;  %v4507_v22 = vld [vmem:[#allocation7 + $0x2e8] sm:$0xf0]  ;;  %v3278_v7 = vpop.f32.mrf.mxu2 }
 0x145   :  { %3470 = vmatmul.bf16.vlgmr.msrb.gmra.mxu1 %v6872_v44  ;;  %v3251_v17 = vadd.f32 %v3250_v11, %v6890_v8  ;;  %v4763_v24 = vld [vmem:[#allocation7 + $0x4e8] sm:$0xf0] }
 0x146   :  { %3495 = vmatpush.bf16.msrb.mxu3 %v5946_v29  ;;  %3514 = vmatpush.bf16.msra.mxu1 %v4638_v32  ;;  %v6408_v25 = vld [vmem:[#allocation7 + $0x6cc] sm:$0xf]  ;;  %v4510_v29 = vor.u32 %v6280_v16, %v4507_v22  ;;  %v4766_v30 = vor.u32 %v6344_v23, %v4763_v24 }
 0x147   :  { %3483 = vmatmul.bf16.vlgmr.msrb.gmra.mxu2 %v6866_v38  ;;  %v5019_v26 = vld [vmem:[#allocation7 + $0x6e8] sm:$0xf0]  ;;  %v3264_v27 = vadd.f32 %v3263_v18, %v3251_v17 }
 0x148   :  { %3527 = vmatpush.bf16.msra.mxu2 %v4894_v33  ;;  %3502 = vmatpush.bf16.msra.mxu0 %v4350_v47  ;;  %v6208_v31 = vld [vmem:[#allocation7 + $0x8c] sm:$0xf]  ;;  %v5022_v8 = vor.u32 %v6408_v25, %v5019_v26 }
 0x149   :  { %3496 = vmatmul.bf16.vlgmr.msrb.gmra.mxu3 %v6870_v42  ;;  %v4219_v32 = vld [vmem:[#allocation7 + $0xa8] sm:$0xf0]  ;;  %v3277_v39 = vadd.f32 %v3276_v34, %v3264_v27 }
 0x14a   :  { %3540 = vmatpush.bf16.msra.mxu3 %v5150_v37  ;;  %3515 = vmatpush.bf16.msra.mxu1 %v4606_v48  ;;  %v6272_v33 = vld [vmem:[#allocation7 + $0x28c] sm:$0xf]  ;;  %v4222_v46 = vor.u32 %v6208_v31, %v4219_v32 }
 0x14b   :  { %v4475_v35 = vld [vmem:[#allocation7 + $0x2a8] sm:$0xf0]  ;;  %v6897_v47 = vadd.f32 %v3289_v40, %v3277_v39 }
 0x14c   :  { %3528 = vmatpush.bf16.msra.mxu2 %v4862_v49  ;;  %3503 = vmatpush.bf16.msra.mxu0 %v4318_v59  ;;  %v6336_v36 = vld [vmem:[#allocation7 + $0x48c] sm:$0xf]  ;;  %v3252_v48 = vpop.f32.mrf.mxu0  ;;  %v4478_v49 = vor.u32 %v6272_v33, %v4475_v35 }
 0x14d   :  { %v4731_v37 = vld [vmem:[#allocation7 + $0x4a8] sm:$0xf0] }
 0x14e   :  { %3541 = vmatpush.bf16.msra.mxu3 %v5118_v53  ;;  %3516 = vmatpush.bf16.msra.mxu1 %v4574_v60  ;;  %v6400_v43 = vld [vmem:[#allocation7 + $0x68c] sm:$0xf]  ;;  %v4734_v50 = vor.u32 %v6336_v36, %v4731_v37 }
 0x14f   :  { %v4987_v45 = vld [vmem:[#allocation7 + $0x6a8] sm:$0xf0] }
 0x150   :  { %3529 = vmatpush.bf16.msra.mxu2 %v4830_v61  ;;  %3504 = vmatpush.bf16.msra.mxu0 %v4286_v10  ;;  %v6200_v51 = vld [vmem:[#allocation7 + $0x4c] sm:$0xf]  ;;  %v4990_v55 = vor.u32 %v6400_v43, %v4987_v45 }
 0x151   :  { %v4187_v52 = vld [vmem:[#allocation7 + $0x68] sm:$0xf0] }
 0x152   :  { %3542 = vmatpush.bf16.msra.mxu3 %v5086_v1  ;;  %3517 = vmatpush.bf16.msra.mxu1 %v4542_v12  ;;  %v6264_v53 = vld [vmem:[#allocation7 + $0x24c] sm:$0xf]  ;;  %v4190_v61 = vor.u32 %v6200_v51, %v4187_v52 }
 0x153   :  { %v4443_v56 = vld [vmem:[#allocation7 + $0x268] sm:$0xf0] }
 0x154   :  { %3530 = vmatpush.bf16.msra.mxu2 %v4798_v13  ;;  %3505 = vmatpush.bf16.msra.mxu0 %v4254_v28  ;;  %v6328_v57 = vld [vmem:[#allocation7 + $0x44c] sm:$0xf]  ;;  %v4446_v0 = vor.u32 %v6264_v53, %v4443_v56  ;;  %v3291_v13 = vpop.f32.mrf.mxu3  ;;  %v3302_v7 = vpop.f32.mrf.mxu0 }
 0x155   :  { %v4699_v58 = vld [vmem:[#allocation7 + $0x468] sm:$0xf0] }
 0x156   :  { %3543 = vmatpush.bf16.msra.mxu3 %v5054_v19  ;;  %3518 = vmatpush.bf16.msra.mxu1 %v4510_v29  ;;  %v6392_v59 = vld [vmem:[#allocation7 + $0x64c] sm:$0xf]  ;;  %v4702_v1 = vor.u32 %v6328_v57, %v4699_v58 }
 0x157   :  { %v4955_v60 = vld [vmem:[#allocation7 + $0x668] sm:$0xf0] }
 0x158   :  { %3531 = vmatpush.bf16.msra.mxu2 %v4766_v30  ;;  %3506 = vmatpush.bf16.msra.mxu0 %v4222_v46  ;;  %v6192_v62 = vld [vmem:[#allocation7 + $0xc] sm:$0xf]  ;;  %v4958_v9 = vor.u32 %v6392_v59, %v4955_v60 }
 0x159   :  { %v4155_v63 = vld [vmem:[#allocation7 + $0x28] sm:$0xf0] }
 0x15a   :  { %3544 = vmatpush.bf16.msra.mxu3 %v5022_v8  ;;  %3519 = vmatpush.bf16.msra.mxu1 %v4478_v49  ;;  %v6256_v2 = vld [vmem:[#allocation7 + $0x20c] sm:$0xf]  ;;  %v4158_v17 = vor.u32 %v6192_v62, %v4155_v63 }
 0x15b   :  { %v4411_v3 = vld [vmem:[#allocation7 + $0x228] sm:$0xf0] }
 0x15c   :  { %3532 = vmatpush.bf16.msra.mxu2 %v4734_v50  ;;  %v6320_v5 = vld [vmem:[#allocation7 + $0x40c] sm:$0xf]  ;;  %3507 = vmatpush.bf16.msra.mxu0 %v4190_v61  ;;  %v4414_v23 = vor.u32 %v6256_v2, %v4411_v3 }
 0x15d   :  { %v4667_v10 = vld [vmem:[#allocation7 + $0x428] sm:$0xf0] }
 0x15e   :  { %3545 = vmatpush.bf16.msra.mxu3 %v4990_v55  ;;  %v6384_v11 = vld [vmem:[#allocation7 + $0x60c] sm:$0xf]  ;;  %3520 = vmatpush.bf16.msra.mxu1 %v4446_v0  ;;  %v4670_v24 = vor.u32 %v6320_v5, %v4667_v10 }
 0x15f   :  { %v4923_v12 = vld [vmem:[#allocation7 + $0x628] sm:$0xf0] }
 0x160   :  { %v6504_v14 = vld [vmem:[#allocation7 + $0x9cc] sm:$0xf]  ;;  %3533 = vmatpush.bf16.msra.mxu2 %v4702_v1  ;;  %v4926_v27 = vor.u32 %v6384_v11, %v4923_v12  ;;  %3508 = vmatpush.bf16.msra.mxu0 %v4158_v17 }
 0x161   :  { %v5403_v15 = vld [vmem:[#allocation7 + $0x9e8] sm:$0xf0] }
 0x162   :  { %v6568_v16 = vld [vmem:[#allocation7 + $0xbcc] sm:$0xf]  ;;  %3546 = vmatpush.bf16.msra.mxu3 %v4958_v9  ;;  %v5406_v28 = vor.u32 %v6504_v14, %v5403_v15  ;;  %3521 = vmatpush.bf16.msra.mxu1 %v4414_v23  ;;  %v3315_v14 = vpop.f32.mrf.mxu1 }
 0x163   :  { %v5659_v18 = vld [vmem:[#allocation7 + $0xbe8] sm:$0xf0]  ;;  %3509 = vmatmul.bf16.vlgmr.msra.gmra.mxu0 %v6859_v20 }
 0x164   :  { %v6632_v19 = vld [vmem:[#allocation7 + $0xdcc] sm:$0xf]  ;;  %v5662_v29 = vor.u32 %v6568_v16, %v5659_v18  ;;  %3534 = vmatpush.bf16.msra.mxu2 %v4670_v24  ;;  %3553 = vmatpush.bf16.msrb.mxu0 %v5406_v28 }
 0x165   :  { %v5915_v22 = vld [vmem:[#allocation7 + $0xde8] sm:$0xf0]  ;;  %3522 = vmatmul.bf16.vlgmr.msra.gmra.mxu1 %v6862_v21 }
 0x166   :  { %v6696_v25 = vld [vmem:[#allocation7 + $0xfcc] sm:$0xf]  ;;  %v5918_v30 = vor.u32 %v6632_v19, %v5915_v22  ;;  %3547 = vmatpush.bf16.msra.mxu3 %v4926_v27  ;;  %3566 = vmatpush.bf16.msrb.mxu1 %v5662_v29  ;;  %v3316_v19 = vadd.f32 %v3315_v14, %v3302_v7 }
 0x167   :  { %v6171_v26 = vld [vmem:[#allocation7 + $0xfe8] sm:$0xf0]  ;;  %3535 = vmatmul.bf16.vlgmr.msra.gmra.mxu2 %v6854_v4 }
 0x168   :  { %v6496_v31 = vld [vmem:[#allocation7 + $0x98c] sm:$0xf]  ;;  %v6174_v34 = vor.u32 %v6696_v25, %v6171_v26  ;;  %3579 = vmatpush.bf16.msrb.mxu2 %v5918_v30  ;;  %v3328_v30 = vpop.f32.mrf.mxu2 }
 0x169   :  { %v5371_v32 = vld [vmem:[#allocation7 + $0x9a8] sm:$0xf0]  ;;  %3548 = vmatmul.bf16.vlgmr.msra.gmra.mxu3 %v6856_v6 }
 0x16a   :  { %v6560_v33 = vld [vmem:[#allocation7 + $0xb8c] sm:$0xf]  ;;  %v5374_v40 = vor.u32 %v6496_v31, %v5371_v32  ;;  %3592 = vmatpush.bf16.msrb.mxu3 %v6174_v34 }
 0x16b   :  { %v5627_v8 = vld [vmem:[#allocation7 + $0xba8] sm:$0xf0] }
 0x16c   :  { %v6624_v35 = vld [vmem:[#allocation7 + $0xd8c] sm:$0xf]  ;;  %v5630_v43 = vor.u32 %v6560_v33, %v5627_v8  ;;  %3554 = vmatpush.bf16.msrb.mxu0 %v5374_v40  ;;  %v3329_v8 = vadd.f32 %v3328_v30, %v3316_v19  ;;  %v4609_v30 = vld [vmem:[#allocation7 + $0x390] sm:$0xf] }
 0x16d   :  { %v5883_v36 = vld [vmem:[#allocation7 + $0xda8] sm:$0xf0] }
 0x16e   :  { %v6688_v37 = vld [vmem:[#allocation7 + $0xf8c] sm:$0xf]  ;;  %v5886_v45 = vor.u32 %v6624_v35, %v5883_v36  ;;  %3567 = vmatpush.bf16.msrb.mxu1 %v5630_v43  ;;  %v3341_v35 = vpop.f32.mrf.mxu3  ;;  %v3304_v43 = vpop.f32.mrf.mxu0 }
 0x16f   :  { %v6139_v39 = vld [vmem:[#allocation7 + $0xfa8] sm:$0xf0]  ;;  %v6903_v40 = vadd.f32 %v3341_v35, %v3329_v8  ;;  %v5121_v8 = vld [vmem:[#allocation7 + $0x790] sm:$0xf] }
 0x170   :  { %v6488_v46 = vld [vmem:[#allocation7 + $0x94c] sm:$0xf]  ;;  %v6142_v50 = vor.u32 %v6688_v37, %v6139_v39  ;;  %3580 = vmatpush.bf16.msrb.mxu2 %v5886_v45  ;;  %v6437_v35 = vld [vmem:[#allocation7 + $0x7ac] sm:$0xf0] }
 0x171   :  { %v5339_v48 = vld [vmem:[#allocation7 + $0x968] sm:$0xf0]  ;;  %v4321_v43 = vld [vmem:[#allocation7 + $0x150] sm:$0xf] }
 0x172   :  { %v6552_v49 = vld [vmem:[#allocation7 + $0xb4c] sm:$0xf]  ;;  %v5342_v56 = vor.u32 %v6488_v46, %v5339_v48  ;;  %3593 = vmatpush.bf16.msrb.mxu3 %v6142_v50 }
 0x173   :  { %v5595_v51 = vld [vmem:[#allocation7 + $0xb68] sm:$0xf0] }
 0x174   :  { %v6616_v52 = vld [vmem:[#allocation7 + $0xd4c] sm:$0xf]  ;;  %v5598_v57 = vor.u32 %v6552_v49, %v5595_v51  ;;  %3555 = vmatpush.bf16.msrb.mxu0 %v5342_v56  ;;  %v3317_v51 = vpop.f32.mrf.mxu1 }
 0x175   :  { %v5851_v53 = vld [vmem:[#allocation7 + $0xd68] sm:$0xf0]  ;;  %v6365_v51 = vld [vmem:[#allocation7 + $0x56c] sm:$0xf0] }
 0x176   :  { %v6680_v54 = vld [vmem:[#allocation7 + $0xf4c] sm:$0xf]  ;;  %v5854_v58 = vor.u32 %v6616_v52, %v5851_v53  ;;  %3568 = vmatpush.bf16.msrb.mxu1 %v5598_v57 }
 0x177   :  { %v6107_v55 = vld [vmem:[#allocation7 + $0xf68] sm:$0xf0] }
 0x178   :  { %v6480_v59 = vld [vmem:[#allocation7 + $0x90c] sm:$0xf]  ;;  %v6110_v62 = vor.u32 %v6680_v54, %v6107_v55  ;;  %3581 = vmatpush.bf16.msrb.mxu2 %v5854_v58 }
 0x179   :  { %v5307_v60 = vld [vmem:[#allocation7 + $0x928] sm:$0xf0] }
 0x17a   :  { %v6544_v61 = vld [vmem:[#allocation7 + $0xb0c] sm:$0xf]  ;;  %v5310_v5 = vor.u32 %v6480_v59, %v5307_v60  ;;  %3594 = vmatpush.bf16.msrb.mxu3 %v6110_v62 }
 0x17b   :  { %v5563_v63 = vld [vmem:[#allocation7 + $0xb28] sm:$0xf0] }
 0x17c   :  { %v6608_v0 = vld [vmem:[#allocation7 + $0xd0c] sm:$0xf]  ;;  %v5566_v9 = vor.u32 %v6544_v61, %v5563_v63  ;;  %3556 = vmatpush.bf16.msrb.mxu0 %v5310_v5 }
 0x17d   :  { %v5819_v1 = vld [vmem:[#allocation7 + $0xd28] sm:$0xf0] }
 0x17e   :  { %v6672_v2 = vld [vmem:[#allocation7 + $0xf0c] sm:$0xf]  ;;  %v5822_v10 = vor.u32 %v6608_v0, %v5819_v1  ;;  %3569 = vmatpush.bf16.msrb.mxu1 %v5566_v9 }
 0x17f   :  { %v6075_v3 = vld [vmem:[#allocation7 + $0xf28] sm:$0xf0] }
 0x180   :  { %v6472_v11 = vld [vmem:[#allocation7 + $0x8cc] sm:$0xf]  ;;  %v6078_v15 = vor.u32 %v6672_v2, %v6075_v3  ;;  %3582 = vmatpush.bf16.msrb.mxu2 %v5822_v10  ;;  %v3330_v2 = vpop.f32.mrf.mxu2  ;;  %v3343_v10 = vpop.f32.mrf.mxu3 }
 0x181   :  { %v5275_v12 = vld [vmem:[#allocation7 + $0x8e8] sm:$0xf0]  ;;  %v6909_v2 = vld [vmem:[#allocation9] sm:$0xff] }
 0x182   :  { %v6536_v13 = vld [vmem:[#allocation7 + $0xacc] sm:$0xf]  ;;  %v5278_v24 = vor.u32 %v6472_v11, %v5275_v12  ;;  %3595 = vmatpush.bf16.msrb.mxu3 %v6078_v15  ;;  %v4385_v11 = vld [vmem:[#allocation7 + $0x1d0] sm:$0xf] }
 0x183   :  { %v5531_v16 = vld [vmem:[#allocation7 + $0xae8] sm:$0xf0]  ;;  %v6253_v12 = vld [vmem:[#allocation7 + $0x1ec] sm:$0xf0] }
 0x184   :  { %v6600_v17 = vld [vmem:[#allocation7 + $0xccc] sm:$0xf]  ;;  %v5534_v25 = vor.u32 %v6536_v13, %v5531_v16  ;;  %3557 = vmatpush.bf16.msrb.mxu0 %v5278_v24  ;;  %v4641_v13 = vld [vmem:[#allocation7 + $0x3d0] sm:$0xf] }
 0x185   :  { %v5787_v18 = vld [vmem:[#allocation7 + $0xce8] sm:$0xf0]  ;;  %v6317_v15 = vld [vmem:[#allocation7 + $0x3ec] sm:$0xf0] }
 0x186   :  { %v6664_v22 = vld [vmem:[#allocation7 + $0xecc] sm:$0xf]  ;;  %v5790_v26 = vor.u32 %v6600_v17, %v5787_v18  ;;  %3570 = vmatpush.bf16.msrb.mxu1 %v5534_v25  ;;  %v4897_v16 = vld [vmem:[#allocation7 + $0x5d0] sm:$0xf]  ;;  %v4386_v25 = vor.u32 %v6253_v12, %v4385_v11  ;;  %v3367_v11 = vpop.f32.mrf.mxu1 }
 0x187   :  { %v6043_v23 = vld [vmem:[#allocation7 + $0xee8] sm:$0xf0]  ;;  %v6381_v17 = vld [vmem:[#allocation7 + $0x5ec] sm:$0xf0] }
 0x188   :  { %v6464_v27 = vld [vmem:[#allocation7 + $0x88c] sm:$0xf]  ;;  %v6046_v31 = vor.u32 %v6664_v22, %v6043_v23  ;;  %3583 = vmatpush.bf16.msrb.mxu2 %v5790_v26  ;;  %v5153_v22 = vld [vmem:[#allocation7 + $0x7d0] sm:$0xf]  ;;  %v4642_v26 = vor.u32 %v6317_v15, %v4641_v13 }
 0x189   :  { %v5243_v28 = vld [vmem:[#allocation7 + $0x8a8] sm:$0xf0]  ;;  %v6445_v23 = vld [vmem:[#allocation7 + $0x7ec] sm:$0xf0] }
 0x18a   :  { %v6528_v29 = vld [vmem:[#allocation7 + $0xa8c] sm:$0xf]  ;;  %v5246_v39 = vor.u32 %v6464_v27, %v5243_v28  ;;  %3596 = vmatpush.bf16.msrb.mxu3 %v6046_v31  ;;  %v4898_v27 = vor.u32 %v6381_v17, %v4897_v16  ;;  %v4353_v28 = vld [vmem:[#allocation7 + $0x190] sm:$0xf]  ;;  %v5154_v31 = vor.u32 %v6445_v23, %v5153_v22 }
 0x18b   :  { %v5499_v32 = vld [vmem:[#allocation7 + $0xaa8] sm:$0xf0]  ;;  %v4257_v12 = vld [vmem:[#allocation7 + $0xd0] sm:$0xf] }
 0x18c   :  { %v6592_v33 = vld [vmem:[#allocation7 + $0xc8c] sm:$0xf]  ;;  %v5502_v45 = vor.u32 %v6528_v29, %v5499_v32  ;;  %3558 = vmatpush.bf16.msrb.mxu0 %v5246_v39  ;;  %v6245_v29 = vld [vmem:[#allocation7 + $0x1ac] sm:$0xf0] }
 0x18d   :  { %v5755_v34 = vld [vmem:[#allocation7 + $0xca8] sm:$0xf0]  ;;  %v6309_v32 = vld [vmem:[#allocation7 + $0x3ac] sm:$0xf0] }
 0x18e   :  { %v6656_v36 = vld [vmem:[#allocation7 + $0xe8c] sm:$0xf]  ;;  %v5758_v46 = vor.u32 %v6592_v33, %v5755_v34  ;;  %3571 = vmatpush.bf16.msrb.mxu1 %v5502_v45  ;;  %v4865_v33 = vld [vmem:[#allocation7 + $0x590] sm:$0xf] }
 0x18f   :  { %v6011_v37 = vld [vmem:[#allocation7 + $0xea8] sm:$0xf0]  ;;  %v6373_v34 = vld [vmem:[#allocation7 + $0x5ac] sm:$0xf0] }
 0x190   :  { %v6456_v48 = vld [vmem:[#allocation7 + $0x84c] sm:$0xf]  ;;  %v6014_v52 = vor.u32 %v6656_v36, %v6011_v37  ;;  %3584 = vmatpush.bf16.msrb.mxu2 %v5758_v46  ;;  %v4354_v36 = vor.u32 %v6245_v29, %v4353_v28  ;;  %v4610_v37 = vor.u32 %v6309_v32, %v4609_v30  ;;  %v4866_v39 = vor.u32 %v6373_v34, %v4865_v33  ;;  %v6237_v45 = vld [vmem:[#allocation7 + $0x16c] sm:$0xf0]  ;;  %v3380_v28 = vpop.f32.mrf.mxu2  ;;  %v3393_v34 = vpop.f32.mrf.mxu3 }
 0x191   :  { %v5211_v49 = vld [vmem:[#allocation7 + $0x868] sm:$0xf0]  ;;  %v4577_v46 = vld [vmem:[#allocation7 + $0x350] sm:$0xf] }
 0x192   :  { %v6520_v50 = vld [vmem:[#allocation7 + $0xa4c] sm:$0xf]  ;;  %v5214_v58 = vor.u32 %v6456_v48, %v5211_v49  ;;  %3597 = vmatpush.bf16.msrb.mxu3 %v6014_v52  ;;  %v5122_v48 = vor.u32 %v6437_v35, %v5121_v8  ;;  %v6301_v49 = vld [vmem:[#allocation7 + $0x36c] sm:$0xf0] }
 0x193   :  { %v5467_v53 = vld [vmem:[#allocation7 + $0xa68] sm:$0xf0]  ;;  %v5089_v52 = vld [vmem:[#allocation7 + $0x750] sm:$0xf] }
 0x194   :  { %v6584_v54 = vld [vmem:[#allocation7 + $0xc4c] sm:$0xf]  ;;  %v5470_v61 = vor.u32 %v6520_v50, %v5467_v53  ;;  %3559 = vmatpush.bf16.msrb.mxu0 %v5214_v58  ;;  %v4833_v50 = vld [vmem:[#allocation7 + $0x550] sm:$0xf] }
 0x195   :  { %v5723_v55 = vld [vmem:[#allocation7 + $0xc68] sm:$0xf0]  ;;  %v6429_v53 = vld [vmem:[#allocation7 + $0x76c] sm:$0xf0] }
 0x196   :  { %v6648_v56 = vld [vmem:[#allocation7 + $0xe4c] sm:$0xf]  ;;  %v5726_v62 = vor.u32 %v6584_v54, %v5723_v55  ;;  %3572 = vmatpush.bf16.msrb.mxu1 %v5470_v61  ;;  %v4322_v54 = vor.u32 %v6237_v45, %v4321_v43  ;;  %v4578_v55 = vor.u32 %v6301_v49, %v4577_v46  ;;  %v6229_v58 = vld [vmem:[#allocation7 + $0x12c] sm:$0xf0] }
 0x197   :  { %v5979_v57 = vld [vmem:[#allocation7 + $0xe68] sm:$0xf0]  ;;  %v6293_v61 = vld [vmem:[#allocation7 + $0x32c] sm:$0xf0] }
 0x198   :  { %v6448_v59 = vld [vmem:[#allocation7 + $0x80c] sm:$0xf]  ;;  %v5982_v3 = vor.u32 %v6648_v56, %v5979_v57  ;;  %3585 = vmatpush.bf16.msrb.mxu2 %v5726_v62  ;;  %v4834_v56 = vor.u32 %v6365_v51, %v4833_v50  ;;  %v4289_v57 = vld [vmem:[#allocation7 + $0x110] sm:$0xf] }
 0x199   :  { %v5179_v60 = vld [vmem:[#allocation7 + $0x828] sm:$0xf0]  ;;  %v4801_v62 = vld [vmem:[#allocation7 + $0x510] sm:$0xf] }
 0x19a   :  { %v6512_v63 = vld [vmem:[#allocation7 + $0xa0c] sm:$0xf]  ;;  %v5182_v14 = vor.u32 %v6448_v59, %v5179_v60  ;;  %3598 = vmatpush.bf16.msrb.mxu3 %v5982_v3  ;;  %v4545_v59 = vld [vmem:[#allocation7 + $0x310] sm:$0xf]  ;;  %v5090_v60 = vor.u32 %v6429_v53, %v5089_v52  ;;  %v4290_v3 = vor.u32 %v6229_v58, %v4289_v57 }
 0x19b   :  { %v5435_v0 = vld [vmem:[#allocation7 + $0xa28] sm:$0xf0]  ;;  %v6221_v13 = vld [vmem:[#allocation7 + $0xec] sm:$0xf0] }
 0x19c   :  { %v6576_v1 = vld [vmem:[#allocation7 + $0xc0c] sm:$0xf]  ;;  %v5438_v18 = vor.u32 %v6512_v63, %v5435_v0  ;;  %3560 = vmatpush.bf16.msrb.mxu0 %v5182_v14  ;;  %v6357_v63 = vld [vmem:[#allocation7 + $0x52c] sm:$0xf0] }
 0x19d   :  { %v5691_v5 = vld [vmem:[#allocation7 + $0xc28] sm:$0xf0]  ;;  %v5057_v0 = vld [vmem:[#allocation7 + $0x710] sm:$0xf] }
 0x19e   :  { %v6640_v7 = vld [vmem:[#allocation7 + $0xe0c] sm:$0xf]  ;;  %v5694_v19 = vor.u32 %v6576_v1, %v5691_v5  ;;  %3573 = vmatpush.bf16.msrb.mxu1 %v5438_v18  ;;  %v6421_v1 = vld [vmem:[#allocation7 + $0x72c] sm:$0xf0]  ;;  %v3354_v5 = vpop.f32.mrf.mxu0 }
 0x19f   :  { %v5947_v9 = vld [vmem:[#allocation7 + $0xe28] sm:$0xf0]  ;;  %3561 = vmatmul.bf16.vlgmr.msrb.gmra.mxu0 %v6868_v41  ;;  %v3355_v10 = vadd.f32 %v3354_v5, %v6903_v40  ;;  %v4513_v14 = vld [vmem:[#allocation7 + $0x2d0] sm:$0xf]  ;;  %v5058_v15 = vor.u32 %v6421_v1, %v5057_v0 }
 0x1a0   :  { %v5950_v24 = vor.u32 %v6640_v7, %v5947_v9  ;;  %3586 = vmatpush.bf16.msrb.mxu2 %v5694_v19  ;;  %3605 = vmatpush.bf16.msra.mxu0 %v4386_v25  ;;  %v4546_v7 = vor.u32 %v6293_v61, %v4545_v59  ;;  %v4802_v9 = vor.u32 %v6357_v63, %v4801_v62  ;;  %v6285_v16 = vld [vmem:[#allocation7 + $0x2ec] sm:$0xf0] }
 0x1a1   :  { %3574 = vmatmul.bf16.vlgmr.msrb.gmra.mxu1 %v6872_v44  ;;  %v4769_v17 = vld [vmem:[#allocation7 + $0x4d0] sm:$0xf]  ;;  %v3368_v19 = vadd.f32 %v3367_v11, %v3355_v10  ;;  %v4258_v25 = vor.u32 %v6221_v13, %v4257_v12  ;;  %v4514_v40 = vor.u32 %v6285_v16, %v4513_v14  ;;  %v3382_v11 = vpop.f32.mrf.mxu2 }
 0x1a2   :  { %3599 = vmatpush.bf16.msrb.mxu3 %v5950_v24  ;;  %3618 = vmatpush.bf16.msra.mxu1 %v4642_v26  ;;  %v6349_v18 = vld [vmem:[#allocation7 + $0x4ec] sm:$0xf0]  ;;  %v4050_v24 = vperm.slane %v6909_v2, 0  ;;  %v4051_v26 = vperm.slane %v6909_v2, 1 }
 0x1a3   :  { %3587 = vmatmul.bf16.vlgmr.msrb.gmra.mxu2 %v6866_v38  ;;  %v5025_v22 = vld [vmem:[#allocation7 + $0x6d0] sm:$0xf]  ;;  %v3381_v33 = vadd.f32 %v3380_v28, %v3368_v19 }
 0x1a4   :  { %3631 = vmatpush.bf16.msra.mxu2 %v4898_v27  ;;  %3606 = vmatpush.bf16.msra.mxu0 %v4354_v36  ;;  %v6413_v23 = vld [vmem:[#allocation7 + $0x6ec] sm:$0xf0]  ;;  %v4770_v27 = vor.u32 %v6349_v18, %v4769_v17  ;;  %v4066_v43 = vsub.f32 %v6897_v47, %v4050_v24  ;;  %v3395_v17 = vpop.f32.mrf.mxu3 }
 0x1a5   :  { %3600 = vmatmul.bf16.vlgmr.msrb.gmra.mxu3 %v6870_v42  ;;  %v4225_v29 = vld [vmem:[#allocation7 + $0x90] sm:$0xf]  ;;  %v5026_v32 = vor.u32 %v6413_v23, %v5025_v22  ;;  %v3394_v45 = vadd.f32 %v3393_v34, %v3381_v33 }
 0x1a6   :  { %3644 = vmatpush.bf16.msra.mxu3 %v5154_v31  ;;  %3619 = vmatpush.bf16.msra.mxu1 %v4610_v37  ;;  %v6213_v30 = vld [vmem:[#allocation7 + $0xac] sm:$0xf0]  ;;  %v4075_v61 = vmul.f32 %v4066_v43, %v4066_v43 }
 0x1a7   :  { %v4481_v31 = vld [vmem:[#allocation7 + $0x290] sm:$0xf]  ;;  %v4226_v46 = vor.u32 %v6213_v30, %v4225_v29 }
 0x1a8   :  { %3632 = vmatpush.bf16.msra.mxu2 %v4866_v39  ;;  %3607 = vmatpush.bf16.msra.mxu0 %v4322_v54  ;;  %v6277_v8 = vld [vmem:[#allocation7 + $0x2ac] sm:$0xf0]  ;;  %v3369_v54 = vpop.f32.mrf.mxu1 }
 0x1a9   :  { %v4737_v35 = vld [vmem:[#allocation7 + $0x490] sm:$0xf]  ;;  %v4482_v49 = vor.u32 %v6277_v8, %v4481_v31 }
 0x1aa   :  { %3645 = vmatpush.bf16.msra.mxu3 %v5122_v48  ;;  %3620 = vmatpush.bf16.msra.mxu1 %v4578_v55  ;;  %v6341_v36 = vld [vmem:[#allocation7 + $0x4ac] sm:$0xf0]  ;;  %v3356_v48 = vpop.f32.mrf.mxu0  ;;  %v4067_v55 = vsub.f32 %v3394_v45, %v4051_v26 }
 0x1ab   :  { %v4993_v37 = vld [vmem:[#allocation7 + $0x690] sm:$0xf]  ;;  %v4738_v50 = vor.u32 %v6341_v36, %v4737_v35 }
 0x1ac   :  { %3633 = vmatpush.bf16.msra.mxu2 %v4834_v56  ;;  %3608 = vmatpush.bf16.msra.mxu0 %v4290_v3  ;;  %v6405_v39 = vld [vmem:[#allocation7 + $0x6ac] sm:$0xf0]  ;;  %v4076_v62 = vmul.f32 %v4067_v55, %v4067_v55 }
 0x1ad   :  { %v4193_v51 = vld [vmem:[#allocation7 + $0x50] sm:$0xf]  ;;  %v4994_v56 = vor.u32 %v6405_v39, %v4993_v37 }
 0x1ae   :  { %3646 = vmatpush.bf16.msra.mxu3 %v5090_v60  ;;  %3621 = vmatpush.bf16.msra.mxu1 %v4546_v7  ;;  %v6205_v52 = vld [vmem:[#allocation7 + $0x6c] sm:$0xf0]  ;;  %v6915_v12 = vadd.f32 %v4076_v62, %v4075_v61 }
 0x1af   :  { %v4449_v53 = vld [vmem:[#allocation7 + $0x250] sm:$0xf]  ;;  %v4194_v63 = vor.u32 %v6205_v52, %v4193_v51 }
 0x1b0   :  { %3634 = vmatpush.bf16.msra.mxu2 %v4802_v9  ;;  %3609 = vmatpush.bf16.msra.mxu0 %v4258_v25  ;;  %v6269_v57 = vld [vmem:[#allocation7 + $0x26c] sm:$0xf0] }
 0x1b1   :  { %v4705_v58 = vld [vmem:[#allocation7 + $0x450] sm:$0xf]  ;;  %v4450_v3 = vor.u32 %v6269_v57, %v4449_v53 }
 0x1b2   :  { %3647 = vmatpush.bf16.msra.mxu3 %v5058_v15  ;;  %3622 = vmatpush.bf16.msra.mxu1 %v4514_v40  ;;  %v6333_v59 = vld [vmem:[#allocation7 + $0x46c] sm:$0xf0] }
 0x1b3   :  { %v4961_v60 = vld [vmem:[#allocation7 + $0x650] sm:$0xf]  ;;  %v4706_v5 = vor.u32 %v6333_v59, %v4705_v58 }
 0x1b4   :  { %3635 = vmatpush.bf16.msra.mxu2 %v4770_v27  ;;  %v6397_v47 = vld [vmem:[#allocation7 + $0x66c] sm:$0xf0]  ;;  %3610 = vmatpush.bf16.msra.mxu0 %v4226_v46 }
 0x1b5   :  { %v4161_v0 = vld [vmem:[#allocation7 + $0x10] sm:$0xf]  ;;  %v4962_v13 = vor.u32 %v6397_v47, %v4961_v60 }
 0x1b6   :  { %3648 = vmatpush.bf16.msra.mxu3 %v5026_v32  ;;  %v6197_v1 = vld [vmem:[#allocation7 + $0x2c] sm:$0xf0]  ;;  %3623 = vmatpush.bf16.msra.mxu1 %v4482_v49 }
 0x1b7   :  { %v4417_v7 = vld [vmem:[#allocation7 + $0x210] sm:$0xf]  ;;  %v4162_v23 = vor.u32 %v6197_v1, %v4161_v0 }
 0x1b8   :  { %3636 = vmatpush.bf16.msra.mxu2 %v4738_v50  ;;  %v6261_v9 = vld [vmem:[#allocation7 + $0x22c] sm:$0xf0]  ;;  %3611 = vmatpush.bf16.msra.mxu0 %v4194_v63 }
 0x1b9   :  { %v4673_v10 = vld [vmem:[#allocation7 + $0x410] sm:$0xf]  ;;  %v4418_v40 = vor.u32 %v6261_v9, %v4417_v7 }
 0x1ba   :  { %3649 = vmatpush.bf16.msra.mxu3 %v4994_v56  ;;  %v6325_v14 = vld [vmem:[#allocation7 + $0x42c] sm:$0xf0]  ;;  %3624 = vmatpush.bf16.msra.mxu1 %v4450_v3 }
 0x1bb   :  { %v4929_v15 = vld [vmem:[#allocation7 + $0x610] sm:$0xf]  ;;  %v4674_v27 = vor.u32 %v6325_v14, %v4673_v10 }
 0x1bc   :  { %v6389_v16 = vld [vmem:[#allocation7 + $0x62c] sm:$0xf0]  ;;  %3637 = vmatpush.bf16.msra.mxu2 %v4706_v5  ;;  %3612 = vmatpush.bf16.msra.mxu0 %v4162_v23 }
 0x1bd   :  { %v5409_v18 = vld [vmem:[#allocation7 + $0x9d0] sm:$0xf]  ;;  %v4930_v30 = vor.u32 %v6389_v16, %v4929_v15 }
 0x1be   :  { %v6509_v19 = vld [vmem:[#allocation7 + $0x9ec] sm:$0xf0]  ;;  %3650 = vmatpush.bf16.msra.mxu3 %v4962_v13  ;;  %3625 = vmatpush.bf16.msra.mxu1 %v4418_v40  ;;  %v3406_v13 = vpop.f32.mrf.mxu0 }
 0x1bf   :  { %v5665_v22 = vld [vmem:[#allocation7 + $0xbd0] sm:$0xf]  ;;  %v5410_v31 = vor.u32 %v6509_v19, %v5409_v18  ;;  %3613 = vmatmul.bf16.vlgmr.msra.gmra.mxu0 %v6859_v20  ;;  %v3419_v19 = vpop.f32.mrf.mxu1 }
 0x1c0   :  { %v6573_v24 = vld [vmem:[#allocation7 + $0xbec] sm:$0xf0]  ;;  %3638 = vmatpush.bf16.msra.mxu2 %v4674_v27 }
 0x1c1   :  { %v5921_v25 = vld [vmem:[#allocation7 + $0xdd0] sm:$0xf]  ;;  %v5666_v32 = vor.u32 %v6573_v24, %v5665_v22  ;;  %3657 = vmatpush.bf16.msrb.mxu0 %v5410_v31  ;;  %3626 = vmatmul.bf16.vlgmr.msra.gmra.mxu1 %v6862_v21 }
 0x1c2   :  { %v6637_v26 = vld [vmem:[#allocation7 + $0xdec] sm:$0xf0]  ;;  %3651 = vmatpush.bf16.msra.mxu3 %v4930_v30 }
 0x1c3   :  { %v6177_v28 = vld [vmem:[#allocation7 + $0xfd0] sm:$0xf]  ;;  %v5922_v33 = vor.u32 %v6637_v26, %v5921_v25  ;;  %3670 = vmatpush.bf16.msrb.mxu1 %v5666_v32  ;;  %3639 = vmatmul.bf16.vlgmr.msra.gmra.mxu2 %v6854_v4  ;;  %v3420_v26 = vadd.f32 %v3419_v19, %v3406_v13  ;;  %v6313_v19 = vld [vmem:[#allocation7 + $0x3d4] sm:$0xf] }
 0x1c4   :  { %v6701_v29 = vld [vmem:[#allocation7 + $0xfec] sm:$0xf0] }
 0x1c5   :  { %v5377_v34 = vld [vmem:[#allocation7 + $0x990] sm:$0xf]  ;;  %v6178_v36 = vor.u32 %v6701_v29, %v6177_v28  ;;  %3683 = vmatpush.bf16.msrb.mxu2 %v5922_v33  ;;  %3652 = vmatmul.bf16.vlgmr.msra.gmra.mxu3 %v6856_v6 }
 0x1c6   :  { %v6501_v8 = vld [vmem:[#allocation7 + $0x9ac] sm:$0xf0] }
 0x1c7   :  { %v5633_v35 = vld [vmem:[#allocation7 + $0xb90] sm:$0xf]  ;;  %v5378_v48 = vor.u32 %v6501_v8, %v5377_v34  ;;  %3696 = vmatpush.bf16.msrb.mxu3 %v6178_v36  ;;  %v3432_v34 = vpop.f32.mrf.mxu2 }
 0x1c8   :  { %v6565_v37 = vld [vmem:[#allocation7 + $0xbac] sm:$0xf0] }
 0x1c9   :  { %v5889_v39 = vld [vmem:[#allocation7 + $0xd90] sm:$0xf]  ;;  %v5634_v49 = vor.u32 %v6565_v37, %v5633_v35  ;;  %3658 = vmatpush.bf16.msrb.mxu0 %v5378_v48 }
 0x1ca   :  { %v6629_v43 = vld [vmem:[#allocation7 + $0xdac] sm:$0xf0] }
 0x1cb   :  { %v6145_v45 = vld [vmem:[#allocation7 + $0xf90] sm:$0xf]  ;;  %v5890_v50 = vor.u32 %v6629_v43, %v5889_v39  ;;  %3671 = vmatpush.bf16.msrb.mxu1 %v5634_v49  ;;  %v3433_v39 = vadd.f32 %v3432_v34, %v3420_v26  ;;  %v3445_v43 = vpop.f32.mrf.mxu3  ;;  %v4355_v34 = vld [vmem:[#allocation7 + $0x1b0] sm:$0xf0] }
 0x1cc   :  { %v6693_v46 = vld [vmem:[#allocation7 + $0xfac] sm:$0xf0] }
 0x1cd   :  { %v5345_v51 = vld [vmem:[#allocation7 + $0x950] sm:$0xf]  ;;  %v6146_v54 = vor.u32 %v6693_v46, %v6145_v45  ;;  %3684 = vmatpush.bf16.msrb.mxu2 %v5890_v50  ;;  %v6921_v49 = vadd.f32 %v3445_v43, %v3433_v39  ;;  %v3408_v50 = vpop.f32.mrf.mxu0  ;;  %v4867_v39 = vld [vmem:[#allocation7 + $0x5b0] sm:$0xf0] }
 0x1ce   :  { %v6493_v52 = vld [vmem:[#allocation7 + $0x96c] sm:$0xf0]  ;;  %v6433_v43 = vld [vmem:[#allocation7 + $0x794] sm:$0xf] }
 0x1cf   :  { %v5601_v53 = vld [vmem:[#allocation7 + $0xb50] sm:$0xf]  ;;  %v5346_v60 = vor.u32 %v6493_v52, %v5345_v51  ;;  %3697 = vmatpush.bf16.msrb.mxu3 %v6146_v54 }
 0x1d0   :  { %v6557_v55 = vld [vmem:[#allocation7 + $0xb6c] sm:$0xf0] }
 0x1d1   :  { %v5857_v56 = vld [vmem:[#allocation7 + $0xd50] sm:$0xf]  ;;  %v5602_v47 = vor.u32 %v6557_v55, %v5601_v53  ;;  %3659 = vmatpush.bf16.msrb.mxu0 %v5346_v60 }
 0x1d2   :  { %v6621_v57 = vld [vmem:[#allocation7 + $0xd6c] sm:$0xf0] }
 0x1d3   :  { %v6113_v58 = vld [vmem:[#allocation7 + $0xf50] sm:$0xf]  ;;  %v5858_v61 = vor.u32 %v6621_v57, %v5857_v56  ;;  %3672 = vmatpush.bf16.msrb.mxu1 %v5602_v47  ;;  %v3421_v56 = vpop.f32.mrf.mxu1 }
 0x1d4   :  { %v6685_v59 = vld [vmem:[#allocation7 + $0xf6c] sm:$0xf0]  ;;  %v6361_v56 = vld [vmem:[#allocation7 + $0x554] sm:$0xf] }
 0x1d5   :  { %v5313_v62 = vld [vmem:[#allocation7 + $0x910] sm:$0xf]  ;;  %v6114_v1 = vor.u32 %v6685_v59, %v6113_v58  ;;  %3685 = vmatpush.bf16.msrb.mxu2 %v5858_v61 }
 0x1d6   :  { %v6485_v63 = vld [vmem:[#allocation7 + $0x92c] sm:$0xf0] }
 0x1d7   :  { %v5569_v0 = vld [vmem:[#allocation7 + $0xb10] sm:$0xf]  ;;  %v5314_v11 = vor.u32 %v6485_v63, %v5313_v62  ;;  %3698 = vmatpush.bf16.msrb.mxu3 %v6114_v1 }
 0x1d8   :  { %v6549_v3 = vld [vmem:[#allocation7 + $0xb2c] sm:$0xf0] }
 0x1d9   :  { %v5825_v5 = vld [vmem:[#allocation7 + $0xd10] sm:$0xf]  ;;  %v5570_v14 = vor.u32 %v6549_v3, %v5569_v0  ;;  %3660 = vmatpush.bf16.msrb.mxu0 %v5314_v11 }
 0x1da   :  { %v6613_v7 = vld [vmem:[#allocation7 + $0xd2c] sm:$0xf0] }
 0x1db   :  { %v6081_v9 = vld [vmem:[#allocation7 + $0xf10] sm:$0xf]  ;;  %v5826_v15 = vor.u32 %v6613_v7, %v5825_v5  ;;  %3673 = vmatpush.bf16.msrb.mxu1 %v5570_v14 }
 0x1dc   :  { %v6677_v10 = vld [vmem:[#allocation7 + $0xf2c] sm:$0xf0] }
 0x1dd   :  { %v5281_v16 = vld [vmem:[#allocation7 + $0x8d0] sm:$0xf]  ;;  %v6082_v22 = vor.u32 %v6677_v10, %v6081_v9  ;;  %3686 = vmatpush.bf16.msrb.mxu2 %v5826_v15  ;;  %v3434_v10 = vpop.f32.mrf.mxu2 }
 0x1de   :  { %v6477_v17 = vld [vmem:[#allocation7 + $0x8ec] sm:$0xf0]  ;;  %v5059_v10 = vld [vmem:[#allocation7 + $0x730] sm:$0xf0] }
 0x1df   :  { %v5537_v18 = vld [vmem:[#allocation7 + $0xad0] sm:$0xf]  ;;  %v5282_v28 = vor.u32 %v6477_v17, %v5281_v16  ;;  %3699 = vmatpush.bf16.msrb.mxu3 %v6082_v22  ;;  %v3447_v16 = vpop.f32.mrf.mxu3  ;;  %v6249_v17 = vld [vmem:[#allocation7 + $0x1d4] sm:$0xf] }
 0x1e0   :  { %v6541_v23 = vld [vmem:[#allocation7 + $0xaec] sm:$0xf0] }
 0x1e1   :  { %v5793_v24 = vld [vmem:[#allocation7 + $0xcd0] sm:$0xf]  ;;  %v5538_v29 = vor.u32 %v6541_v23, %v5537_v18  ;;  %3661 = vmatpush.bf16.msrb.mxu0 %v5282_v28  ;;  %v4387_v18 = vld [vmem:[#allocation7 + $0x1f0] sm:$0xf0] }
 0x1e2   :  { %v6605_v25 = vld [vmem:[#allocation7 + $0xcec] sm:$0xf0]  ;;  %v4643_v23 = vld [vmem:[#allocation7 + $0x3f0] sm:$0xf0] }
 0x1e3   :  { %v6049_v40 = vld [vmem:[#allocation7 + $0xed0] sm:$0xf]  ;;  %v5794_v30 = vor.u32 %v6605_v25, %v5793_v24  ;;  %3674 = vmatpush.bf16.msrb.mxu1 %v5538_v29  ;;  %v6377_v24 = vld [vmem:[#allocation7 + $0x5d4] sm:$0xf] }
 0x1e4   :  { %v6669_v27 = vld [vmem:[#allocation7 + $0xeec] sm:$0xf0]  ;;  %v4899_v25 = vld [vmem:[#allocation7 + $0x5f0] sm:$0xf0] }
 0x1e5   :  { %v5249_v31 = vld [vmem:[#allocation7 + $0x890] sm:$0xf]  ;;  %v6050_v8 = vor.u32 %v6669_v27, %v6049_v40  ;;  %3687 = vmatpush.bf16.msrb.mxu2 %v5794_v30  ;;  %v6441_v27 = vld [vmem:[#allocation7 + $0x7d4] sm:$0xf]  ;;  %v4390_v30 = vor.u32 %v6249_v17, %v4387_v18  ;;  %v3471_v17 = vpop.f32.mrf.mxu1 }
 0x1e6   :  { %v6469_v32 = vld [vmem:[#allocation7 + $0x8ac] sm:$0xf0]  ;;  %v5155_v28 = vld [vmem:[#allocation7 + $0x7f0] sm:$0xf0] }
 0x1e7   :  { %v5505_v33 = vld [vmem:[#allocation7 + $0xa90] sm:$0xf]  ;;  %v5250_v48 = vor.u32 %v6469_v32, %v5249_v31  ;;  %3700 = vmatpush.bf16.msrb.mxu3 %v6050_v8  ;;  %v4646_v31 = vor.u32 %v6313_v19, %v4643_v23  ;;  %v4902_v32 = vor.u32 %v6377_v24, %v4899_v25  ;;  %v6305_v8 = vld [vmem:[#allocation7 + $0x394] sm:$0xf] }
 0x1e8   :  { %v6533_v35 = vld [vmem:[#allocation7 + $0xaac] sm:$0xf0]  ;;  %v6217_v18 = vld [vmem:[#allocation7 + $0xd4] sm:$0xf] }
 0x1e9   :  { %v5761_v36 = vld [vmem:[#allocation7 + $0xc90] sm:$0xf]  ;;  %v5506_v51 = vor.u32 %v6533_v35, %v5505_v33  ;;  %3662 = vmatpush.bf16.msrb.mxu0 %v5250_v48  ;;  %v6241_v33 = vld [vmem:[#allocation7 + $0x194] sm:$0xf]  ;;  %v5158_v35 = vor.u32 %v6441_v27, %v5155_v28 }
 0x1ea   :  { %v6597_v37 = vld [vmem:[#allocation7 + $0xcac] sm:$0xf0]  ;;  %v4259_v19 = vld [vmem:[#allocation7 + $0xf0] sm:$0xf0] }
 0x1eb   :  { %v6017_v45 = vld [vmem:[#allocation7 + $0xe90] sm:$0xf]  ;;  %v5762_v52 = vor.u32 %v6597_v37, %v5761_v36  ;;  %3675 = vmatpush.bf16.msrb.mxu1 %v5506_v51  ;;  %v4611_v36 = vld [vmem:[#allocation7 + $0x3b0] sm:$0xf0] }
 0x1ec   :  { %v6661_v46 = vld [vmem:[#allocation7 + $0xeac] sm:$0xf0]  ;;  %v6369_v37 = vld [vmem:[#allocation7 + $0x594] sm:$0xf]  ;;  %v4614_v48 = vor.u32 %v6305_v8, %v4611_v36 }
 0x1ed   :  { %v5217_v53 = vld [vmem:[#allocation7 + $0x850] sm:$0xf]  ;;  %v6018_v57 = vor.u32 %v6661_v46, %v6017_v45  ;;  %3688 = vmatpush.bf16.msrb.mxu2 %v5762_v52  ;;  %v5123_v45 = vld [vmem:[#allocation7 + $0x7b0] sm:$0xf0]  ;;  %v4358_v46 = vor.u32 %v6241_v33, %v4355_v34  ;;  %v4870_v50 = vor.u32 %v6369_v37, %v4867_v39  ;;  %v3497_v37 = vpop.f32.mrf.mxu3 }
 0x1ee   :  { %v6461_v54 = vld [vmem:[#allocation7 + $0x86c] sm:$0xf0]  ;;  %v6233_v51 = vld [vmem:[#allocation7 + $0x154] sm:$0xf] }
 0x1ef   :  { %v5473_v55 = vld [vmem:[#allocation7 + $0xa50] sm:$0xf]  ;;  %v5218_v62 = vor.u32 %v6461_v54, %v5217_v53  ;;  %3701 = vmatpush.bf16.msrb.mxu3 %v6018_v57  ;;  %v4323_v52 = vld [vmem:[#allocation7 + $0x170] sm:$0xf0]  ;;  %v5126_v54 = vor.u32 %v6433_v43, %v5123_v45 }
 0x1f0   :  { %v6525_v58 = vld [vmem:[#allocation7 + $0xa6c] sm:$0xf0]  ;;  %v6297_v53 = vld [vmem:[#allocation7 + $0x354] sm:$0xf] }
 0x1f1   :  { %v5729_v59 = vld [vmem:[#allocation7 + $0xc50] sm:$0xf]  ;;  %v5474_v1 = vor.u32 %v6525_v58, %v5473_v55  ;;  %3663 = vmatpush.bf16.msrb.mxu0 %v5218_v62  ;;  %v4579_v55 = vld [vmem:[#allocation7 + $0x370] sm:$0xf0] }
 0x1f2   :  { %v6589_v60 = vld [vmem:[#allocation7 + $0xc6c] sm:$0xf0]  ;;  %v4835_v57 = vld [vmem:[#allocation7 + $0x570] sm:$0xf0] }
 0x1f3   :  { %v5985_v47 = vld [vmem:[#allocation7 + $0xe50] sm:$0xf]  ;;  %v5730_v3 = vor.u32 %v6589_v60, %v5729_v59  ;;  %3676 = vmatpush.bf16.msrb.mxu1 %v5474_v1  ;;  %v6425_v58 = vld [vmem:[#allocation7 + $0x754] sm:$0xf]  ;;  %v4326_v60 = vor.u32 %v6233_v51, %v4323_v52 }
 0x1f4   :  { %v6653_v61 = vld [vmem:[#allocation7 + $0xe6c] sm:$0xf0]  ;;  %v5091_v59 = vld [vmem:[#allocation7 + $0x770] sm:$0xf0] }
 0x1f5   :  { %v5185_v63 = vld [vmem:[#allocation7 + $0x810] sm:$0xf]  ;;  %v5986_v11 = vor.u32 %v6653_v61, %v5985_v47  ;;  %3689 = vmatpush.bf16.msrb.mxu2 %v5730_v3  ;;  %v4582_v47 = vor.u32 %v6297_v53, %v4579_v55  ;;  %v4838_v61 = vor.u32 %v6361_v56, %v4835_v57  ;;  %v6225_v62 = vld [vmem:[#allocation7 + $0x114] sm:$0xf]  ;;  %v5094_v1 = vor.u32 %v6425_v58, %v5091_v59  ;;  %v3473_v57 = vpop.f32.mrf.mxu1 }
 0x1f6   :  { %v6453_v0 = vld [vmem:[#allocation7 + $0x82c] sm:$0xf0]  ;;  %v4547_v3 = vld [vmem:[#allocation7 + $0x330] sm:$0xf0] }
 0x1f7   :  { %v5441_v5 = vld [vmem:[#allocation7 + $0xa10] sm:$0xf]  ;;  %v5186_v22 = vor.u32 %v6453_v0, %v5185_v63  ;;  %3702 = vmatpush.bf16.msrb.mxu3 %v5986_v11  ;;  %v4291_v63 = vld [vmem:[#allocation7 + $0x130] sm:$0xf0] }
 0x1f8   :  { %v6517_v7 = vld [vmem:[#allocation7 + $0xa2c] sm:$0xf0]  ;;  %v6289_v0 = vld [vmem:[#allocation7 + $0x314] sm:$0xf]  ;;  %v4294_v11 = vor.u32 %v6225_v62, %v4291_v63 }
 0x1f9   :  { %v5697_v9 = vld [vmem:[#allocation7 + $0xc10] sm:$0xf]  ;;  %v5442_v26 = vor.u32 %v6517_v7, %v5441_v5  ;;  %3664 = vmatpush.bf16.msrb.mxu0 %v5186_v22  ;;  %v6353_v5 = vld [vmem:[#allocation7 + $0x514] sm:$0xf] }
 0x1fa   :  { %v6581_v13 = vld [vmem:[#allocation7 + $0xc2c] sm:$0xf0]  ;;  %v4803_v7 = vld [vmem:[#allocation7 + $0x530] sm:$0xf0] }
 0x1fb   :  { %v5953_v14 = vld [vmem:[#allocation7 + $0xe10] sm:$0xf]  ;;  %v5698_v40 = vor.u32 %v6581_v13, %v5697_v9  ;;  %3677 = vmatpush.bf16.msrb.mxu1 %v5442_v26  ;;  %v6417_v9 = vld [vmem:[#allocation7 + $0x714] sm:$0xf]  ;;  %v3458_v13 = vpop.f32.mrf.mxu0 }
 0x1fc   :  { %v6645_v15 = vld [vmem:[#allocation7 + $0xe2c] sm:$0xf0]  ;;  %3665 = vmatmul.bf16.vlgmr.msrb.gmra.mxu0 %v6868_v41  ;;  %v3459_v16 = vadd.f32 %v3458_v13, %v6921_v49  ;;  %v6281_v22 = vld [vmem:[#allocation7 + $0x2d4] sm:$0xf]  ;;  %v5062_v23 = vor.u32 %v6417_v9, %v5059_v10 }
 0x1fd   :  { %v5954_v29 = vor.u32 %v6645_v15, %v5953_v14  ;;  %3690 = vmatpush.bf16.msrb.mxu2 %v5698_v40  ;;  %3709 = vmatpush.bf16.msra.mxu0 %v4390_v30  ;;  %v4550_v14 = vor.u32 %v6289_v0, %v4547_v3  ;;  %v4806_v15 = vor.u32 %v6353_v5, %v4803_v7  ;;  %v4515_v24 = vld [vmem:[#allocation7 + $0x2f0] sm:$0xf0]  ;;  %v4052_v30 = vperm.slane %v6909_v2, 2 }
 0x1fe   :  { %3678 = vmatmul.bf16.vlgmr.msrb.gmra.mxu1 %v6872_v44  ;;  %v6345_v25 = vld [vmem:[#allocation7 + $0x4d4] sm:$0xf]  ;;  %v3472_v40 = vadd.f32 %v3471_v17, %v3459_v16 }
 0x1ff   :  { %3703 = vmatpush.bf16.msrb.mxu3 %v5954_v29  ;;  %3722 = vmatpush.bf16.msra.mxu1 %v4646_v31  ;;  %v4771_v26 = vld [vmem:[#allocation7 + $0x4f0] sm:$0xf0]  ;;  %v4262_v29 = vor.u32 %v6217_v18, %v4259_v19  ;;  %v4518_v31 = vor.u32 %v6281_v22, %v4515_v24  ;;  %v3499_v22 = vpop.f32.mrf.mxu3 }
 0x200   :  { %3691 = vmatmul.bf16.vlgmr.msrb.gmra.mxu2 %v6866_v38  ;;  %v6409_v27 = vld [vmem:[#allocation7 + $0x6d4] sm:$0xf]  ;;  %v4774_v49 = vor.u32 %v6345_v25, %v4771_v26 }
 0x201   :  { %3735 = vmatpush.bf16.msra.mxu2 %v4902_v32  ;;  %3710 = vmatpush.bf16.msra.mxu0 %v4358_v46  ;;  %v5027_v28 = vld [vmem:[#allocation7 + $0x6f0] sm:$0xf0]  ;;  %v3484_v32 = vpop.f32.mrf.mxu2 }
 0x202   :  { %3704 = vmatmul.bf16.vlgmr.msrb.gmra.mxu3 %v6870_v42  ;;  %v6209_v33 = vld [vmem:[#allocation7 + $0x94] sm:$0xf]  ;;  %v3485_v36 = vadd.f32 %v3484_v32, %v3472_v40 }
 0x203   :  { %3748 = vmatpush.bf16.msra.mxu3 %v5158_v35  ;;  %3723 = vmatpush.bf16.msra.mxu1 %v4614_v48  ;;  %v4227_v34 = vld [vmem:[#allocation7 + $0xb0] sm:$0xf0]  ;;  %v5030_v35 = vor.u32 %v6409_v27, %v5027_v28  ;;  %v3460_v51 = vpop.f32.mrf.mxu0 }
 0x204   :  { %v6273_v8 = vld [vmem:[#allocation7 + $0x294] sm:$0xf]  ;;  %v4230_v2 = vor.u32 %v6209_v33, %v4227_v34 }
 0x205   :  { %3736 = vmatpush.bf16.msra.mxu2 %v4870_v50  ;;  %3711 = vmatpush.bf16.msra.mxu0 %v4326_v60  ;;  %v4483_v39 = vld [vmem:[#allocation7 + $0x2b0] sm:$0xf0]  ;;  %v3498_v50 = vadd.f32 %v3497_v37, %v3485_v36 }
 0x206   :  { %v6337_v43 = vld [vmem:[#allocation7 + $0x494] sm:$0xf]  ;;  %v4486_v52 = vor.u32 %v6273_v8, %v4483_v39 }
 0x207   :  { %3749 = vmatpush.bf16.msra.mxu3 %v5126_v54  ;;  %3724 = vmatpush.bf16.msra.mxu1 %v4582_v47  ;;  %v4739_v45 = vld [vmem:[#allocation7 + $0x4b0] sm:$0xf0]  ;;  %v4068_v58 = vsub.f32 %v3498_v50, %v4052_v30 }
 0x208   :  { %v6401_v46 = vld [vmem:[#allocation7 + $0x694] sm:$0xf]  ;;  %v4742_v53 = vor.u32 %v6337_v43, %v4739_v45 }
 0x209   :  { %3737 = vmatpush.bf16.msra.mxu2 %v4838_v61  ;;  %3712 = vmatpush.bf16.msra.mxu0 %v4294_v11  ;;  %v4995_v48 = vld [vmem:[#allocation7 + $0x6b0] sm:$0xf0]  ;;  %v4077_v0 = vmul.f32 %v4068_v58, %v4068_v58 }
 0x20a   :  { %v6201_v54 = vld [vmem:[#allocation7 + $0x54] sm:$0xf]  ;;  %v4998_v59 = vor.u32 %v6401_v46, %v4995_v48 }
 0x20b   :  { %3750 = vmatpush.bf16.msra.mxu3 %v5094_v1  ;;  %3725 = vmatpush.bf16.msra.mxu1 %v4550_v14  ;;  %v4195_v55 = vld [vmem:[#allocation7 + $0x70] sm:$0xf0]  ;;  %v3486_v14 = vpop.f32.mrf.mxu2 }
 0x20c   :  { %v6265_v56 = vld [vmem:[#allocation7 + $0x254] sm:$0xf]  ;;  %v4198_v1 = vor.u32 %v6201_v54, %v4195_v55  ;;  %v3510_v14 = vpop.f32.mrf.mxu0 }
 0x20d   :  { %3738 = vmatpush.bf16.msra.mxu2 %v4806_v15  ;;  %3713 = vmatpush.bf16.msra.mxu0 %v4262_v29  ;;  %v4451_v60 = vld [vmem:[#allocation7 + $0x270] sm:$0xf0]  ;;  %v6930_v15 = vadd.f32 %v6915_v12, %v4077_v0 }
 0x20e   :  { %v6329_v47 = vld [vmem:[#allocation7 + $0x454] sm:$0xf]  ;;  %v4454_v7 = vor.u32 %v6265_v56, %v4451_v60 }
 0x20f   :  { %3751 = vmatpush.bf16.msra.mxu3 %v5062_v23  ;;  %3726 = vmatpush.bf16.msra.mxu1 %v4518_v31  ;;  %v4707_v61 = vld [vmem:[#allocation7 + $0x470] sm:$0xf0] }
 0x210   :  { %v6393_v62 = vld [vmem:[#allocation7 + $0x654] sm:$0xf]  ;;  %v4710_v9 = vor.u32 %v6329_v47, %v4707_v61 }
 0x211   :  { %3739 = vmatpush.bf16.msra.mxu2 %v4774_v49  ;;  %v4963_v63 = vld [vmem:[#allocation7 + $0x670] sm:$0xf0]  ;;  %3714 = vmatpush.bf16.msra.mxu0 %v4230_v2 }
 0x212   :  { %v6193_v3 = vld [vmem:[#allocation7 + $0x14] sm:$0xf]  ;;  %v4966_v16 = vor.u32 %v6393_v62, %v4963_v63 }
 0x213   :  { %3752 = vmatpush.bf16.msra.mxu3 %v5030_v35  ;;  %v4163_v5 = vld [vmem:[#allocation7 + $0x30] sm:$0xf0]  ;;  %3727 = vmatpush.bf16.msra.mxu1 %v4486_v52 }
 0x214   :  { %v6257_v10 = vld [vmem:[#allocation7 + $0x214] sm:$0xf]  ;;  %v4166_v26 = vor.u32 %v6193_v3, %v4163_v5 }
 0x215   :  { %3740 = vmatpush.bf16.msra.mxu2 %v4742_v53  ;;  %v4419_v11 = vld [vmem:[#allocation7 + $0x230] sm:$0xf0]  ;;  %3715 = vmatpush.bf16.msra.mxu0 %v4198_v1 }
 0x216   :  { %v6321_v13 = vld [vmem:[#allocation7 + $0x414] sm:$0xf]  ;;  %v4422_v29 = vor.u32 %v6257_v10, %v4419_v11 }
 0x217   :  { %3753 = vmatpush.bf16.msra.mxu3 %v4998_v59  ;;  %v4675_v17 = vld [vmem:[#allocation7 + $0x430] sm:$0xf0]  ;;  %3728 = vmatpush.bf16.msra.mxu1 %v4454_v7 }
 0x218   :  { %v6385_v18 = vld [vmem:[#allocation7 + $0x614] sm:$0xf]  ;;  %v4678_v30 = vor.u32 %v6321_v13, %v4675_v17 }
 0x219   :  { %v4931_v19 = vld [vmem:[#allocation7 + $0x630] sm:$0xf0]  ;;  %3741 = vmatpush.bf16.msra.mxu2 %v4710_v9  ;;  %3716 = vmatpush.bf16.msra.mxu0 %v4166_v26 }
 0x21a   :  { %v6505_v23 = vld [vmem:[#allocation7 + $0x9d4] sm:$0xf]  ;;  %v4934_v49 = vor.u32 %v6385_v18, %v4931_v19 }
 0x21b   :  { %v5411_v24 = vld [vmem:[#allocation7 + $0x9f0] sm:$0xf0]  ;;  %3754 = vmatpush.bf16.msra.mxu3 %v4966_v16  ;;  %3729 = vmatpush.bf16.msra.mxu1 %v4422_v29 }
 0x21c   :  { %v6569_v25 = vld [vmem:[#allocation7 + $0xbd4] sm:$0xf]  ;;  %v5414_v32 = vor.u32 %v6505_v23, %v5411_v24  ;;  %3717 = vmatmul.bf16.vlgmr.msra.gmra.mxu0 %v6859_v20  ;;  %v3523_v23 = vpop.f32.mrf.mxu1 }
 0x21d   :  { %v5667_v40 = vld [vmem:[#allocation7 + $0xbf0] sm:$0xf0]  ;;  %3742 = vmatpush.bf16.msra.mxu2 %v4678_v30 }
 0x21e   :  { %v6633_v27 = vld [vmem:[#allocation7 + $0xdd4] sm:$0xf]  ;;  %v5670_v33 = vor.u32 %v6569_v25, %v5667_v40  ;;  %3761 = vmatpush.bf16.msrb.mxu0 %v5414_v32  ;;  %3730 = vmatmul.bf16.vlgmr.msra.gmra.mxu1 %v6862_v21 }
 0x21f   :  { %v5923_v28 = vld [vmem:[#allocation7 + $0xdf0] sm:$0xf0]  ;;  %3755 = vmatpush.bf16.msra.mxu3 %v4934_v49 }
 0x220   :  { %v6697_v12 = vld [vmem:[#allocation7 + $0xfd4] sm:$0xf]  ;;  %v5926_v34 = vor.u32 %v6633_v27, %v5923_v28  ;;  %3774 = vmatpush.bf16.msrb.mxu1 %v5670_v33  ;;  %3743 = vmatmul.bf16.vlgmr.msra.gmra.mxu2 %v6854_v4  ;;  %v3524_v27 = vadd.f32 %v3523_v23, %v3510_v14 }
 0x221   :  { %v6179_v31 = vld [vmem:[#allocation7 + $0xff0] sm:$0xf0] }
 0x222   :  { %v6497_v8 = vld [vmem:[#allocation7 + $0x994] sm:$0xf]  ;;  %v6182_v37 = vor.u32 %v6697_v12, %v6179_v31  ;;  %3787 = vmatpush.bf16.msrb.mxu2 %v5926_v34  ;;  %3756 = vmatmul.bf16.vlgmr.msra.gmra.mxu3 %v6856_v6  ;;  %v3536_v34 = vpop.f32.mrf.mxu2 }
 0x223   :  { %v5379_v35 = vld [vmem:[#allocation7 + $0x9b0] sm:$0xf0] }
 0x224   :  { %v6561_v36 = vld [vmem:[#allocation7 + $0xb94] sm:$0xf]  ;;  %v5382_v50 = vor.u32 %v6497_v8, %v5379_v35  ;;  %3800 = vmatpush.bf16.msrb.mxu3 %v6182_v37 }
 0x225   :  { %v5635_v39 = vld [vmem:[#allocation7 + $0xbb0] sm:$0xf0] }
 0x226   :  { %v6625_v43 = vld [vmem:[#allocation7 + $0xd94] sm:$0xf]  ;;  %v5638_v2 = vor.u32 %v6561_v36, %v5635_v39  ;;  %3762 = vmatpush.bf16.msrb.mxu0 %v5382_v50  ;;  %v3537_v39 = vadd.f32 %v3536_v34, %v3524_v27  ;;  %v4617_v34 = vld [vmem:[#allocation7 + $0x398] sm:$0xf] }
 0x227   :  { %v5891_v45 = vld [vmem:[#allocation7 + $0xdb0] sm:$0xf0] }
 0x228   :  { %v6689_v46 = vld [vmem:[#allocation7 + $0xf94] sm:$0xf]  ;;  %v5894_v51 = vor.u32 %v6625_v43, %v5891_v45  ;;  %3775 = vmatpush.bf16.msrb.mxu1 %v5638_v2  ;;  %v3549_v43 = vpop.f32.mrf.mxu3  ;;  %v3512_v2 = vpop.f32.mrf.mxu0 }
 0x229   :  { %v6147_v48 = vld [vmem:[#allocation7 + $0xfb0] sm:$0xf0]  ;;  %v6936_v50 = vadd.f32 %v3549_v43, %v3537_v39  ;;  %v5129_v39 = vld [vmem:[#allocation7 + $0x798] sm:$0xf] }
 0x22a   :  { %v6489_v52 = vld [vmem:[#allocation7 + $0x954] sm:$0xf]  ;;  %v6150_v55 = vor.u32 %v6689_v46, %v6147_v48  ;;  %3788 = vmatpush.bf16.msrb.mxu2 %v5894_v51  ;;  %v6438_v43 = vld [vmem:[#allocation7 + $0x7b4] sm:$0xf0] }
 0x22b   :  { %v5347_v53 = vld [vmem:[#allocation7 + $0x970] sm:$0xf0]  ;;  %v4329_v2 = vld [vmem:[#allocation7 + $0x158] sm:$0xf] }
 0x22c   :  { %v6553_v54 = vld [vmem:[#allocation7 + $0xb54] sm:$0xf]  ;;  %v5350_v47 = vor.u32 %v6489_v52, %v5347_v53  ;;  %3801 = vmatpush.bf16.msrb.mxu3 %v6150_v55 }
 0x22d   :  { %v5603_v56 = vld [vmem:[#allocation7 + $0xb70] sm:$0xf0] }
 0x22e   :  { %v6617_v57 = vld [vmem:[#allocation7 + $0xd54] sm:$0xf]  ;;  %v5606_v61 = vor.u32 %v6553_v54, %v5603_v56  ;;  %3763 = vmatpush.bf16.msrb.mxu0 %v5350_v47  ;;  %v3525_v56 = vpop.f32.mrf.mxu1 }
 0x22f   :  { %v5859_v58 = vld [vmem:[#allocation7 + $0xd70] sm:$0xf0]  ;;  %v6366_v56 = vld [vmem:[#allocation7 + $0x574] sm:$0xf0] }
 0x230   :  { %v6681_v59 = vld [vmem:[#allocation7 + $0xf54] sm:$0xf]  ;;  %v5862_v62 = vor.u32 %v6617_v57, %v5859_v58  ;;  %3776 = vmatpush.bf16.msrb.mxu1 %v5606_v61 }
 0x231   :  { %v6115_v60 = vld [vmem:[#allocation7 + $0xf70] sm:$0xf0] }
 0x232   :  { %v6481_v63 = vld [vmem:[#allocation7 + $0x914] sm:$0xf]  ;;  %v6118_v3 = vor.u32 %v6681_v59, %v6115_v60  ;;  %3789 = vmatpush.bf16.msrb.mxu2 %v5862_v62 }
 0x233   :  { %v5315_v0 = vld [vmem:[#allocation7 + $0x930] sm:$0xf0] }
 0x234   :  { %v6545_v1 = vld [vmem:[#allocation7 + $0xb14] sm:$0xf]  ;;  %v5318_v13 = vor.u32 %v6481_v63, %v5315_v0  ;;  %3802 = vmatpush.bf16.msrb.mxu3 %v6118_v3 }
 0x235   :  { %v5571_v5 = vld [vmem:[#allocation7 + $0xb30] sm:$0xf0] }
 0x236   :  { %v6609_v7 = vld [vmem:[#allocation7 + $0xd14] sm:$0xf]  ;;  %v5574_v16 = vor.u32 %v6545_v1, %v5571_v5  ;;  %3764 = vmatpush.bf16.msrb.mxu0 %v5318_v13 }
 0x237   :  { %v5827_v9 = vld [vmem:[#allocation7 + $0xd30] sm:$0xf0] }
 0x238   :  { %v6673_v10 = vld [vmem:[#allocation7 + $0xf14] sm:$0xf]  ;;  %v5830_v17 = vor.u32 %v6609_v7, %v5827_v9  ;;  %3777 = vmatpush.bf16.msrb.mxu1 %v5574_v16 }
 0x239   :  { %v6083_v11 = vld [vmem:[#allocation7 + $0xf30] sm:$0xf0] }
 0x23a   :  { %v6473_v18 = vld [vmem:[#allocation7 + $0x8d4] sm:$0xf]  ;;  %v6086_v24 = vor.u32 %v6673_v10, %v6083_v11  ;;  %3790 = vmatpush.bf16.msrb.mxu2 %v5830_v17  ;;  %v3538_v10 = vpop.f32.mrf.mxu2  ;;  %v3551_v17 = vpop.f32.mrf.mxu3 }
 0x23b   :  { %v5283_v19 = vld [vmem:[#allocation7 + $0x8f0] sm:$0xf0]  ;;  %v3575_v17 = vpop.f32.mrf.mxu1 }
 0x23c   :  { %v6537_v22 = vld [vmem:[#allocation7 + $0xad4] sm:$0xf]  ;;  %v5286_v30 = vor.u32 %v6473_v18, %v5283_v19  ;;  %3803 = vmatpush.bf16.msrb.mxu3 %v6086_v24  ;;  %v4393_v18 = vld [vmem:[#allocation7 + $0x1d8] sm:$0xf] }
 0x23d   :  { %v5539_v25 = vld [vmem:[#allocation7 + $0xaf0] sm:$0xf0]  ;;  %v6254_v19 = vld [vmem:[#allocation7 + $0x1f4] sm:$0xf0] }
 0x23e   :  { %v6601_v26 = vld [vmem:[#allocation7 + $0xcd4] sm:$0xf]  ;;  %v5542_v12 = vor.u32 %v6537_v22, %v5539_v25  ;;  %3765 = vmatpush.bf16.msrb.mxu0 %v5286_v30  ;;  %v4649_v22 = vld [vmem:[#allocation7 + $0x3d8] sm:$0xf] }
 0x23f   :  { %v5795_v40 = vld [vmem:[#allocation7 + $0xcf0] sm:$0xf0]  ;;  %v6318_v24 = vld [vmem:[#allocation7 + $0x3f4] sm:$0xf0] }
 0x240   :  { %v6665_v28 = vld [vmem:[#allocation7 + $0xed4] sm:$0xf]  ;;  %v5798_v31 = vor.u32 %v6601_v26, %v5795_v40  ;;  %3778 = vmatpush.bf16.msrb.mxu1 %v5542_v12  ;;  %v4905_v25 = vld [vmem:[#allocation7 + $0x5d8] sm:$0xf]  ;;  %v4394_v12 = vor.u32 %v6254_v19, %v4393_v18 }
 0x241   :  { %v6051_v29 = vld [vmem:[#allocation7 + $0xef0] sm:$0xf0]  ;;  %v6382_v26 = vld [vmem:[#allocation7 + $0x5f4] sm:$0xf0] }
 0x242   :  { %v6465_v49 = vld [vmem:[#allocation7 + $0x894] sm:$0xf]  ;;  %v6054_v8 = vor.u32 %v6665_v28, %v6051_v29  ;;  %3791 = vmatpush.bf16.msrb.mxu2 %v5798_v31  ;;  %v5161_v28 = vld [vmem:[#allocation7 + $0x7d8] sm:$0xf]  ;;  %v4650_v31 = vor.u32 %v6318_v24, %v4649_v22 }
 0x243   :  { %v5251_v32 = vld [vmem:[#allocation7 + $0x8b0] sm:$0xf0]  ;;  %v6446_v29 = vld [vmem:[#allocation7 + $0x7f4] sm:$0xf0] }
 0x244   :  { %v6529_v33 = vld [vmem:[#allocation7 + $0xa94] sm:$0xf]  ;;  %v5254_v48 = vor.u32 %v6465_v49, %v5251_v32  ;;  %3804 = vmatpush.bf16.msrb.mxu3 %v6054_v8  ;;  %v4906_v49 = vor.u32 %v6382_v26, %v4905_v25  ;;  %v4361_v32 = vld [vmem:[#allocation7 + $0x198] sm:$0xf]  ;;  %v5162_v8 = vor.u32 %v6446_v29, %v5161_v28 }
 0x245   :  { %v5507_v35 = vld [vmem:[#allocation7 + $0xab0] sm:$0xf0]  ;;  %v4265_v18 = vld [vmem:[#allocation7 + $0xd8] sm:$0xf] }
 0x246   :  { %v6593_v36 = vld [vmem:[#allocation7 + $0xc94] sm:$0xf]  ;;  %v5510_v51 = vor.u32 %v6529_v33, %v5507_v35  ;;  %3766 = vmatpush.bf16.msrb.mxu0 %v5254_v48  ;;  %v6246_v33 = vld [vmem:[#allocation7 + $0x1b4] sm:$0xf0] }
 0x247   :  { %v5763_v37 = vld [vmem:[#allocation7 + $0xcb0] sm:$0xf0]  ;;  %v6310_v35 = vld [vmem:[#allocation7 + $0x3b4] sm:$0xf0] }
 0x248   :  { %v6657_v45 = vld [vmem:[#allocation7 + $0xe94] sm:$0xf]  ;;  %v5766_v52 = vor.u32 %v6593_v36, %v5763_v37  ;;  %3779 = vmatpush.bf16.msrb.mxu1 %v5510_v51  ;;  %v4873_v36 = vld [vmem:[#allocation7 + $0x598] sm:$0xf] }
 0x249   :  { %v6019_v46 = vld [vmem:[#allocation7 + $0xeb0] sm:$0xf0]  ;;  %v6374_v37 = vld [vmem:[#allocation7 + $0x5b4] sm:$0xf0] }
 0x24a   :  { %v6457_v53 = vld [vmem:[#allocation7 + $0x854] sm:$0xf]  ;;  %v6022_v57 = vor.u32 %v6657_v45, %v6019_v46  ;;  %3792 = vmatpush.bf16.msrb.mxu2 %v5766_v52  ;;  %v4362_v45 = vor.u32 %v6246_v33, %v4361_v32  ;;  %v4618_v46 = vor.u32 %v6310_v35, %v4617_v34  ;;  %v4874_v48 = vor.u32 %v6374_v37, %v4873_v36  ;;  %v6238_v51 = vld [vmem:[#allocation7 + $0x174] sm:$0xf0]  ;;  %v3601_v36 = vpop.f32.mrf.mxu3 }
 0x24b   :  { %v5219_v54 = vld [vmem:[#allocation7 + $0x870] sm:$0xf0]  ;;  %v4585_v52 = vld [vmem:[#allocation7 + $0x358] sm:$0xf] }
 0x24c   :  { %v6521_v55 = vld [vmem:[#allocation7 + $0xa54] sm:$0xf]  ;;  %v5222_v62 = vor.u32 %v6457_v53, %v5219_v54  ;;  %3805 = vmatpush.bf16.msrb.mxu3 %v6022_v57  ;;  %v5130_v53 = vor.u32 %v6438_v43, %v5129_v39  ;;  %v6302_v54 = vld [vmem:[#allocation7 + $0x374] sm:$0xf0] }
 0x24d   :  { %v5475_v58 = vld [vmem:[#allocation7 + $0xa70] sm:$0xf0]  ;;  %v5097_v57 = vld [vmem:[#allocation7 + $0x758] sm:$0xf] }
 0x24e   :  { %v6585_v59 = vld [vmem:[#allocation7 + $0xc54] sm:$0xf]  ;;  %v5478_v1 = vor.u32 %v6521_v55, %v5475_v58  ;;  %3767 = vmatpush.bf16.msrb.mxu0 %v5222_v62  ;;  %v4841_v55 = vld [vmem:[#allocation7 + $0x558] sm:$0xf] }
 0x24f   :  { %v5731_v60 = vld [vmem:[#allocation7 + $0xc70] sm:$0xf0]  ;;  %v6430_v58 = vld [vmem:[#allocation7 + $0x774] sm:$0xf0] }
 0x250   :  { %v6649_v47 = vld [vmem:[#allocation7 + $0xe54] sm:$0xf]  ;;  %v5734_v3 = vor.u32 %v6585_v59, %v5731_v60  ;;  %3780 = vmatpush.bf16.msrb.mxu1 %v5478_v1  ;;  %v4330_v59 = vor.u32 %v6238_v51, %v4329_v2  ;;  %v4586_v60 = vor.u32 %v6302_v54, %v4585_v52  ;;  %v6230_v62 = vld [vmem:[#allocation7 + $0x134] sm:$0xf0] }
 0x251   :  { %v5987_v61 = vld [vmem:[#allocation7 + $0xe70] sm:$0xf0]  ;;  %v6294_v1 = vld [vmem:[#allocation7 + $0x334] sm:$0xf0] }
 0x252   :  { %v6449_v63 = vld [vmem:[#allocation7 + $0x814] sm:$0xf]  ;;  %v5990_v11 = vor.u32 %v6649_v47, %v5987_v61  ;;  %3793 = vmatpush.bf16.msrb.mxu2 %v5734_v3  ;;  %v4842_v47 = vor.u32 %v6366_v56, %v4841_v55  ;;  %v4297_v61 = vld [vmem:[#allocation7 + $0x118] sm:$0xf] }
 0x253   :  { %v5187_v0 = vld [vmem:[#allocation7 + $0x830] sm:$0xf0]  ;;  %v4809_v3 = vld [vmem:[#allocation7 + $0x518] sm:$0xf]  ;;  %v4298_v10 = vor.u32 %v6230_v62, %v4297_v61 }
 0x254   :  { %v6513_v5 = vld [vmem:[#allocation7 + $0xa14] sm:$0xf]  ;;  %v5190_v23 = vor.u32 %v6449_v63, %v5187_v0  ;;  %3806 = vmatpush.bf16.msrb.mxu3 %v5990_v11  ;;  %v4553_v63 = vld [vmem:[#allocation7 + $0x318] sm:$0xf]  ;;  %v5098_v0 = vor.u32 %v6430_v58, %v5097_v57  ;;  %v3562_v11 = vpop.f32.mrf.mxu0  ;;  %v3577_v57 = vpop.f32.mrf.mxu1 }
 0x255   :  { %v5443_v7 = vld [vmem:[#allocation7 + $0xa30] sm:$0xf0]  ;;  %v6222_v19 = vld [vmem:[#allocation7 + $0xf4] sm:$0xf0] }
 0x256   :  { %v6577_v9 = vld [vmem:[#allocation7 + $0xc14] sm:$0xf]  ;;  %v5446_v40 = vor.u32 %v6513_v5, %v5443_v7  ;;  %3768 = vmatpush.bf16.msrb.mxu0 %v5190_v23  ;;  %v6358_v5 = vld [vmem:[#allocation7 + $0x534] sm:$0xf0]  ;;  %v4266_v29 = vor.u32 %v6222_v19, %v4265_v18 }
 0x257   :  { %v5699_v13 = vld [vmem:[#allocation7 + $0xc30] sm:$0xf0]  ;;  %v5065_v7 = vld [vmem:[#allocation7 + $0x718] sm:$0xf] }
 0x258   :  { %v6641_v14 = vld [vmem:[#allocation7 + $0xe14] sm:$0xf]  ;;  %v5702_v27 = vor.u32 %v6577_v9, %v5699_v13  ;;  %3781 = vmatpush.bf16.msrb.mxu1 %v5446_v40  ;;  %v6422_v9 = vld [vmem:[#allocation7 + $0x734] sm:$0xf0]  ;;  %v4554_v13 = vor.u32 %v6294_v1, %v4553_v63 }
 0x259   :  { %v5955_v16 = vld [vmem:[#allocation7 + $0xe30] sm:$0xf0]  ;;  %3769 = vmatmul.bf16.vlgmr.msrb.gmra.mxu0 %v6868_v41  ;;  %v4521_v22 = vld [vmem:[#allocation7 + $0x2d8] sm:$0xf]  ;;  %v5066_v23 = vor.u32 %v6422_v9, %v5065_v7 }
 0x25a   :  { %v5958_v30 = vor.u32 %v6641_v14, %v5955_v16  ;;  %3794 = vmatpush.bf16.msrb.mxu2 %v5702_v27  ;;  %3813 = vmatpush.bf16.msra.mxu0 %v4394_v12  ;;  %v4810_v14 = vor.u32 %v6358_v5, %v4809_v3  ;;  %v3563_v16 = vadd.f32 %v3562_v11, %v6936_v50  ;;  %v6286_v24 = vld [vmem:[#allocation7 + $0x2f4] sm:$0xf0] }
 0x25b   :  { %3782 = vmatmul.bf16.vlgmr.msrb.gmra.mxu1 %v6872_v44  ;;  %v4777_v25 = vld [vmem:[#allocation7 + $0x4d8] sm:$0xf]  ;;  %v4522_v50 = vor.u32 %v6286_v24, %v4521_v22 }
 0x25c   :  { %3807 = vmatpush.bf16.msrb.mxu3 %v5958_v30  ;;  %3826 = vmatpush.bf16.msra.mxu1 %v4650_v31  ;;  %v6350_v26 = vld [vmem:[#allocation7 + $0x4f4] sm:$0xf0]  ;;  %v3576_v40 = vadd.f32 %v3575_v17, %v3563_v16  ;;  %v6943_v30 = vld [vmem:[#allocation9] sm:$0xff]  ;;  %v3564_v51 = vpop.f32.mrf.mxu0 }
 0x25d   :  { %3795 = vmatmul.bf16.vlgmr.msrb.gmra.mxu2 %v6866_v38  ;;  %v5033_v27 = vld [vmem:[#allocation7 + $0x6d8] sm:$0xf]  ;;  %v4053_v12 = vperm.slane %v6943_v30, 3  ;;  %v4778_v31 = vor.u32 %v6350_v26, %v4777_v25 }
 0x25e   :  { %3839 = vmatpush.bf16.msra.mxu2 %v4906_v49  ;;  %3814 = vmatpush.bf16.msra.mxu0 %v4362_v45  ;;  %v6414_v28 = vld [vmem:[#allocation7 + $0x6f4] sm:$0xf0]  ;;  %v3588_v49 = vpop.f32.mrf.mxu2 }
 0x25f   :  { %3808 = vmatmul.bf16.vlgmr.msrb.gmra.mxu3 %v6870_v42  ;;  %v4233_v32 = vld [vmem:[#allocation7 + $0x98] sm:$0xf]  ;;  %v3589_v35 = vadd.f32 %v3588_v49, %v3576_v40 }
 0x260   :  { %3852 = vmatpush.bf16.msra.mxu3 %v5162_v8  ;;  %3827 = vmatpush.bf16.msra.mxu1 %v4618_v46  ;;  %v6214_v33 = vld [vmem:[#allocation7 + $0xb4] sm:$0xf0]  ;;  %v5034_v8 = vor.u32 %v6414_v28, %v5033_v27 }
 0x261   :  { %v4489_v34 = vld [vmem:[#allocation7 + $0x298] sm:$0xf]  ;;  %v4234_v2 = vor.u32 %v6214_v33, %v4233_v32 }
 0x262   :  { %3840 = vmatpush.bf16.msra.mxu2 %v4874_v48  ;;  %3815 = vmatpush.bf16.msra.mxu0 %v4330_v59  ;;  %v6278_v37 = vld [vmem:[#allocation7 + $0x2b4] sm:$0xf0]  ;;  %v3602_v48 = vadd.f32 %v3601_v36, %v3589_v35 }
 0x263   :  { %v4745_v39 = vld [vmem:[#allocation7 + $0x498] sm:$0xf]  ;;  %v4490_v52 = vor.u32 %v6278_v37, %v4489_v34 }
 0x264   :  { %3853 = vmatpush.bf16.msra.mxu3 %v5130_v53  ;;  %3828 = vmatpush.bf16.msra.mxu1 %v4586_v60  ;;  %v6342_v43 = vld [vmem:[#allocation7 + $0x4b4] sm:$0xf0]  ;;  %v4069_v58 = vsub.f32 %v3602_v48, %v4053_v12 }
 0x265   :  { %v5001_v45 = vld [vmem:[#allocation7 + $0x698] sm:$0xf]  ;;  %v4746_v53 = vor.u32 %v6342_v43, %v4745_v39 }
 0x266   :  { %3841 = vmatpush.bf16.msra.mxu2 %v4842_v47  ;;  %3816 = vmatpush.bf16.msra.mxu0 %v4298_v10  ;;  %v6406_v46 = vld [vmem:[#allocation7 + $0x6b4] sm:$0xf0] }
 0x267   :  { %v4201_v54 = vld [vmem:[#allocation7 + $0x58] sm:$0xf]  ;;  %v5002_v59 = vor.u32 %v6406_v46, %v5001_v45 }
 0x268   :  { %3854 = vmatpush.bf16.msra.mxu3 %v5098_v0  ;;  %3829 = vmatpush.bf16.msra.mxu1 %v4554_v13  ;;  %v6206_v55 = vld [vmem:[#allocation7 + $0x74] sm:$0xf0]  ;;  %v4078_v0 = vmul.f32 %v4069_v58, %v4069_v58 }
 0x269   :  { %v4457_v56 = vld [vmem:[#allocation7 + $0x258] sm:$0xf]  ;;  %v4202_v1 = vor.u32 %v6206_v55, %v4201_v54 }
 0x26a   :  { %3842 = vmatpush.bf16.msra.mxu2 %v4810_v14  ;;  %3817 = vmatpush.bf16.msra.mxu0 %v4266_v29  ;;  %v6270_v60 = vld [vmem:[#allocation7 + $0x274] sm:$0xf0]  ;;  %v3590_v14 = vpop.f32.mrf.mxu2  ;;  %v6947_v16 = vadd.f32 %v6930_v15, %v4078_v0 }
 0x26b   :  { %v4713_v47 = vld [vmem:[#allocation7 + $0x458] sm:$0xf]  ;;  %v4458_v7 = vor.u32 %v6270_v60, %v4457_v56 }
 0x26c   :  { %3855 = vmatpush.bf16.msra.mxu3 %v5066_v23  ;;  %3830 = vmatpush.bf16.msra.mxu1 %v4522_v50  ;;  %v6334_v61 = vld [vmem:[#allocation7 + $0x474] sm:$0xf0]  ;;  %v3603_v23 = vpop.f32.mrf.mxu3 }
 0x26d   :  { %v4969_v62 = vld [vmem:[#allocation7 + $0x658] sm:$0xf]  ;;  %v4714_v9 = vor.u32 %v6334_v61, %v4713_v47 }
 0x26e   :  { %3843 = vmatpush.bf16.msra.mxu2 %v4778_v31  ;;  %v6398_v63 = vld [vmem:[#allocation7 + $0x674] sm:$0xf0]  ;;  %3818 = vmatpush.bf16.msra.mxu0 %v4234_v2 }
 0x26f   :  { %v4169_v3 = vld [vmem:[#allocation7 + $0x18] sm:$0xf]  ;;  %v4970_v17 = vor.u32 %v6398_v63, %v4969_v62 }
 0x270   :  { %3856 = vmatpush.bf16.msra.mxu3 %v5034_v8  ;;  %v6198_v5 = vld [vmem:[#allocation7 + $0x34] sm:$0xf0]  ;;  %3831 = vmatpush.bf16.msra.mxu1 %v4490_v52 }
 0x271   :  { %v4425_v10 = vld [vmem:[#allocation7 + $0x218] sm:$0xf]  ;;  %v4170_v40 = vor.u32 %v6198_v5, %v4169_v3 }
 0x272   :  { %3844 = vmatpush.bf16.msra.mxu2 %v4746_v53  ;;  %v6262_v11 = vld [vmem:[#allocation7 + $0x234] sm:$0xf0]  ;;  %3819 = vmatpush.bf16.msra.mxu0 %v4202_v1 }
 0x273   :  { %v4681_v13 = vld [vmem:[#allocation7 + $0x418] sm:$0xf]  ;;  %v4426_v12 = vor.u32 %v6262_v11, %v4425_v10 }
 0x274   :  { %3857 = vmatpush.bf16.msra.mxu3 %v5002_v59  ;;  %v6326_v18 = vld [vmem:[#allocation7 + $0x434] sm:$0xf0]  ;;  %3832 = vmatpush.bf16.msra.mxu1 %v4458_v7 }
 0x275   :  { %v4937_v19 = vld [vmem:[#allocation7 + $0x618] sm:$0xf]  ;;  %v4682_v50 = vor.u32 %v6326_v18, %v4681_v13 }
 0x276   :  { %v6390_v22 = vld [vmem:[#allocation7 + $0x634] sm:$0xf0]  ;;  %3845 = vmatpush.bf16.msra.mxu2 %v4714_v9  ;;  %3820 = vmatpush.bf16.msra.mxu0 %v4170_v40 }
 0x277   :  { %v5417_v24 = vld [vmem:[#allocation7 + $0x9d8] sm:$0xf]  ;;  %v4938_v49 = vor.u32 %v6390_v22, %v4937_v19 }
 0x278   :  { %v6510_v25 = vld [vmem:[#allocation7 + $0x9f4] sm:$0xf0]  ;;  %3858 = vmatpush.bf16.msra.mxu3 %v4970_v17  ;;  %3833 = vmatpush.bf16.msra.mxu1 %v4426_v12  ;;  %v3614_v17 = vpop.f32.mrf.mxu0 }
 0x279   :  { %v5673_v26 = vld [vmem:[#allocation7 + $0xbd8] sm:$0xf]  ;;  %v5418_v32 = vor.u32 %v6510_v25, %v5417_v24  ;;  %3821 = vmatmul.bf16.vlgmr.msra.gmra.mxu0 %v6859_v20  ;;  %v3627_v25 = vpop.f32.mrf.mxu1 }
 0x27a   :  { %v6574_v27 = vld [vmem:[#allocation7 + $0xbf4] sm:$0xf0]  ;;  %3846 = vmatpush.bf16.msra.mxu2 %v4682_v50 }
 0x27b   :  { %v5929_v28 = vld [vmem:[#allocation7 + $0xdd8] sm:$0xf]  ;;  %v5674_v33 = vor.u32 %v6574_v27, %v5673_v26  ;;  %3865 = vmatpush.bf16.msrb.mxu0 %v5418_v32  ;;  %3834 = vmatmul.bf16.vlgmr.msra.gmra.mxu1 %v6862_v21 }
 0x27c   :  { %v6638_v29 = vld [vmem:[#allocation7 + $0xdf4] sm:$0xf0]  ;;  %3859 = vmatpush.bf16.msra.mxu3 %v4938_v49 }
 0x27d   :  { %v6185_v15 = vld [vmem:[#allocation7 + $0xfd8] sm:$0xf]  ;;  %v5930_v34 = vor.u32 %v6638_v29, %v5929_v28  ;;  %3878 = vmatpush.bf16.msrb.mxu1 %v5674_v33  ;;  %3847 = vmatmul.bf16.vlgmr.msra.gmra.mxu2 %v6854_v4  ;;  %v3628_v29 = vadd.f32 %v3627_v25, %v3614_v17  ;;  %v6314_v25 = vld [vmem:[#allocation7 + $0x3dc] sm:$0xf] }
 0x27e   :  { %v6702_v31 = vld [vmem:[#allocation7 + $0xff4] sm:$0xf0] }
 0x27f   :  { %v5385_v8 = vld [vmem:[#allocation7 + $0x998] sm:$0xf]  ;;  %v6186_v37 = vor.u32 %v6702_v31, %v6185_v15  ;;  %3891 = vmatpush.bf16.msrb.mxu2 %v5930_v34  ;;  %3860 = vmatmul.bf16.vlgmr.msra.gmra.mxu3 %v6856_v6 }
 0x280   :  { %v6502_v35 = vld [vmem:[#allocation7 + $0x9b4] sm:$0xf0] }
 0x281   :  { %v5641_v36 = vld [vmem:[#allocation7 + $0xb98] sm:$0xf]  ;;  %v5386_v2 = vor.u32 %v6502_v35, %v5385_v8  ;;  %3904 = vmatpush.bf16.msrb.mxu3 %v6186_v37  ;;  %v3640_v8 = vpop.f32.mrf.mxu2 }
 0x282   :  { %v6566_v39 = vld [vmem:[#allocation7 + $0xbb4] sm:$0xf0] }
 0x283   :  { %v5897_v43 = vld [vmem:[#allocation7 + $0xd98] sm:$0xf]  ;;  %v5642_v51 = vor.u32 %v6566_v39, %v5641_v36  ;;  %3866 = vmatpush.bf16.msrb.mxu0 %v5386_v2 }
 0x284   :  { %v6630_v45 = vld [vmem:[#allocation7 + $0xdb4] sm:$0xf0] }
 0x285   :  { %v6153_v46 = vld [vmem:[#allocation7 + $0xf98] sm:$0xf]  ;;  %v5898_v52 = vor.u32 %v6630_v45, %v5897_v43  ;;  %3879 = vmatpush.bf16.msrb.mxu1 %v5642_v51  ;;  %v3641_v43 = vadd.f32 %v3640_v8, %v3628_v29  ;;  %v3653_v45 = vpop.f32.mrf.mxu3  ;;  %v4363_v8 = vld [vmem:[#allocation7 + $0x1b8] sm:$0xf0] }
 0x286   :  { %v6694_v48 = vld [vmem:[#allocation7 + $0xfb4] sm:$0xf0] }
 0x287   :  { %v5353_v53 = vld [vmem:[#allocation7 + $0x958] sm:$0xf]  ;;  %v6154_v56 = vor.u32 %v6694_v48, %v6153_v46  ;;  %3892 = vmatpush.bf16.msrb.mxu2 %v5898_v52  ;;  %v6953_v51 = vadd.f32 %v3653_v45, %v3641_v43  ;;  %v3616_v52 = vpop.f32.mrf.mxu0  ;;  %v4875_v43 = vld [vmem:[#allocation7 + $0x5b8] sm:$0xf0] }
 0x288   :  { %v6494_v54 = vld [vmem:[#allocation7 + $0x974] sm:$0xf0]  ;;  %v6434_v45 = vld [vmem:[#allocation7 + $0x79c] sm:$0xf] }
 0x289   :  { %v5609_v55 = vld [vmem:[#allocation7 + $0xb58] sm:$0xf]  ;;  %v5354_v61 = vor.u32 %v6494_v54, %v5353_v53  ;;  %3905 = vmatpush.bf16.msrb.mxu3 %v6154_v56 }
 0x28a   :  { %v6558_v57 = vld [vmem:[#allocation7 + $0xb74] sm:$0xf0] }
 0x28b   :  { %v5865_v58 = vld [vmem:[#allocation7 + $0xd58] sm:$0xf]  ;;  %v5610_v62 = vor.u32 %v6558_v57, %v5609_v55  ;;  %3867 = vmatpush.bf16.msrb.mxu0 %v5354_v61 }
 0x28c   :  { %v6622_v59 = vld [vmem:[#allocation7 + $0xd74] sm:$0xf0] }
 0x28d   :  { %v6121_v60 = vld [vmem:[#allocation7 + $0xf58] sm:$0xf]  ;;  %v5866_v63 = vor.u32 %v6622_v59, %v5865_v58  ;;  %3880 = vmatpush.bf16.msrb.mxu1 %v5610_v62  ;;  %v3629_v58 = vpop.f32.mrf.mxu1 }
 0x28e   :  { %v6686_v47 = vld [vmem:[#allocation7 + $0xf74] sm:$0xf0]  ;;  %v6362_v58 = vld [vmem:[#allocation7 + $0x55c] sm:$0xf] }
 0x28f   :  { %v5321_v0 = vld [vmem:[#allocation7 + $0x918] sm:$0xf]  ;;  %v6122_v5 = vor.u32 %v6686_v47, %v6121_v60  ;;  %3893 = vmatpush.bf16.msrb.mxu2 %v5866_v63 }
 0x290   :  { %v6486_v1 = vld [vmem:[#allocation7 + $0x934] sm:$0xf0] }
 0x291   :  { %v5577_v3 = vld [vmem:[#allocation7 + $0xb18] sm:$0xf]  ;;  %v5322_v14 = vor.u32 %v6486_v1, %v5321_v0  ;;  %3906 = vmatpush.bf16.msrb.mxu3 %v6122_v5 }
 0x292   :  { %v6550_v7 = vld [vmem:[#allocation7 + $0xb34] sm:$0xf0] }
 0x293   :  { %v5833_v9 = vld [vmem:[#allocation7 + $0xd18] sm:$0xf]  ;;  %v5578_v18 = vor.u32 %v6550_v7, %v5577_v3  ;;  %3868 = vmatpush.bf16.msrb.mxu0 %v5322_v14 }
 0x294   :  { %v6614_v10 = vld [vmem:[#allocation7 + $0xd34] sm:$0xf0] }
 0x295   :  { %v6089_v11 = vld [vmem:[#allocation7 + $0xf18] sm:$0xf]  ;;  %v5834_v19 = vor.u32 %v6614_v10, %v5833_v9  ;;  %3881 = vmatpush.bf16.msrb.mxu1 %v5578_v18 }
 0x296   :  { %v6678_v13 = vld [vmem:[#allocation7 + $0xf34] sm:$0xf0] }
 0x297   :  { %v5289_v22 = vld [vmem:[#allocation7 + $0x8d8] sm:$0xf]  ;;  %v6090_v26 = vor.u32 %v6678_v13, %v6089_v11  ;;  %3894 = vmatpush.bf16.msrb.mxu2 %v5834_v19  ;;  %v3642_v13 = vpop.f32.mrf.mxu2 }
 0x298   :  { %v6478_v23 = vld [vmem:[#allocation7 + $0x8f4] sm:$0xf0]  ;;  %v5067_v13 = vld [vmem:[#allocation7 + $0x738] sm:$0xf0] }
 0x299   :  { %v5545_v24 = vld [vmem:[#allocation7 + $0xad8] sm:$0xf]  ;;  %v5290_v15 = vor.u32 %v6478_v23, %v5289_v22  ;;  %3907 = vmatpush.bf16.msrb.mxu3 %v6090_v26  ;;  %v3655_v22 = vpop.f32.mrf.mxu3  ;;  %v6250_v23 = vld [vmem:[#allocation7 + $0x1dc] sm:$0xf] }
 0x29a   :  { %v6542_v40 = vld [vmem:[#allocation7 + $0xaf4] sm:$0xf0] }
 0x29b   :  { %v5801_v27 = vld [vmem:[#allocation7 + $0xcd8] sm:$0xf]  ;;  %v5546_v31 = vor.u32 %v6542_v40, %v5545_v24  ;;  %3869 = vmatpush.bf16.msrb.mxu0 %v5290_v15  ;;  %v4395_v24 = vld [vmem:[#allocation7 + $0x1f8] sm:$0xf0] }
 0x29c   :  { %v6606_v28 = vld [vmem:[#allocation7 + $0xcf4] sm:$0xf0]  ;;  %v4651_v40 = vld [vmem:[#allocation7 + $0x3f8] sm:$0xf0] }
 0x29d   :  { %v6057_v12 = vld [vmem:[#allocation7 + $0xed8] sm:$0xf]  ;;  %v5802_v49 = vor.u32 %v6606_v28, %v5801_v27  ;;  %3882 = vmatpush.bf16.msrb.mxu1 %v5546_v31  ;;  %v6378_v27 = vld [vmem:[#allocation7 + $0x5dc] sm:$0xf] }
 0x29e   :  { %v6670_v50 = vld [vmem:[#allocation7 + $0xef4] sm:$0xf0]  ;;  %v4907_v28 = vld [vmem:[#allocation7 + $0x5f8] sm:$0xf0] }
 0x29f   :  { %v5257_v32 = vld [vmem:[#allocation7 + $0x898] sm:$0xf]  ;;  %v6058_v35 = vor.u32 %v6670_v50, %v6057_v12  ;;  %3895 = vmatpush.bf16.msrb.mxu2 %v5802_v49  ;;  %v6442_v50 = vld [vmem:[#allocation7 + $0x7dc] sm:$0xf]  ;;  %v4398_v49 = vor.u32 %v6250_v23, %v4395_v24  ;;  %v3679_v23 = vpop.f32.mrf.mxu1 }
 0x2a0   :  { %v6470_v33 = vld [vmem:[#allocation7 + $0x8b4] sm:$0xf0]  ;;  %v5163_v15 = vld [vmem:[#allocation7 + $0x7f8] sm:$0xf0] }
 0x2a1   :  { %v5513_v34 = vld [vmem:[#allocation7 + $0xa98] sm:$0xf]  ;;  %v5258_v2 = vor.u32 %v6470_v33, %v5257_v32  ;;  %3908 = vmatpush.bf16.msrb.mxu3 %v6058_v35  ;;  %v4654_v32 = vor.u32 %v6314_v25, %v4651_v40  ;;  %v4910_v33 = vor.u32 %v6378_v27, %v4907_v28  ;;  %v6306_v35 = vld [vmem:[#allocation7 + $0x39c] sm:$0xf] }
 0x2a2   :  { %v6534_v36 = vld [vmem:[#allocation7 + $0xab4] sm:$0xf0]  ;;  %v6218_v24 = vld [vmem:[#allocation7 + $0xdc] sm:$0xf] }
 0x2a3   :  { %v5769_v37 = vld [vmem:[#allocation7 + $0xc98] sm:$0xf]  ;;  %v5514_v53 = vor.u32 %v6534_v36, %v5513_v34  ;;  %3870 = vmatpush.bf16.msrb.mxu0 %v5258_v2  ;;  %v6242_v34 = vld [vmem:[#allocation7 + $0x19c] sm:$0xf]  ;;  %v5166_v36 = vor.u32 %v6442_v50, %v5163_v15 }
 0x2a4   :  { %v6598_v39 = vld [vmem:[#allocation7 + $0xcb4] sm:$0xf0]  ;;  %v4267_v25 = vld [vmem:[#allocation7 + $0xf8] sm:$0xf0] }
 0x2a5   :  { %v6025_v46 = vld [vmem:[#allocation7 + $0xe98] sm:$0xf]  ;;  %v5770_v54 = vor.u32 %v6598_v39, %v5769_v37  ;;  %3883 = vmatpush.bf16.msrb.mxu1 %v5514_v53  ;;  %v4619_v37 = vld [vmem:[#allocation7 + $0x3b8] sm:$0xf0] }
 0x2a6   :  { %v6662_v48 = vld [vmem:[#allocation7 + $0xeb4] sm:$0xf0]  ;;  %v6370_v39 = vld [vmem:[#allocation7 + $0x59c] sm:$0xf]  ;;  %v4622_v2 = vor.u32 %v6306_v35, %v4619_v37 }
 0x2a7   :  { %v5225_v55 = vld [vmem:[#allocation7 + $0x858] sm:$0xf]  ;;  %v6026_v59 = vor.u32 %v6662_v48, %v6025_v46  ;;  %3896 = vmatpush.bf16.msrb.mxu2 %v5770_v54  ;;  %v5131_v46 = vld [vmem:[#allocation7 + $0x7b8] sm:$0xf0]  ;;  %v4366_v48 = vor.u32 %v6242_v34, %v4363_v8  ;;  %v4878_v52 = vor.u32 %v6370_v39, %v4875_v43  ;;  %v3705_v39 = vpop.f32.mrf.mxu3 }
 0x2a8   :  { %v6462_v56 = vld [vmem:[#allocation7 + $0x874] sm:$0xf0]  ;;  %v6234_v53 = vld [vmem:[#allocation7 + $0x15c] sm:$0xf] }
 0x2a9   :  { %v5481_v57 = vld [vmem:[#allocation7 + $0xa58] sm:$0xf]  ;;  %v5226_v0 = vor.u32 %v6462_v56, %v5225_v55  ;;  %3909 = vmatpush.bf16.msrb.mxu3 %v6026_v59  ;;  %v4331_v54 = vld [vmem:[#allocation7 + $0x178] sm:$0xf0]  ;;  %v5134_v56 = vor.u32 %v6434_v45, %v5131_v46 }
 0x2aa   :  { %v6526_v60 = vld [vmem:[#allocation7 + $0xa74] sm:$0xf0]  ;;  %v6298_v55 = vld [vmem:[#allocation7 + $0x35c] sm:$0xf] }
 0x2ab   :  { %v5737_v47 = vld [vmem:[#allocation7 + $0xc58] sm:$0xf]  ;;  %v5482_v5 = vor.u32 %v6526_v60, %v5481_v57  ;;  %3871 = vmatpush.bf16.msrb.mxu0 %v5226_v0  ;;  %v4587_v57 = vld [vmem:[#allocation7 + $0x378] sm:$0xf0] }
 0x2ac   :  { %v6590_v61 = vld [vmem:[#allocation7 + $0xc74] sm:$0xf0]  ;;  %v4843_v59 = vld [vmem:[#allocation7 + $0x578] sm:$0xf0] }
 0x2ad   :  { %v5993_v62 = vld [vmem:[#allocation7 + $0xe58] sm:$0xf]  ;;  %v5738_v7 = vor.u32 %v6590_v61, %v5737_v47  ;;  %3884 = vmatpush.bf16.msrb.mxu1 %v5482_v5  ;;  %v6426_v60 = vld [vmem:[#allocation7 + $0x75c] sm:$0xf]  ;;  %v4334_v61 = vor.u32 %v6234_v53, %v4331_v54 }
 0x2ae   :  { %v6654_v63 = vld [vmem:[#allocation7 + $0xe74] sm:$0xf0]  ;;  %v5099_v47 = vld [vmem:[#allocation7 + $0x778] sm:$0xf0] }
 0x2af   :  { %v5193_v1 = vld [vmem:[#allocation7 + $0x818] sm:$0xf]  ;;  %v5994_v14 = vor.u32 %v6654_v63, %v5993_v62  ;;  %3897 = vmatpush.bf16.msrb.mxu2 %v5738_v7  ;;  %v4590_v62 = vor.u32 %v6298_v55, %v4587_v57  ;;  %v4846_v63 = vor.u32 %v6362_v58, %v4843_v59  ;;  %v6226_v0 = vld [vmem:[#allocation7 + $0x11c] sm:$0xf]  ;;  %v5102_v5 = vor.u32 %v6426_v60, %v5099_v47  ;;  %v3681_v59 = vpop.f32.mrf.mxu1 }
 0x2b0   :  { %v6454_v3 = vld [vmem:[#allocation7 + $0x834] sm:$0xf0]  ;;  %v4555_v7 = vld [vmem:[#allocation7 + $0x338] sm:$0xf0] }
 0x2b1   :  { %v5449_v9 = vld [vmem:[#allocation7 + $0xa18] sm:$0xf]  ;;  %v5194_v26 = vor.u32 %v6454_v3, %v5193_v1  ;;  %3910 = vmatpush.bf16.msrb.mxu3 %v5994_v14  ;;  %v4299_v1 = vld [vmem:[#allocation7 + $0x138] sm:$0xf0] }
 0x2b2   :  { %v6518_v10 = vld [vmem:[#allocation7 + $0xa34] sm:$0xf0]  ;;  %v6290_v3 = vld [vmem:[#allocation7 + $0x31c] sm:$0xf]  ;;  %v4302_v14 = vor.u32 %v6226_v0, %v4299_v1 }
 0x2b3   :  { %v5705_v11 = vld [vmem:[#allocation7 + $0xc18] sm:$0xf]  ;;  %v5450_v29 = vor.u32 %v6518_v10, %v5449_v9  ;;  %3872 = vmatpush.bf16.msrb.mxu0 %v5194_v26  ;;  %v6354_v9 = vld [vmem:[#allocation7 + $0x51c] sm:$0xf] }
 0x2b4   :  { %v6582_v17 = vld [vmem:[#allocation7 + $0xc34] sm:$0xf0]  ;;  %v4811_v10 = vld [vmem:[#allocation7 + $0x538] sm:$0xf0] }
 0x2b5   :  { %v5961_v18 = vld [vmem:[#allocation7 + $0xe18] sm:$0xf]  ;;  %v5706_v12 = vor.u32 %v6582_v17, %v5705_v11  ;;  %3885 = vmatpush.bf16.msrb.mxu1 %v5450_v29  ;;  %v6418_v11 = vld [vmem:[#allocation7 + $0x71c] sm:$0xf]  ;;  %v3666_v17 = vpop.f32.mrf.mxu0 }
 0x2b6   :  { %v6646_v19 = vld [vmem:[#allocation7 + $0xe34] sm:$0xf0]  ;;  %3873 = vmatmul.bf16.vlgmr.msrb.gmra.mxu0 %v6868_v41  ;;  %v3667_v22 = vadd.f32 %v3666_v17, %v6953_v51  ;;  %v6282_v26 = vld [vmem:[#allocation7 + $0x2dc] sm:$0xf]  ;;  %v5070_v40 = vor.u32 %v6418_v11, %v5067_v13 }
 0x2b7   :  { %v5962_v31 = vor.u32 %v6646_v19, %v5961_v18  ;;  %3898 = vmatpush.bf16.msrb.mxu2 %v5706_v12  ;;  %3917 = vmatpush.bf16.msra.mxu0 %v4398_v49  ;;  %v4558_v18 = vor.u32 %v6290_v3, %v4555_v7  ;;  %v4814_v19 = vor.u32 %v6354_v9, %v4811_v10  ;;  %v4523_v27 = vld [vmem:[#allocation7 + $0x2f8] sm:$0xf0]  ;;  %v4054_v49 = vperm.slane %v6943_v30, 4 }
 0x2b8   :  { %3886 = vmatmul.bf16.vlgmr.msrb.gmra.mxu1 %v6872_v44  ;;  %v6346_v28 = vld [vmem:[#allocation7 + $0x4dc] sm:$0xf]  ;;  %v3680_v12 = vadd.f32 %v3679_v23, %v3667_v22 }
 0x2b9   :  { %3911 = vmatpush.bf16.msrb.mxu3 %v5962_v31  ;;  %3930 = vmatpush.bf16.msra.mxu1 %v4654_v32  ;;  %v4779_v29 = vld [vmem:[#allocation7 + $0x4f8] sm:$0xf0]  ;;  %v4270_v31 = vor.u32 %v6218_v24, %v4267_v25  ;;  %v4526_v32 = vor.u32 %v6282_v26, %v4523_v27  ;;  %v3707_v26 = vpop.f32.mrf.mxu3 }
 0x2ba   :  { %3899 = vmatmul.bf16.vlgmr.msrb.gmra.mxu2 %v6866_v38  ;;  %v6410_v50 = vld [vmem:[#allocation7 + $0x6dc] sm:$0xf]  ;;  %v4782_v51 = vor.u32 %v6346_v28, %v4779_v29 }
 0x2bb   :  { %3943 = vmatpush.bf16.msra.mxu2 %v4910_v33  ;;  %3918 = vmatpush.bf16.msra.mxu0 %v4366_v48  ;;  %v5035_v15 = vld [vmem:[#allocation7 + $0x6f8] sm:$0xf0]  ;;  %v3692_v33 = vpop.f32.mrf.mxu2 }
 0x2bc   :  { %3912 = vmatmul.bf16.vlgmr.msrb.gmra.mxu3 %v6870_v42  ;;  %v6210_v34 = vld [vmem:[#allocation7 + $0x9c] sm:$0xf]  ;;  %v3693_v37 = vadd.f32 %v3692_v33, %v3680_v12 }
 0x2bd   :  { %3956 = vmatpush.bf16.msra.mxu3 %v5166_v36  ;;  %3931 = vmatpush.bf16.msra.mxu1 %v4622_v2  ;;  %v4235_v8 = vld [vmem:[#allocation7 + $0xb8] sm:$0xf0]  ;;  %v5038_v36 = vor.u32 %v6410_v50, %v5035_v15  ;;  %v3668_v53 = vpop.f32.mrf.mxu0 }
 0x2be   :  { %v6274_v35 = vld [vmem:[#allocation7 + $0x29c] sm:$0xf]  ;;  %v4238_v30 = vor.u32 %v6210_v34, %v4235_v8 }
 0x2bf   :  { %3944 = vmatpush.bf16.msra.mxu2 %v4878_v52  ;;  %3919 = vmatpush.bf16.msra.mxu0 %v4334_v61  ;;  %v4491_v43 = vld [vmem:[#allocation7 + $0x2b8] sm:$0xf0]  ;;  %v3706_v52 = vadd.f32 %v3705_v39, %v3693_v37 }
 0x2c0   :  { %v6338_v45 = vld [vmem:[#allocation7 + $0x49c] sm:$0xf]  ;;  %v4494_v54 = vor.u32 %v6274_v35, %v4491_v43 }
 0x2c1   :  { %3957 = vmatpush.bf16.msra.mxu3 %v5134_v56  ;;  %3932 = vmatpush.bf16.msra.mxu1 %v4590_v62  ;;  %v4747_v46 = vld [vmem:[#allocation7 + $0x4b8] sm:$0xf0]  ;;  %v4070_v60 = vsub.f32 %v3706_v52, %v4054_v49 }
 0x2c2   :  { %v6402_v48 = vld [vmem:[#allocation7 + $0x69c] sm:$0xf]  ;;  %v4750_v55 = vor.u32 %v6338_v45, %v4747_v46 }
 0x2c3   :  { %3945 = vmatpush.bf16.msra.mxu2 %v4846_v63  ;;  %3920 = vmatpush.bf16.msra.mxu0 %v4302_v14  ;;  %v5003_v2 = vld [vmem:[#allocation7 + $0x6b8] sm:$0xf0]  ;;  %v4079_v3 = vmul.f32 %v4070_v60, %v4070_v60 }
 0x2c4   :  { %v6202_v56 = vld [vmem:[#allocation7 + $0x5c] sm:$0xf]  ;;  %v5006_v47 = vor.u32 %v6402_v48, %v5003_v2 }
 0x2c5   :  { %3958 = vmatpush.bf16.msra.mxu3 %v5102_v5  ;;  %3933 = vmatpush.bf16.msra.mxu1 %v4558_v18  ;;  %v4203_v57 = vld [vmem:[#allocation7 + $0x78] sm:$0xf0]  ;;  %v3694_v18 = vpop.f32.mrf.mxu2 }
 0x2c6   :  { %v6266_v58 = vld [vmem:[#allocation7 + $0x25c] sm:$0xf]  ;;  %v4206_v5 = vor.u32 %v6202_v56, %v4203_v57 }
 0x2c7   :  { %3946 = vmatpush.bf16.msra.mxu2 %v4814_v19  ;;  %3921 = vmatpush.bf16.msra.mxu0 %v4270_v31  ;;  %v4459_v61 = vld [vmem:[#allocation7 + $0x278] sm:$0xf0]  ;;  %v6962_v19 = vadd.f32 %v6947_v16, %v4079_v3 }
 0x2c8   :  { %v6330_v62 = vld [vmem:[#allocation7 + $0x45c] sm:$0xf]  ;;  %v4462_v10 = vor.u32 %v6266_v58, %v4459_v61 }
 0x2c9   :  { %3959 = vmatpush.bf16.msra.mxu3 %v5070_v40  ;;  %3934 = vmatpush.bf16.msra.mxu1 %v4526_v32  ;;  %v4715_v63 = vld [vmem:[#allocation7 + $0x478] sm:$0xf0] }
 0x2ca   :  { %v6394_v0 = vld [vmem:[#allocation7 + $0x65c] sm:$0xf]  ;;  %v4718_v11 = vor.u32 %v6330_v62, %v4715_v63 }
 0x2cb   :  { %3947 = vmatpush.bf16.msra.mxu2 %v4782_v51  ;;  %v4971_v1 = vld [vmem:[#allocation7 + $0x678] sm:$0xf0]  ;;  %3922 = vmatpush.bf16.msra.mxu0 %v4238_v30 }
 0x2cc   :  { %v6194_v7 = vld [vmem:[#allocation7 + $0x1c] sm:$0xf]  ;;  %v4974_v22 = vor.u32 %v6394_v0, %v4971_v1 }
 0x2cd   :  { %3960 = vmatpush.bf16.msra.mxu3 %v5038_v36  ;;  %v4171_v9 = vld [vmem:[#allocation7 + $0x38] sm:$0xf0]  ;;  %3935 = vmatpush.bf16.msra.mxu1 %v4494_v54 }
 0x2ce   :  { %v6258_v13 = vld [vmem:[#allocation7 + $0x21c] sm:$0xf]  ;;  %v4174_v29 = vor.u32 %v6194_v7, %v4171_v9 }
 0x2cf   :  { %3948 = vmatpush.bf16.msra.mxu2 %v4750_v55  ;;  %v4427_v14 = vld [vmem:[#allocation7 + $0x238] sm:$0xf0]  ;;  %3923 = vmatpush.bf16.msra.mxu0 %v4206_v5 }
 0x2d0   :  { %v6322_v17 = vld [vmem:[#allocation7 + $0x41c] sm:$0xf]  ;;  %v4430_v31 = vor.u32 %v6258_v13, %v4427_v14  ;;  %v3718_v13 = vpop.f32.mrf.mxu0 }
 0x2d1   :  { %3961 = vmatpush.bf16.msra.mxu3 %v5006_v47  ;;  %v4683_v23 = vld [vmem:[#allocation7 + $0x438] sm:$0xf0]  ;;  %3936 = vmatpush.bf16.msra.mxu1 %v4462_v10 }
 0x2d2   :  { %v6386_v24 = vld [vmem:[#allocation7 + $0x61c] sm:$0xf]  ;;  %v4686_v49 = vor.u32 %v6322_v17, %v4683_v23  ;;  %v3731_v23 = vpop.f32.mrf.mxu1 }
 0x2d3   :  { %v4939_v25 = vld [vmem:[#allocation7 + $0x638] sm:$0xf0]  ;;  %3949 = vmatpush.bf16.msra.mxu2 %v4718_v11  ;;  %3924 = vmatpush.bf16.msra.mxu0 %v4174_v29 }
 0x2d4   :  { %v6506_v40 = vld [vmem:[#allocation7 + $0x9dc] sm:$0xf]  ;;  %v4942_v51 = vor.u32 %v6386_v24, %v4939_v25 }
 0x2d5   :  { %v5419_v27 = vld [vmem:[#allocation7 + $0x9f8] sm:$0xf0]  ;;  %3962 = vmatpush.bf16.msra.mxu3 %v4974_v22  ;;  %3937 = vmatpush.bf16.msra.mxu1 %v4430_v31 }
 0x2d6   :  { %v6570_v28 = vld [vmem:[#allocation7 + $0xbdc] sm:$0xf]  ;;  %v5422_v33 = vor.u32 %v6506_v40, %v5419_v27  ;;  %3925 = vmatmul.bf16.vlgmr.msra.gmra.mxu0 %v6859_v20  ;;  %v3732_v27 = vadd.f32 %v3731_v23, %v3718_v13 }
 0x2d7   :  { %v5675_v12 = vld [vmem:[#allocation7 + $0xbf8] sm:$0xf0]  ;;  %3950 = vmatpush.bf16.msra.mxu2 %v4686_v49 }
 0x2d8   :  { %v6634_v50 = vld [vmem:[#allocation7 + $0xddc] sm:$0xf]  ;;  %v5678_v34 = vor.u32 %v6570_v28, %v5675_v12  ;;  %3969 = vmatpush.bf16.msrb.mxu0 %v5422_v33  ;;  %3938 = vmatmul.bf16.vlgmr.msra.gmra.mxu1 %v6862_v21 }
 0x2d9   :  { %v5931_v15 = vld [vmem:[#allocation7 + $0xdf8] sm:$0xf0]  ;;  %3963 = vmatpush.bf16.msra.mxu3 %v4942_v51 }
 0x2da   :  { %v6698_v16 = vld [vmem:[#allocation7 + $0xfdc] sm:$0xf]  ;;  %v5934_v8 = vor.u32 %v6634_v50, %v5931_v15  ;;  %3982 = vmatpush.bf16.msrb.mxu1 %v5678_v34  ;;  %3951 = vmatmul.bf16.vlgmr.msra.gmra.mxu2 %v6854_v4 }
 0x2db   :  { %v6187_v32 = vld [vmem:[#allocation7 + $0xff8] sm:$0xf0] }
 0x2dc   :  { %v6498_v35 = vld [vmem:[#allocation7 + $0x99c] sm:$0xf]  ;;  %v6190_v39 = vor.u32 %v6698_v16, %v6187_v32  ;;  %3995 = vmatpush.bf16.msrb.mxu2 %v5934_v8  ;;  %3964 = vmatmul.bf16.vlgmr.msra.gmra.mxu3 %v6856_v6  ;;  %v3744_v32 = vpop.f32.mrf.mxu2 }
 0x2dd   :  { %v5387_v36 = vld [vmem:[#allocation7 + $0x9b8] sm:$0xf0] }
 0x2de   :  { %v6562_v37 = vld [vmem:[#allocation7 + $0xb9c] sm:$0xf]  ;;  %v5390_v52 = vor.u32 %v6498_v35, %v5387_v36  ;;  %4008 = vmatpush.bf16.msrb.mxu3 %v6190_v39  ;;  %v3745_v35 = vadd.f32 %v3744_v32, %v3732_v27  ;;  %v3757_v36 = vpop.f32.mrf.mxu3 }
 0x2df   :  { %v5643_v43 = vld [vmem:[#allocation7 + $0xbb8] sm:$0xf0] }
 0x2e0   :  { %v6626_v45 = vld [vmem:[#allocation7 + $0xd9c] sm:$0xf]  ;;  %v5646_v30 = vor.u32 %v6562_v37, %v5643_v43  ;;  %3970 = vmatpush.bf16.msrb.mxu0 %v5390_v52 }
 0x2e1   :  { %v5899_v46 = vld [vmem:[#allocation7 + $0xdb8] sm:$0xf0] }
 0x2e2   :  { %v6690_v48 = vld [vmem:[#allocation7 + $0xf9c] sm:$0xf]  ;;  %v5902_v53 = vor.u32 %v6626_v45, %v5899_v46  ;;  %3983 = vmatpush.bf16.msrb.mxu1 %v5646_v30  ;;  %v3758_v45 = vadd.f32 %v3757_v36, %v3745_v35  ;;  %v3720_v46 = vpop.f32.mrf.mxu0 }
 0x2e3   :  { %v6155_v2 = vld [vmem:[#allocation7 + $0xfb8] sm:$0xf0] }
 0x2e4   :  { %v6490_v54 = vld [vmem:[#allocation7 + $0x95c] sm:$0xf]  ;;  %v6158_v57 = vor.u32 %v6690_v48, %v6155_v2  ;;  %3996 = vmatpush.bf16.msrb.mxu2 %v5902_v53 }
 0x2e5   :  { %v5355_v55 = vld [vmem:[#allocation7 + $0x978] sm:$0xf0] }
 0x2e6   :  { %v6554_v56 = vld [vmem:[#allocation7 + $0xb5c] sm:$0xf]  ;;  %v5358_v62 = vor.u32 %v6490_v54, %v5355_v55  ;;  %4009 = vmatpush.bf16.msrb.mxu3 %v6158_v57  ;;  %v3733_v54 = vpop.f32.mrf.mxu1 }
 0x2e7   :  { %v5611_v58 = vld [vmem:[#allocation7 + $0xb78] sm:$0xf0] }
 0x2e8   :  { %v6618_v59 = vld [vmem:[#allocation7 + $0xd5c] sm:$0xf]  ;;  %v5614_v63 = vor.u32 %v6554_v56, %v5611_v58  ;;  %3971 = vmatpush.bf16.msrb.mxu0 %v5358_v62 }
 0x2e9   :  { %v5867_v60 = vld [vmem:[#allocation7 + $0xd78] sm:$0xf0] }
 0x2ea   :  { %v6682_v47 = vld [vmem:[#allocation7 + $0xf5c] sm:$0xf]  ;;  %v5870_v0 = vor.u32 %v6618_v59, %v5867_v60  ;;  %3984 = vmatpush.bf16.msrb.mxu1 %v5614_v63 }
 0x2eb   :  { %v6123_v61 = vld [vmem:[#allocation7 + $0xf78] sm:$0xf0] }
 0x2ec   :  { %v6482_v1 = vld [vmem:[#allocation7 + $0x91c] sm:$0xf]  ;;  %v6126_v5 = vor.u32 %v6682_v47, %v6123_v61  ;;  %3997 = vmatpush.bf16.msrb.mxu2 %v5870_v0 }
 0x2ed   :  { %v5323_v3 = vld [vmem:[#allocation7 + $0x938] sm:$0xf0] }
 0x2ee   :  { %v6546_v4 = vld [vmem:[#allocation7 + $0xb1c] sm:$0xf]  ;;  %v5326_v6 = vor.u32 %v6482_v1, %v5323_v3  ;;  %4010 = vmatpush.bf16.msrb.mxu3 %v6126_v5  ;;  %v3746_v3 = vpop.f32.mrf.mxu2 }
 0x2ef   :  { %v5579_v7 = vld [vmem:[#allocation7 + $0xb38] sm:$0xf0]  ;;  %v6822_v3 = vmov 0.0  }
 0x2f0   :  { %v6610_v9 = vld [vmem:[#allocation7 + $0xd1c] sm:$0xf]  ;;  %v5582_v21 = vor.u32 %v6546_v4, %v5579_v7  ;;  %3972 = vmatpush.bf16.msrb.mxu0 %v5326_v6  ;;  %65 = vst.msk [vmem:[#allocation3] sm:$0xff] %vm64_vm0, %v6822_v3 }
 0x2f1   :  { %v5835_v10 = vld [vmem:[#allocation7 + $0xd38] sm:$0xf0] }
 0x2f2   :  { %v6674_v11 = vld [vmem:[#allocation7 + $0xf1c] sm:$0xf]  ;;  %v5838_v14 = vor.u32 %v6610_v9, %v5835_v10  ;;  %3985 = vmatpush.bf16.msrb.mxu1 %v5582_v21  ;;  %v3759_v10 = vpop.f32.mrf.mxu3 }
 0x2f3   :  { %v6091_v20 = vld [vmem:[#allocation7 + $0xf38] sm:$0xf0] }
 0x2f4   :  { %v6474_v17 = vld [vmem:[#allocation7 + $0x8dc] sm:$0xf]  ;;  %v6094_v24 = vor.u32 %v6674_v11, %v6091_v20  ;;  %3998 = vmatpush.bf16.msrb.mxu2 %v5838_v14 }
 0x2f5   :  { %v5291_v18 = vld [vmem:[#allocation7 + $0x8f8] sm:$0xf0] }
 0x2f6   :  { %v6538_v22 = vld [vmem:[#allocation7 + $0xadc] sm:$0xf]  ;;  %v5294_v12 = vor.u32 %v6474_v17, %v5291_v18  ;;  %4011 = vmatpush.bf16.msrb.mxu3 %v6094_v24  ;;  %v3770_v17 = vpop.f32.mrf.mxu0  ;;  %v3796_v24 = vpop.f32.mrf.mxu2 }
 0x2f7   :  { %v5547_v25 = vld [vmem:[#allocation7 + $0xaf8] sm:$0xf0]  ;;  %v3771_v18 = vadd.f32 %v3770_v17, %v3758_v45 }
 0x2f8   :  { %v6602_v26 = vld [vmem:[#allocation7 + $0xcdc] sm:$0xf]  ;;  %v5550_v50 = vor.u32 %v6538_v22, %v5547_v25  ;;  %3973 = vmatpush.bf16.msrb.mxu0 %v5294_v12  ;;  %v3783_v22 = vpop.f32.mrf.mxu1 }
 0x2f9   :  { %v5803_v40 = vld [vmem:[#allocation7 + $0xcf8] sm:$0xf0]  ;;  %v3784_v23 = vadd.f32 %v3783_v22, %v3771_v18 }
 0x2fa   :  { %v6666_v28 = vld [vmem:[#allocation7 + $0xedc] sm:$0xf]  ;;  %v5806_v15 = vor.u32 %v6602_v26, %v5803_v40  ;;  %3986 = vmatpush.bf16.msrb.mxu1 %v5550_v50  ;;  %v3809_v26 = vpop.f32.mrf.mxu3  ;;  %v6972_v40 = vld [vmem:[#allocation9] sm:$0xff] }
 0x2fb   :  { %v6059_v29 = vld [vmem:[#allocation7 + $0xef8] sm:$0xf0]  ;;  %v3797_v25 = vadd.f32 %v3796_v24, %v3784_v23  ;;  %v4055_v27 = vperm.slane %v6972_v40, 5  ;;  %v4057_v17 = vperm.slane %v6972_v40, 7 }
 0x2fc   :  { %v6466_v31 = vld [vmem:[#allocation7 + $0x89c] sm:$0xf]  ;;  %v6062_v51 = vor.u32 %v6666_v28, %v6059_v29  ;;  %3999 = vmatpush.bf16.msrb.mxu2 %v5806_v15 }
 0x2fd   :  { %v5259_v49 = vld [vmem:[#allocation7 + $0x8b8] sm:$0xf0]  ;;  %v3810_v28 = vadd.f32 %v3809_v26, %v3797_v25 }
 0x2fe   :  { %v6530_v16 = vld [vmem:[#allocation7 + $0xa9c] sm:$0xf]  ;;  %v5262_v43 = vor.u32 %v6466_v31, %v5259_v49  ;;  %4012 = vmatpush.bf16.msrb.mxu3 %v6062_v51  ;;  %v3772_v29 = vpop.f32.mrf.mxu0  ;;  %v3798_v50 = vpop.f32.mrf.mxu2 }
 0x2ff   :  { %v5515_v33 = vld [vmem:[#allocation7 + $0xab8] sm:$0xf0]  ;;  %v4071_v12 = vsub.f32 %v3810_v28, %v4055_v27  ;;  %v6823_v28 = vmov 0  }
 0x300   :  { %v6594_v34 = vld [vmem:[#allocation7 + $0xc9c] sm:$0xf]  ;;  %v5518_v48 = vor.u32 %v6530_v16, %v5515_v33  ;;  %3974 = vmatpush.bf16.msrb.mxu0 %v5262_v43  ;;  %6712 = vset.pattern.permute.xlu1 %v6823_v28 }
 0x301   :  { %v5771_v8 = vld [vmem:[#allocation7 + $0xcb8] sm:$0xf0]  ;;  %6711 = vset.pattern.permute.xlu0 %v6823_v28 }
 0x302   :  { %v6658_v37 = vld [vmem:[#allocation7 + $0xe9c] sm:$0xf]  ;;  %v5774_v2 = vor.u32 %v6594_v34, %v5771_v8  ;;  %3987 = vmatpush.bf16.msrb.mxu1 %v5518_v48 }
 0x303   :  { %v6027_v39 = vld [vmem:[#allocation7 + $0xeb8] sm:$0xf0] }
 0x304   :  { %v6458_v52 = vld [vmem:[#allocation7 + $0x85c] sm:$0xf]  ;;  %v6030_v55 = vor.u32 %v6658_v37, %v6027_v39  ;;  %4000 = vmatpush.bf16.msrb.mxu2 %v5774_v2 }
 0x305   :  { %v5227_v30 = vld [vmem:[#allocation7 + $0x878] sm:$0xf0] }
 0x306   :  { %v6522_v53 = vld [vmem:[#allocation7 + $0xa5c] sm:$0xf]  ;;  %v5230_v47 = vor.u32 %v6458_v52, %v5227_v30  ;;  %4013 = vmatpush.bf16.msrb.mxu3 %v6030_v55  ;;  %v3822_v15 = vpop.f32.mrf.mxu0  ;;  %v3848_v16 = vpop.f32.mrf.mxu2 }
 0x307   :  { %v5483_v56 = vld [vmem:[#allocation7 + $0xa78] sm:$0xf0] }
 0x308   :  { %v6586_v57 = vld [vmem:[#allocation7 + $0xc5c] sm:$0xf]  ;;  %v5486_v61 = vor.u32 %v6522_v53, %v5483_v56  ;;  %3975 = vmatpush.bf16.msrb.mxu0 %v5230_v47 }
 0x309   :  { %v5739_v58 = vld [vmem:[#allocation7 + $0xc78] sm:$0xf0] }
 0x30a   :  { %v6650_v59 = vld [vmem:[#allocation7 + $0xe5c] sm:$0xf]  ;;  %v5742_v62 = vor.u32 %v6586_v57, %v5739_v58  ;;  %3988 = vmatpush.bf16.msrb.mxu1 %v5486_v61 }
 0x30b   :  { %v5995_v60 = vld [vmem:[#allocation7 + $0xe78] sm:$0xf0] }
 0x30c   :  { %v6450_v63 = vld [vmem:[#allocation7 + $0x81c] sm:$0xf]  ;;  %v5998_v4 = vor.u32 %v6650_v59, %v5995_v60  ;;  %4001 = vmatpush.bf16.msrb.mxu2 %v5742_v62 }
 0x30d   :  { %v5195_v0 = vld [vmem:[#allocation7 + $0x838] sm:$0xf0] }
 0x30e   :  { %v6514_v1 = vld [vmem:[#allocation7 + $0xa1c] sm:$0xf]  ;;  %v5198_v6 = vor.u32 %v6450_v63, %v5195_v0  ;;  %4014 = vmatpush.bf16.msrb.mxu3 %v5998_v4  ;;  %v3824_v34 = vpop.f32.mrf.mxu0  ;;  %v3850_v35 = vpop.f32.mrf.mxu2 }
 0x30f   :  { %v5451_v5 = vld [vmem:[#allocation7 + $0xa38] sm:$0xf0] }
 0x310   :  { %v6578_v7 = vld [vmem:[#allocation7 + $0xc1c] sm:$0xf]  ;;  %v5454_v13 = vor.u32 %v6514_v1, %v5451_v5  ;;  %3976 = vmatpush.bf16.msrb.mxu0 %v5198_v6 }
 0x311   :  { %v5707_v9 = vld [vmem:[#allocation7 + $0xc38] sm:$0xf0] }
 0x312   :  { %v6642_v11 = vld [vmem:[#allocation7 + $0xe1c] sm:$0xf]  ;;  %v5710_v21 = vor.u32 %v6578_v7, %v5707_v9  ;;  %3989 = vmatpush.bf16.msrb.mxu1 %v5454_v13 }
 0x313   :  { %v5963_v20 = vld [vmem:[#allocation7 + $0xe38] sm:$0xf0]  ;;  %3977 = vmatmul.bf16.vlgmr.msrb.gmra.mxu0 %v6868_v41  ;;  %v3785_v41 = vpop.f32.mrf.mxu1 }
 0x314   :  { %v5966_v14 = vor.u32 %v6642_v11, %v5963_v20  ;;  %4002 = vmatpush.bf16.msrb.mxu2 %v5710_v21  ;;  %v4074_v29 = vld [vmem:[#allocation3] sm:$0xff] }
 0x315   :  { %3990 = vmatmul.bf16.vlgmr.msrb.gmra.mxu1 %v6872_v44  ;;  %v4080_v44 = vmul.f32 %v4071_v12, %v4071_v12 }
 0x316   :  { %4015 = vmatpush.bf16.msrb.mxu3 %v5966_v14 }
 0x317   :  { %4003 = vmatmul.bf16.vlgmr.msrb.gmra.mxu2 %v6866_v38  ;;  %v3811_v38 = vpop.f32.mrf.mxu3 }
 0x319   :  { %4016 = vmatmul.bf16.vlgmr.msrb.gmra.mxu3 %v6870_v42  ;;  %v4087_v42 = vadd.f32 %v6962_v19, %v4080_v44  ;;  %v4056_v19 = vperm.slane %v6972_v40, 6 }
 0x31b   :  { %v3835_v31 = vpop.f32.mrf.mxu1 }
 0x31c   :  { %v3836_v49 = vadd.f32 %v3835_v31, %v3822_v15 }
 0x31e   :  { %v3849_v32 = vadd.f32 %v3848_v16, %v3836_v49 }
 0x31f   :  { %v3861_v51 = vpop.f32.mrf.mxu3 }
 0x320   :  { %v3862_v33 = vadd.f32 %v3861_v51, %v3849_v32 }
 0x323   :  { %v3837_v8 = vpop.f32.mrf.mxu1 }
 0x327   :  { %v3863_v36 = vpop.f32.mrf.mxu3 }
 0x333   :  { %v3874_v37 = vpop.f32.mrf.mxu0 }
 0x334   :  { %v3875_v39 = vadd.f32 %v3874_v37, %v3862_v33  ;;  %v4108_v33 = vlaneseq }
 0x335   :  { %v3887_v43 = vpop.f32.mrf.mxu1 }
 0x336   :  { %v3888_v45 = vadd.f32 %v3887_v43, %v3875_v39  ;;  %v4109_v34 = vand.u32 127, %v4108_v33 }
 0x338   :  { %vm4111_vm1 = vcmp.eq.s32.totalorder %v4109_v34, 1  ;;  %vm4110_vm2 = vcmp.eq.s32.totalorder %v4109_v34, 0 }
 0x33b   :  { %v3876_v30 = vpop.f32.mrf.mxu0 }
 0x33d   :  { %v3900_v46 = vpop.f32.mrf.mxu2  ;;  %v3889_v53 = vpop.f32.mrf.mxu1 }
 0x33e   :  { %v3901_v48 = vadd.f32 %v3900_v46, %v3888_v45 }
 0x33f   :  { %v3913_v2 = vpop.f32.mrf.mxu3 }
 0x340   :  { %v3914_v52 = vadd.f32 %v3913_v2, %v3901_v48 }
 0x342   :  { %v4072_v54 = vsub.f32 %v3914_v52, %v4056_v19 }
 0x344   :  { %v4081_v55 = vmul.f32 %v4072_v54, %v4072_v54 }
 0x345   :  { %v3902_v56 = vpop.f32.mrf.mxu2 }
 0x346   :  { %v4088_v58 = vadd.f32 %v4087_v42, %v4081_v55 }
 0x347   :  { %v3915_v57 = vpop.f32.mrf.mxu3 }
 0x353   :  { %v3926_v59 = vpop.f32.mrf.mxu0 }
 0x355   :  { %v3939_v60 = vpop.f32.mrf.mxu1 }
 0x356   :  { %v3940_v4 = vadd.f32 %v3939_v60, %v3926_v59 }
 0x35b   :  { %v3928_v62 = vpop.f32.mrf.mxu0 }
 0x35d   :  { %v3952_v47 = vpop.f32.mrf.mxu2  ;;  %v3941_v63 = vpop.f32.mrf.mxu1 }
 0x35e   :  { %v3953_v5 = vadd.f32 %v3952_v47, %v3940_v4 }
 0x35f   :  { %v3965_v61 = vpop.f32.mrf.mxu3 }
 0x360   :  { %v3966_v7 = vadd.f32 %v3965_v61, %v3953_v5 }
 0x365   :  { %v3954_v0 = vpop.f32.mrf.mxu2 }
 0x367   :  { %v3967_v1 = vpop.f32.mrf.mxu3 }
 0x390   :  { %v3978_v9 = vpop.f32.mrf.mxu0 }
 0x391   :  { %v3979_v11 = vadd.f32 %v3978_v9, %v3966_v7 }
 0x392   :  { %v3991_v10 = vpop.f32.mrf.mxu1 }
 0x393   :  { %v3992_v20 = vadd.f32 %v3991_v10, %v3979_v11 }
 0x398   :  { %v3980_v14 = vpop.f32.mrf.mxu0 }
 0x39a   :  { %v4004_v6 = vpop.f32.mrf.mxu2  ;;  %v3993_v18 = vpop.f32.mrf.mxu1 }
 0x39b   :  { %v4005_v13 = vadd.f32 %v4004_v6, %v3992_v20 }
 0x39c   :  { %v4017_v21 = vpop.f32.mrf.mxu3 }
 0x39d   :  { %v4018_v22 = vadd.f32 %v4017_v21, %v4005_v13 }
 0x39f   :  { %v4073_v23 = vsub.f32 %v4018_v22, %v4057_v17 }
 0x3a1   :  { %v4082_v24 = vmul.f32 %v4073_v23, %v4073_v23 }
 0x3a2   :  { %v4006_v25 = vpop.f32.mrf.mxu2 }
 0x3a3   :  { %v4089_v27 = vadd.f32 %v4088_v58, %v4082_v24 }
 0x3a4   :  { %v4019_v26 = vpop.f32.mrf.mxu3 }
 0x3a5   :  { %4090 = vadd.xlane.f32.xlu0 %v4089_v27 }
 0x418   :  { %v4091_v41 = vpop.xlane.xlu0 %4090 }
 0x419   :  { %v4092_v12 = vadd.f32 %v4091_v41, %v4074_v29 }
 0x41b   :  { %4094 = vst.msk [vmem:[#allocation3] sm:$0xff] %vm64_vm0, %v4092_v12 }
 0x422   :  { %v4097_v44 = vld [vmem:[#allocation3] sm:$0xff] }
 0x423   :  { %v4098_v50 = vsub.f32 0.0, %v4097_v44 }
 0x425   :  { %v4099_v38 = vadd.f32 432.27374, %v4098_v50 }
 0x427   :  { %v4100_v40 = vmax.f32 %v4099_v38, 0.0 }
 0x429   :  { %v4101_v42 = vsub.f32 0.0, %v4100_v40 }
 0x42b   :  { %v4102_v15 = vadd.f32 1.0, %v4101_v42 }
 0x42d   :  { %v4103_v31 = vmax.f32 %v4102_v15, 0.0 }
 0x42f   :  { %v4104_v49 = vmax.f32 %v4103_v31, 0.0  ;;  %v4105_v16 = vsub.f32 0.0, %v4103_v31 }
 0x431   :  { %4120 = vperm.xlu1 %6712, %v4104_v49   ;;  %v4106_v32 = vadd.f32 1.0, %v4105_v16 }
 0x433   :  { %v4107_v51 = vmax.f32 %v4106_v32, 0.0 }
 0x435   :  { %4114 = vperm.xlu0 %6711, %v4107_v51  }
 0x4a3   :  { %v4121_v35 = vpop.permute.xlu1 %4120 }
 0x4a7   :  { %v4115_v8 = vpop.permute.xlu0 %4114 }
 0x4a8   :  { %v4117_v36 = vsel %vm4111_vm1, %v4115_v8, 0.0 }
 0x4a9   :  { %v4123_v37 = vsel %vm4110_vm2, %v4121_v35, %v4117_v36 }
 0x4aa   :  { %4124 = vst [vmem:[#allocation10] sm:$0xff] %v4123_v37 }
 0x4ab   :  { %4135 = dma.vmem_to_hbm [thread:$0]  %s4131_s2, 128, %s4133_s30, [#allocation6]  }
 0x4ac   :  { %6815 = dma.done.wait [#allocation6], 128  }
 0x4ad   :  { %6816 = vsyncadd [#allocation6], 4294967168 }
 0x4ae   :  { %4140 = vsyncpa [#allocation5], 1 }
 0x4af   :  { %4141 = vsyncpa [#allocation8], 1 }
 0x4b0   :  { %4142 = vsyncpa [#allocation6], 1 }

</bundles_post_ra>
